<compile_context>
chip_gen: v6e
topology: v6e:2x2x1
jax: 0.10.0
libtpu: 0.0.40
codegen_flags: <defaults>
</compile_context>

<pallas_src>
import functools

import jax
import jax.numpy as jnp
from jax.experimental import pallas as pl
from jax.experimental.pallas import tpu as pltpu

FC_WIDTH = 256    # opt.fc_width
ACTION_DIM = 6    # opt.action_dim
HEAD_PAD = 128    # lane-dense padded width of the folded dueling head

# Per-layer M-tile caps (rows).  Double-buffered blocks stay well below v7x's
# 32 MiB scoped VMEM while being far larger than the old global 512-row tile.
CONV1_MAX_ROWS = 3200    # K=256  uint8 -> 0.8 MB / block
CONV2_MAX_ROWS = 2592    # K=512  bf16  -> 2.7 MB / block
CONV3_MAX_ROWS = 3136    # K=576  bf16  -> 3.6 MB / block
FC_MAX_ROWS = 1024       # K=3136 bf16  -> 6.4 MB / block

VMEM_LIMIT = 48 * 1024 * 1024   # actual block usage <~20 MiB, so v7x-safe too


def _cparams(ndims):
    return pltpu.CompilerParams(
        dimension_semantics=("parallel",) * ndims,
        vmem_limit_bytes=VMEM_LIMIT,
    )


def _tile_rows(m, unit, max_rows):
    """Largest multiple of `unit` that is <= min(m, max_rows) (at least `unit`)."""
    return unit * max(1, min(m // unit, max_rows // unit))


# ----------------------------- Pallas kernels ------------------------------ #

def _mm_kernel(x_ref, w_ref, b_ref, o_ref, *, relu, cast_x):
    """o = act(x @ w + b) for one M-tile."""
    x = x_ref[...]
    if cast_x:
        # uint8 observation tile: single widen u8 -> f32 -> bf16 (0..255 exact);
        # the /255 normalisation is pre-folded into w1, so no per-element scale.
        x = x.astype(jnp.float32).astype(w_ref.dtype)
    acc = jnp.dot(x, w_ref[...], preferred_element_type=jnp.float32) + b_ref[...]
    if relu:
        acc = jnp.maximum(acc, 0.0)
    o_ref[...] = acc.astype(o_ref.dtype)


def _fc_head_kernel(x_ref, wf_ref, bf_ref, wq_ref, bq_ref, q_ref):
    """Fused fc1 + folded dueling head: q = relu(x @ wf + bf) @ wq + bq."""
    h = jnp.dot(x_ref[...], wf_ref[...], preferred_element_type=jnp.float32)
    h = jnp.maximum(h + bf_ref[...], 0.0).astype(wq_ref.dtype)
    q = jnp.dot(h, wq_ref[...], preferred_element_type=jnp.float32) + bq_ref[...]
    q_ref[...] = q.astype(q_ref.dtype)


# ------------------------------ Pallas wrappers ----------------------------- #

def conv1_matmul(x, w, b, *, out_dtype=jnp.bfloat16):
    """conv1 for BOTH nets at once: x [M,256] uint8 (shared patches), w [256,64]."""
    M, K = x.shape
    _, N = w.shape
    tm = _tile_rows(M, 400, CONV1_MAX_ROWS)        # multiples of 400 rows / image
    return pl.pallas_call(
        functools.partial(_mm_kernel, relu=True, cast_x=True),
        out_shape=jax.ShapeDtypeStruct((M, N), out_dtype),
        grid=(pl.cdiv(M, tm),),
        in_specs=[
            pl.BlockSpec((tm, K), lambda i: (i, 0)),
            pl.BlockSpec((K, N), lambda i: (0, 0)),
            pl.BlockSpec((1, N), lambda i: (0, 0)),
        ],
        out_specs=pl.BlockSpec((tm, N), lambda i: (i, 0)),
        compiler_params=_cparams(1),
    )(x, w, b)


def stacked_matmul(x, w, b, *, unit, max_rows, out_dtype=jnp.bfloat16):
    """Per-net matmul + bias + ReLU: x [2,M,K], w [2,K,N], b [2,1,N] -> [2,M,N]."""
    G, M, K = x.shape
    N = w.shape[2]
    tm = _tile_rows(M, unit, max_rows)
    return pl.pallas_call(
        functools.partial(_mm_kernel, relu=True, cast_x=False),
        out_shape=jax.ShapeDtypeStruct((G, M, N), out_dtype),
        grid=(G, pl.cdiv(M, tm)),
        in_specs=[
            pl.BlockSpec((None, tm, K), lambda n, i: (n, i, 0)),
            pl.BlockSpec((None, K, N), lambda n, i: (n, 0, 0)),
            pl.BlockSpec((None, 1, N), lambda n, i: (n, 0, 0)),
        ],
        out_specs=pl.BlockSpec((None, tm, N), lambda n, i: (n, i, 0)),
        compiler_params=_cparams(2),
    )(x, w, b)


def fc_head(flat, wf, bf, wq, bq):
    """Fused fc1 + folded dueling head.  flat [2,B,3136] -> [2,B,HEAD_PAD] f32."""
    G, M, K = flat.shape
    F = wf.shape[2]
    NQ = wq.shape[2]
    tm = _tile_rows(M, 1, FC_MAX_ROWS)
    return pl.pallas_call(
        _fc_head_kernel,
        out_shape=jax.ShapeDtypeStruct((G, M, NQ), jnp.float32),
        grid=(G, pl.cdiv(M, tm)),
        in_specs=[
            pl.BlockSpec((None, tm, K), lambda n, i: (n, i, 0)),
            pl.BlockSpec((None, K, F), lambda n, i: (n, 0, 0)),
            pl.BlockSpec((None, 1, F), lambda n, i: (n, 0, 0)),
            pl.BlockSpec((None, F, NQ), lambda n, i: (n, 0, 0)),
            pl.BlockSpec((None, 1, NQ), lambda n, i: (n, 0, 0)),
        ],
        out_specs=pl.BlockSpec((None, tm, NQ), lambda n, i: (n, i, 0)),
        compiler_params=_cparams(2),
    )(flat, wf, bf, wq, bq)


# ------------------------------- JAX glue ---------------------------------- #

def space_to_depth(x, r):
    """[..., H, W, C] -> [..., H/r, W/r, r*r*C]; depth order (ri, rj, c)."""
    *lead, H, W, C = x.shape
    n = len(lead)
    x = x.reshape(*lead, H // r, r, W // r, r, C)
    x = jnp.transpose(x, tuple(range(n)) + (n, n + 2, n + 1, n + 3, n + 4))
    return x.reshape(*lead, H // r, W // r, r * r * C)


def patchify(x, k):
    """[..., H, W, C] -> [..., H-k+1, W-k+1, k*k*C] via k*k stride-1 slices.

    Feature order (pi, pj, c); lane-dense output, only k*k XLA slices.
    """
    *_, H, W, _ = x.shape
    oh, ow = H - k + 1, W - k + 1
    cols = [x[..., i:i + oh, j:j + ow, :] for i in range(k) for j in range(k)]
    return jnp.concatenate(cols, axis=-1)


def _uniform(key, shape, fan):
    b = fan ** -0.5
    return jax.random.uniform(key, shape, jnp.float32, -b, b)


def _init_single_net(k):
    """One Duel_Q_Net, PyTorch-style U(-1/sqrt(fan_in), 1/sqrt(fan_in)) init.

    Weight layouts match the space-to-depth patch orders used in the forward
    pass; loading a real PyTorch checkpoint would need the same re-permutations
    plus the /255 and dueling-head folds.
    """
    ks = jax.random.split(k, 12)
    # conv1 8x8/stride4: s2d(4)+2x2 patch order (pi, pj, bi, bj, c), ki = 4*pi+bi.
    fan = 4 * 8 * 8
    w1 = _uniform(ks[0], (8, 8, 4, 32), fan)
    w1 = w1.reshape(2, 4, 2, 4, 4, 32).transpose(0, 2, 1, 3, 4, 5).reshape(256, 32)
    w1 = w1 / 255.0                                            # fold obs/255 into w1
    b1 = _uniform(ks[1], (32,), fan)
    # conv2 4x4/stride2: s2d(2)+2x2 patch order (pi, pj, ri, rj, c), ki = 2*pi+ri.
    fan = 32 * 4 * 4
    w2 = _uniform(ks[2], (4, 4, 32, 64), fan)
    w2 = w2.reshape(2, 2, 2, 2, 32, 64).transpose(0, 2, 1, 3, 4, 5).reshape(512, 64)
    b2 = _uniform(ks[3], (64,), fan)
    # conv3 3x3/stride1: plain (ki, kj, c) patch order.
    fan = 64 * 3 * 3
    w3 = _uniform(ks[4], (3, 3, 64, 64), fan).reshape(576, 64)
    b3 = _uniform(ks[5], (64,), fan)
    # fc1: rows in NHWC (h, w, c) flatten order of the conv3 activation.
    fan = 64 * 7 * 7
    wf = _uniform(ks[6], (3136, FC_WIDTH), fan)
    bf = _uniform(ks[7], (FC_WIDTH,), fan)
    # Dueling head folded into one linear layer, padded to 128 lanes:
    #   Q = V + (A - mean(A))  =>  W_q = (W_A - mean_cols(W_A)) + W_V, b_q likewise.
    fan = FC_WIDTH
    wa = _uniform(ks[8], (FC_WIDTH, ACTION_DIM), fan)
    ba = _uniform(ks[9], (ACTION_DIM,), fan)
    wv = _uniform(ks[10], (FC_WIDTH, 1), fan)
    bv = _uniform(ks[11], (1,), fan)
    wq = (wa - wa.mean(axis=1, keepdims=True)) + wv
    bq = (ba - ba.mean()) + bv
    wq = jnp.pad(wq, ((0, 0), (0, HEAD_PAD - ACTION_DIM)))
    bq = jnp.pad(bq, (0, HEAD_PAD - ACTION_DIM))
    return dict(w1=w1, b1=b1, w2=w2, b2=b2, w3=w3, b3=b3,
                wf=wf, bf=bf, wq=wq, bq=bq)


def init_double_duel_q_params(key):
    k1, k2 = jax.random.split(key)
    p1, p2 = _init_single_net(k1), _init_single_net(k2)
    params = {}
    # conv1: concatenate both nets on the output-channel axis (N = 64) so the
    # shared patch matrix is read once and the MXU columns are 2x fuller.
    params["w1"] = jnp.concatenate([p1["w1"], p2["w1"]], axis=1).astype(jnp.bfloat16)
    params["b1"] = jnp.concatenate([p1["b1"], p2["b1"]]).reshape(1, 64).astype(jnp.float32)
    # Remaining layers: stacked on a leading "net" axis of size 2.
    for name in ("w2", "w3", "wf", "wq"):
        params[name] = jnp.stack([p1[name], p2[name]], axis=0).astype(jnp.bfloat16)
    for name in ("b2", "b3", "bf", "bq"):
        params[name] = jnp.stack([p1[name], p2[name]], axis=0).reshape(2, 1, -1).astype(jnp.float32)
    return params


def double_duel_q_forward(params, obs):
    """obs: [B, 4, 84, 84] NCHW uint8.  Returns (q1, q2), each [B, ACTION_DIM] f32."""
    B = obs.shape[0]
    # NHWC; stay uint8 through the layout change and patch extraction.
    x = jnp.transpose(obs, (0, 2, 3, 1))                       # [B, 84, 84, 4]  u8

    # conv1 + ReLU for BOTH nets in one call (weights N-concatenated).
    x = space_to_depth(x, 4)                                   # [B, 21, 21, 64] u8
    cols = patchify(x, 2).reshape(B * 400, 256)                # [B*400, 256]    u8
    y = conv1_matmul(cols, params["w1"], params["b1"])         # [B*400, 64]     bf16

    # Split the two nets' channels and re-block for conv2.
    y = y.reshape(B, 20, 20, 2, 32).transpose(3, 0, 1, 2, 4)   # [2, B, 20, 20, 32]
    y = space_to_depth(y, 2)                                   # [2, B, 10, 10, 128]
    cols = patchify(y, 2).reshape(2, B * 81, 512)
    y = stacked_matmul(cols, params["w2"], params["b2"],
                       unit=81, max_rows=CONV2_MAX_ROWS)       # [2, B*81, 64]

    # conv3 + ReLU
    y = y.reshape(2, B, 9, 9, 64)
    cols = patchify(y, 3).reshape(2, B * 49, 576)
    y = stacked_matmul(cols, params["w3"], params["b3"],
                       unit=49, max_rows=CONV3_MAX_ROWS)       # [2, B*49, 64]

    # NHWC flatten (free reshape; wf rows are in (h, w, c) order, no transpose).
    flat = y.reshape(2, B, 49 * 64)                            # [2, B, 3136]

    # fc1 + ReLU + folded dueling head, fused; lane-dense (128) padded output.
    q = fc_head(flat, params["wf"], params["bf"], params["wq"], params["bq"])
    q = q[:, :, :ACTION_DIM]                                   # drop zero padding
    return q[0], q[1]


# --------------------------------- main ------------------------------------ #

if __name__ == "__main__":
    key = jax.random.PRNGKey(0)
    kp, kx = jax.random.split(key)
    params = init_double_duel_q_params(kp)

    # Atari-style frame stack: 84x84 is required by the Linear(64*7*7, fc_width) layer.
    obs = jax.random.randint(kx, (2, 4, 84, 84), 0, 256, dtype=jnp.int32).astype(jnp.uint8)

    fwd = jax.jit(double_duel_q_forward)
    q1, q2 = fwd(params, obs)
    jax.block_until_ready((q1, q2))

    assert q1.shape == (2, ACTION_DIM) and q2.shape == (2, ACTION_DIM)
    assert q1.dtype == jnp.float32 and q2.dtype == jnp.float32
    assert bool(jnp.all(jnp.isfinite(q1))) and bool(jnp.all(jnp.isfinite(q2)))
    print("KERNEL_OK")
</pallas_src>

<mosaic_0001>
module attributes {stable_mosaic.version = 11 : i64} {
  func.func @_mm_kernel(%arg0: i32, %arg1: memref<800x256xi8, #tpu.memory_space<vmem>>, %arg2: memref<256x64xbf16, #tpu.memory_space<vmem>>, %arg3: memref<1x64xf32, #tpu.memory_space<vmem>>, %arg4: memref<800x64xbf16, #tpu.memory_space<vmem>>) attributes {dimension_semantics = [#tpu.dimension_semantics<parallel>], iteration_bounds = array<i64: 1>, scalar_prefetch = 0 : i64, scratch_operands = 0 : i64, tpu.core_type = #tpu.core_type<tc>, window_params = [{transform_indices = @transform_0, window_bounds = array<i64: 800, 256>}, {pipeline_mode = #tpu.pipeline_mode<synchronous>, transform_indices = @transform_1, window_bounds = array<i64: 256, 64>}, {pipeline_mode = #tpu.pipeline_mode<synchronous>, transform_indices = @transform_2, window_bounds = array<i64: 1, 64>}, {transform_indices = @transform_3, window_bounds = array<i64: 800, 64>}]} {
    %c0 = arith.constant 0 : index
    %c0_0 = arith.constant 0 : index
    %0 = vector.load %arg1[%c0, %c0_0] : memref<800x256xi8, #tpu.memory_space<vmem>>, vector<800x256xi8>
    %1 = arith.uitofp %0 : vector<800x256xi8> to vector<800x256xf32>
    %2 = arith.truncf %1 : vector<800x256xf32> to vector<800x256xbf16>
    %c0_1 = arith.constant 0 : index
    %c0_2 = arith.constant 0 : index
    %3 = vector.load %arg2[%c0_1, %c0_2] : memref<256x64xbf16, #tpu.memory_space<vmem>>, vector<256x64xbf16>
    %cst = arith.constant dense<0.000000e+00> : vector<800x64xf32>
    %4 = tpu.matmul %2, %3, %cst {dimension_numbers = #tpu.dot_dimension_numbers<[1], [0], [0], [1], [0, 0, 1, 1], [], []>} : vector<800x256xbf16>, vector<256x64xbf16>, vector<800x64xf32> -> vector<800x64xf32>
    %c0_3 = arith.constant 0 : index
    %c0_4 = arith.constant 0 : index
    %5 = vector.load %arg3[%c0_3, %c0_4] : memref<1x64xf32, #tpu.memory_space<vmem>>, vector<1x64xf32>
    %6 = vector.broadcast %5 : vector<1x64xf32> to vector<800x64xf32>
    %7 = arith.addf %4, %6 : vector<800x64xf32>
    %cst_5 = arith.constant 0.000000e+00 : f32
    %8 = vector.broadcast %cst_5 : f32 to vector<800x64xf32>
    %9 = arith.maximumf %7, %8 : vector<800x64xf32>
    %10 = arith.truncf %9 : vector<800x64xf32> to vector<800x64xbf16>
    %c0_6 = arith.constant 0 : index
    %c0_7 = arith.constant 0 : index
    %11 = vector.load %arg4[%c0_6, %c0_7] : memref<800x64xbf16, #tpu.memory_space<vmem>>, vector<800x64xbf16>
    tpu.vector_store %arg4[%c0_6, %c0_7], %10 {strides = array<i32>} : memref<800x64xbf16, #tpu.memory_space<vmem>>, vector<800x64xbf16>,
    return
  }
  func.func @transform_0(%arg0: i32) -> (i32, i32) {
    %c0_i32 = arith.constant 0 : i32
    %c0_i32_0 = arith.constant 0 : i32
    return %arg0, %c0_i32 : i32, i32
  }
  func.func @transform_1(%arg0: i32) -> (i32, i32) {
    %c0_i32 = arith.constant 0 : i32
    %c0_i32_0 = arith.constant 0 : i32
    %c0_i32_1 = arith.constant 0 : i32
    return %c0_i32, %c0_i32_0 : i32, i32
  }
  func.func @transform_2(%arg0: i32) -> (i32, i32) {
    %c0_i32 = arith.constant 0 : i32
    %c0_i32_0 = arith.constant 0 : i32
    %c0_i32_1 = arith.constant 0 : i32
    return %c0_i32, %c0_i32_0 : i32, i32
  }
  func.func @transform_3(%arg0: i32) -> (i32, i32) {
    %c0_i32 = arith.constant 0 : i32
    %c0_i32_0 = arith.constant 0 : i32
    return %arg0, %c0_i32 : i32, i32
  }
}

module attributes {stable_mosaic.version = 11 : i64} {
  func.func @_mm_kernel(%arg0: i32, %arg1: i32, %arg2: memref<1x162x512xbf16, #tpu.memory_space<vmem>>, %arg3: memref<1x512x64xbf16, #tpu.memory_space<vmem>>, %arg4: memref<1x1x64xf32, #tpu.memory_space<vmem>>, %arg5: memref<1x162x64xbf16, #tpu.memory_space<vmem>>) attributes {dimension_semantics = [#tpu.dimension_semantics<parallel>, #tpu.dimension_semantics<parallel>], iteration_bounds = array<i64: 2, 1>, scalar_prefetch = 0 : i64, scratch_operands = 0 : i64, tpu.core_type = #tpu.core_type<tc>, window_params = [{transform_indices = @transform_0, window_bounds = array<i64: 1, 162, 512>}, {transform_indices = @transform_1, window_bounds = array<i64: 1, 512, 64>}, {transform_indices = @transform_2, window_bounds = array<i64: 1, 1, 64>}, {transform_indices = @transform_3, window_bounds = array<i64: 1, 162, 64>}]} {
    %c0 = arith.constant 0 : index
    %c0_0 = arith.constant 0 : index
    %c0_1 = arith.constant 0 : index
    %0 = vector.load %arg2[%c0, %c0_0, %c0_1] : memref<1x162x512xbf16, #tpu.memory_space<vmem>>, vector<1x162x512xbf16>
    %1 = vector.shape_cast %0 : vector<1x162x512xbf16> to vector<162x512xbf16>
    %c0_2 = arith.constant 0 : index
    %c0_3 = arith.constant 0 : index
    %c0_4 = arith.constant 0 : index
    %2 = vector.load %arg3[%c0_2, %c0_3, %c0_4] : memref<1x512x64xbf16, #tpu.memory_space<vmem>>, vector<1x512x64xbf16>
    %3 = vector.shape_cast %2 : vector<1x512x64xbf16> to vector<512x64xbf16>
    %cst = arith.constant dense<0.000000e+00> : vector<162x64xf32>
    %4 = tpu.matmul %1, %3, %cst {dimension_numbers = #tpu.dot_dimension_numbers<[1], [0], [0], [1], [0, 0, 1, 1], [], []>} : vector<162x512xbf16>, vector<512x64xbf16>, vector<162x64xf32> -> vector<162x64xf32>
    %c0_5 = arith.constant 0 : index
    %c0_6 = arith.constant 0 : index
    %c0_7 = arith.constant 0 : index
    %5 = vector.load %arg4[%c0_5, %c0_6, %c0_7] : memref<1x1x64xf32, #tpu.memory_space<vmem>>, vector<1x1x64xf32>
    %6 = vector.shape_cast %5 : vector<1x1x64xf32> to vector<1x64xf32>
    %7 = vector.broadcast %6 : vector<1x64xf32> to vector<162x64xf32>
    %8 = arith.addf %4, %7 : vector<162x64xf32>
    %cst_8 = arith.constant 0.000000e+00 : f32
    %9 = vector.broadcast %cst_8 : f32 to vector<162x64xf32>
    %10 = arith.maximumf %8, %9 : vector<162x64xf32>
    %11 = arith.truncf %10 : vector<162x64xf32> to vector<162x64xbf16>
    %c0_9 = arith.constant 0 : index
    %c0_10 = arith.constant 0 : index
    %c0_11 = arith.constant 0 : index
    %12 = vector.load %arg5[%c0_9, %c0_10, %c0_11] : memref<1x162x64xbf16, #tpu.memory_space<vmem>>, vector<1x162x64xbf16>
    %13 = vector.shape_cast %12 : vector<1x162x64xbf16> to vector<162x64xbf16>
    %14 = vector.shape_cast %11 : vector<162x64xbf16> to vector<1x162x64xbf16>
    tpu.vector_store %arg5[%c0_9, %c0_10, %c0_11], %14 {strides = array<i32>} : memref<1x162x64xbf16, #tpu.memory_space<vmem>>, vector<1x162x64xbf16>,
    return
  }
  func.func @transform_0(%arg0: i32, %arg1: i32) -> (i32, i32, i32) {
    %c0_i32 = arith.constant 0 : i32
    %c0_i32_0 = arith.constant 0 : i32
    return %arg0, %arg1, %c0_i32 : i32, i32, i32
  }
  func.func @transform_1(%arg0: i32, %arg1: i32) -> (i32, i32, i32) {
    %c0_i32 = arith.constant 0 : i32
    %c0_i32_0 = arith.constant 0 : i32
    %c0_i32_1 = arith.constant 0 : i32
    return %arg0, %c0_i32, %c0_i32_0 : i32, i32, i32
  }
  func.func @transform_2(%arg0: i32, %arg1: i32) -> (i32, i32, i32) {
    %c0_i32 = arith.constant 0 : i32
    %c0_i32_0 = arith.constant 0 : i32
    %c0_i32_1 = arith.constant 0 : i32
    return %arg0, %c0_i32, %c0_i32_0 : i32, i32, i32
  }
  func.func @transform_3(%arg0: i32, %arg1: i32) -> (i32, i32, i32) {
    %c0_i32 = arith.constant 0 : i32
    %c0_i32_0 = arith.constant 0 : i32
    return %arg0, %arg1, %c0_i32 : i32, i32, i32
  }
}

module attributes {stable_mosaic.version = 11 : i64} {
  func.func @_mm_kernel(%arg0: i32, %arg1: i32, %arg2: memref<1x98x576xbf16, #tpu.memory_space<vmem>>, %arg3: memref<1x576x64xbf16, #tpu.memory_space<vmem>>, %arg4: memref<1x1x64xf32, #tpu.memory_space<vmem>>, %arg5: memref<1x98x64xbf16, #tpu.memory_space<vmem>>) attributes {dimension_semantics = [#tpu.dimension_semantics<parallel>, #tpu.dimension_semantics<parallel>], iteration_bounds = array<i64: 2, 1>, scalar_prefetch = 0 : i64, scratch_operands = 0 : i64, tpu.core_type = #tpu.core_type<tc>, window_params = [{transform_indices = @transform_0, window_bounds = array<i64: 1, 98, 576>}, {transform_indices = @transform_1, window_bounds = array<i64: 1, 576, 64>}, {transform_indices = @transform_2, window_bounds = array<i64: 1, 1, 64>}, {transform_indices = @transform_3, window_bounds = array<i64: 1, 98, 64>}]} {
    %c0 = arith.constant 0 : index
    %c0_0 = arith.constant 0 : index
    %c0_1 = arith.constant 0 : index
    %0 = vector.load %arg2[%c0, %c0_0, %c0_1] : memref<1x98x576xbf16, #tpu.memory_space<vmem>>, vector<1x98x576xbf16>
    %1 = vector.shape_cast %0 : vector<1x98x576xbf16> to vector<98x576xbf16>
    %c0_2 = arith.constant 0 : index
    %c0_3 = arith.constant 0 : index
    %c0_4 = arith.constant 0 : index
    %2 = vector.load %arg3[%c0_2, %c0_3, %c0_4] : memref<1x576x64xbf16, #tpu.memory_space<vmem>>, vector<1x576x64xbf16>
    %3 = vector.shape_cast %2 : vector<1x576x64xbf16> to vector<576x64xbf16>
    %cst = arith.constant dense<0.000000e+00> : vector<98x64xf32>
    %4 = tpu.matmul %1, %3, %cst {dimension_numbers = #tpu.dot_dimension_numbers<[1], [0], [0], [1], [0, 0, 1, 1], [], []>} : vector<98x576xbf16>, vector<576x64xbf16>, vector<98x64xf32> -> vector<98x64xf32>
    %c0_5 = arith.constant 0 : index
    %c0_6 = arith.constant 0 : index
    %c0_7 = arith.constant 0 : index
    %5 = vector.load %arg4[%c0_5, %c0_6, %c0_7] : memref<1x1x64xf32, #tpu.memory_space<vmem>>, vector<1x1x64xf32>
    %6 = vector.shape_cast %5 : vector<1x1x64xf32> to vector<1x64xf32>
    %7 = vector.broadcast %6 : vector<1x64xf32> to vector<98x64xf32>
    %8 = arith.addf %4, %7 : vector<98x64xf32>
    %cst_8 = arith.constant 0.000000e+00 : f32
    %9 = vector.broadcast %cst_8 : f32 to vector<98x64xf32>
    %10 = arith.maximumf %8, %9 : vector<98x64xf32>
    %11 = arith.truncf %10 : vector<98x64xf32> to vector<98x64xbf16>
    %c0_9 = arith.constant 0 : index
    %c0_10 = arith.constant 0 : index
    %c0_11 = arith.constant 0 : index
    %12 = vector.load %arg5[%c0_9, %c0_10, %c0_11] : memref<1x98x64xbf16, #tpu.memory_space<vmem>>, vector<1x98x64xbf16>
    %13 = vector.shape_cast %12 : vector<1x98x64xbf16> to vector<98x64xbf16>
    %14 = vector.shape_cast %11 : vector<98x64xbf16> to vector<1x98x64xbf16>
    tpu.vector_store %arg5[%c0_9, %c0_10, %c0_11], %14 {strides = array<i32>} : memref<1x98x64xbf16, #tpu.memory_space<vmem>>, vector<1x98x64xbf16>,
    return
  }
  func.func @transform_0(%arg0: i32, %arg1: i32) -> (i32, i32, i32) {
    %c0_i32 = arith.constant 0 : i32
    %c0_i32_0 = arith.constant 0 : i32
    return %arg0, %arg1, %c0_i32 : i32, i32, i32
  }
  func.func @transform_1(%arg0: i32, %arg1: i32) -> (i32, i32, i32) {
    %c0_i32 = arith.constant 0 : i32
    %c0_i32_0 = arith.constant 0 : i32
    %c0_i32_1 = arith.constant 0 : i32
    return %arg0, %c0_i32, %c0_i32_0 : i32, i32, i32
  }
  func.func @transform_2(%arg0: i32, %arg1: i32) -> (i32, i32, i32) {
    %c0_i32 = arith.constant 0 : i32
    %c0_i32_0 = arith.constant 0 : i32
    %c0_i32_1 = arith.constant 0 : i32
    return %arg0, %c0_i32, %c0_i32_0 : i32, i32, i32
  }
  func.func @transform_3(%arg0: i32, %arg1: i32) -> (i32, i32, i32) {
    %c0_i32 = arith.constant 0 : i32
    %c0_i32_0 = arith.constant 0 : i32
    return %arg0, %arg1, %c0_i32 : i32, i32, i32
  }
}

module attributes {stable_mosaic.version = 11 : i64} {
  func.func @_fc_head_kernel(%arg0: i32, %arg1: i32, %arg2: memref<1x2x3136xbf16, #tpu.memory_space<vmem>>, %arg3: memref<1x3136x256xbf16, #tpu.memory_space<vmem>>, %arg4: memref<1x1x256xf32, #tpu.memory_space<vmem>>, %arg5: memref<1x256x128xbf16, #tpu.memory_space<vmem>>, %arg6: memref<1x1x128xf32, #tpu.memory_space<vmem>>, %arg7: memref<1x2x128xf32, #tpu.memory_space<vmem>>) attributes {dimension_semantics = [#tpu.dimension_semantics<parallel>, #tpu.dimension_semantics<parallel>], iteration_bounds = array<i64: 2, 1>, scalar_prefetch = 0 : i64, scratch_operands = 0 : i64, tpu.core_type = #tpu.core_type<tc>, window_params = [{transform_indices = @transform_0, window_bounds = array<i64: 1, 2, 3136>}, {transform_indices = @transform_1, window_bounds = array<i64: 1, 3136, 256>}, {transform_indices = @transform_2, window_bounds = array<i64: 1, 1, 256>}, {transform_indices = @transform_3, window_bounds = array<i64: 1, 256, 128>}, {transform_indices = @transform_4, window_bounds = array<i64: 1, 1, 128>}, {transform_indices = @transform_5, window_bounds = array<i64: 1, 2, 128>}]} {
    %c0 = arith.constant 0 : index
    %c0_0 = arith.constant 0 : index
    %c0_1 = arith.constant 0 : index
    %0 = vector.load %arg2[%c0, %c0_0, %c0_1] : memref<1x2x3136xbf16, #tpu.memory_space<vmem>>, vector<1x2x3136xbf16>
    %1 = vector.shape_cast %0 : vector<1x2x3136xbf16> to vector<2x3136xbf16>
    %c0_2 = arith.constant 0 : index
    %c0_3 = arith.constant 0 : index
    %c0_4 = arith.constant 0 : index
    %2 = vector.load %arg3[%c0_2, %c0_3, %c0_4] : memref<1x3136x256xbf16, #tpu.memory_space<vmem>>, vector<1x3136x256xbf16>
    %3 = vector.shape_cast %2 : vector<1x3136x256xbf16> to vector<3136x256xbf16>
    %cst = arith.constant dense<0.000000e+00> : vector<2x256xf32>
    %4 = tpu.matmul %1, %3, %cst {dimension_numbers = #tpu.dot_dimension_numbers<[1], [0], [0], [1], [0, 0, 1, 1], [], []>} : vector<2x3136xbf16>, vector<3136x256xbf16>, vector<2x256xf32> -> vector<2x256xf32>
    %c0_5 = arith.constant 0 : index
    %c0_6 = arith.constant 0 : index
    %c0_7 = arith.constant 0 : index
    %5 = vector.load %arg4[%c0_5, %c0_6, %c0_7] : memref<1x1x256xf32, #tpu.memory_space<vmem>>, vector<1x1x256xf32>
    %6 = vector.shape_cast %5 : vector<1x1x256xf32> to vector<1x256xf32>
    %7 = vector.broadcast %6 : vector<1x256xf32> to vector<2x256xf32>
    %8 = arith.addf %4, %7 : vector<2x256xf32>
    %cst_8 = arith.constant 0.000000e+00 : f32
    %9 = vector.broadcast %cst_8 : f32 to vector<2x256xf32>
    %10 = arith.maximumf %8, %9 : vector<2x256xf32>
    %11 = arith.truncf %10 : vector<2x256xf32> to vector<2x256xbf16>
    %c0_9 = arith.constant 0 : index
    %c0_10 = arith.constant 0 : index
    %c0_11 = arith.constant 0 : index
    %12 = vector.load %arg5[%c0_9, %c0_10, %c0_11] : memref<1x256x128xbf16, #tpu.memory_space<vmem>>, vector<1x256x128xbf16>
    %13 = vector.shape_cast %12 : vector<1x256x128xbf16> to vector<256x128xbf16>
    %cst_12 = arith.constant dense<0.000000e+00> : vector<2x128xf32>
    %14 = tpu.matmul %11, %13, %cst_12 {dimension_numbers = #tpu.dot_dimension_numbers<[1], [0], [0], [1], [0, 0, 1, 1], [], []>} : vector<2x256xbf16>, vector<256x128xbf16>, vector<2x128xf32> -> vector<2x128xf32>
    %c0_13 = arith.constant 0 : index
    %c0_14 = arith.constant 0 : index
    %c0_15 = arith.constant 0 : index
    %15 = vector.load %arg6[%c0_13, %c0_14, %c0_15] : memref<1x1x128xf32, #tpu.memory_space<vmem>>, vector<1x1x128xf32>
    %16 = vector.shape_cast %15 : vector<1x1x128xf32> to vector<1x128xf32>
    %17 = vector.broadcast %16 : vector<1x128xf32> to vector<2x128xf32>
    %18 = arith.addf %14, %17 : vector<2x128xf32>
    %c0_16 = arith.constant 0 : index
    %c0_17 = arith.constant 0 : index
    %c0_18 = arith.constant 0 : index
    %19 = vector.load %arg7[%c0_16, %c0_17, %c0_18] : memref<1x2x128xf32, #tpu.memory_space<vmem>>, vector<1x2x128xf32>
    %20 = vector.shape_cast %19 : vector<1x2x128xf32> to vector<2x128xf32>
    %21 = vector.shape_cast %18 : vector<2x128xf32> to vector<1x2x128xf32>
    tpu.vector_store %arg7[%c0_16, %c0_17, %c0_18], %21 {strides = array<i32>} : memref<1x2x128xf32, #tpu.memory_space<vmem>>, vector<1x2x128xf32>,
    return
  }
  func.func @transform_0(%arg0: i32, %arg1: i32) -> (i32, i32, i32) {
    %c0_i32 = arith.constant 0 : i32
    %c0_i32_0 = arith.constant 0 : i32
    return %arg0, %arg1, %c0_i32 : i32, i32, i32
  }
  func.func @transform_1(%arg0: i32, %arg1: i32) -> (i32, i32, i32) {
    %c0_i32 = arith.constant 0 : i32
    %c0_i32_0 = arith.constant 0 : i32
    %c0_i32_1 = arith.constant 0 : i32
    return %arg0, %c0_i32, %c0_i32_0 : i32, i32, i32
  }
  func.func @transform_2(%arg0: i32, %arg1: i32) -> (i32, i32, i32) {
    %c0_i32 = arith.constant 0 : i32
    %c0_i32_0 = arith.constant 0 : i32
    %c0_i32_1 = arith.constant 0 : i32
    return %arg0, %c0_i32, %c0_i32_0 : i32, i32, i32
  }
  func.func @transform_3(%arg0: i32, %arg1: i32) -> (i32, i32, i32) {
    %c0_i32 = arith.constant 0 : i32
    %c0_i32_0 = arith.constant 0 : i32
    %c0_i32_1 = arith.constant 0 : i32
    return %arg0, %c0_i32, %c0_i32_0 : i32, i32, i32
  }
  func.func @transform_4(%arg0: i32, %arg1: i32) -> (i32, i32, i32) {
    %c0_i32 = arith.constant 0 : i32
    %c0_i32_0 = arith.constant 0 : i32
    %c0_i32_1 = arith.constant 0 : i32
    return %arg0, %c0_i32, %c0_i32_0 : i32, i32, i32
  }
  func.func @transform_5(%arg0: i32, %arg1: i32) -> (i32, i32, i32) {
    %c0_i32 = arith.constant 0 : i32
    %c0_i32_0 = arith.constant 0 : i32
    return %arg0, %arg1, %c0_i32 : i32, i32, i32
  }
}

</mosaic_0001>

<bundles_post_ra>
// kernel: double_duel_q_forward.4
= control target key start
LH: loop header
LB: loop body
LE: loop exit
PB: predicated region body
PF: predicated region fallthrough
CT: control target
= control target key end

     0   :  { %v1605_v0 = vmov 0   ;;  %vm1233_vm0 = vcmask 519168   ;;  %s2378_s1 = inlined_call_operand.vmem [shape: bf16[256,64], index: 1, kind: input, shape index: {}]   ;;  %s2379_s0 = inlined_call_operand.vmem [shape: u8[800,256], index: 0, kind: input, shape index: {}]   ;;  %s2380_s2 = inlined_call_operand.vmem [shape: f32[1,64], index: 2, kind: input, shape index: {}]   ;;  %s2381_s3 = inlined_call_operand.vmem [shape: bf16[800,64], index: 3, kind: output, shape index: {}]  }
   0x1   :  { %300 = vmatprep.subr.bf16.mxu0 %v1605_v0  ;;  %1555 = vmatprep.subr.bf16.mxu1 %v1605_v0  ;;  %v1588_v1 = vld [vmem:[%s2378_s1 + $0x38] sm:$0xff]   ;;  %v1589_v2 = vld [vmem:[%s2378_s1 + $0x30] sm:$0xff]   ;;  %v1590_v3 = vld [vmem:[%s2378_s1 + $0x28] sm:$0xff]  }
   0x2   :  { %301 = vmatpush1.bf16.msra.mxu0 %v1588_v1  ;;  %1571 = vmatpush1.bf16.msra.mxu1 %v1588_v1  ;;  %v1591_v4 = vld [vmem:[%s2378_s1 + $0x20] sm:$0xff]   ;;  %v1592_v5 = vld [vmem:[%s2378_s1 + $0x18] sm:$0xff]   ;;  %v1654_v6 = vld [vmem:[%s2379_s0 + $0x8] sm:$0xff] }
   0x3   :  { %302 = vmatprep.subr.bf16.mxu0 %v1605_v0  ;;  %1556 = vmatprep.subr.bf16.mxu1 %v1605_v0  ;;  %v1659_v7 = vld [vmem:[%s2379_s0 + $0xc8] sm:$0xff]  ;;  %v66_v8 = vunpack.c.l.u8.bf16 %v1654_v6  ;;  %v1593_v10 = vld [vmem:[%s2378_s1 + $0x10] sm:$0xff]   ;;  %v1595_v12 = vld [vmem:[%s2378_s1] sm:$0xff]   ;;  %v68_v26 = vunpack.c.h.u8.bf16 %v1654_v6 }
   0x4   :  { %v116_v9 = vunpack.c.h.u8.bf16 %v1659_v7  ;;  %v1594_v11 = vld [vmem:[%s2378_s1 + $0x8] sm:$0xff]   ;;  %v1596_v13 = vld [vmem:[%s2378_s1 + $0x78] sm:$0xff]   ;;  %v1597_v14 = vld [vmem:[%s2378_s1 + $0x70] sm:$0xff]  }
   0x5   :  { %332 = vmatprep.mubr.bf16.mxu0 %v66_v8  ;;  %v1598_v15 = vld [vmem:[%s2378_s1 + $0x68] sm:$0xff]   ;;  %v1599_v16 = vld [vmem:[%s2378_s1 + $0x60] sm:$0xff]   ;;  %v1600_v17 = vld [vmem:[%s2378_s1 + $0x58] sm:$0xff]  }
   0x6   :  { %303 = vmatpush1.bf16.msra.mxu0 %v1589_v2  ;;  %1572 = vmatpush1.bf16.msra.mxu1 %v1589_v2  ;;  %v1601_v18 = vld [vmem:[%s2378_s1 + $0x50] sm:$0xff]   ;;  %v1602_v19 = vld [vmem:[%s2378_s1 + $0x48] sm:$0xff]   ;;  %v1603_v20 = vld [vmem:[%s2378_s1 + $0x40] sm:$0xff]  }
   0x7   :  { %304 = vmatprep.subr.bf16.mxu0 %v1605_v0  ;;  %1557 = vmatprep.subr.bf16.mxu1 %v1605_v0  ;;  %v15_v21 = vld [vmem:[%s2379_s0] sm:$0xff]  ;;  %v42_v23 = vld [vmem:[%s2379_s0 + $0xd8] sm:$0xff]  ;;  %v41_v28 = vld [vmem:[%s2379_s0 + $0xd0] sm:$0xff] }
   0x8   :  { %532 = vmatprep.mubr.bf16.mxu1 %v116_v9  ;;  %v1722_v22 = vld [vmem:[%s2379_s0 + $0xc0] sm:$0xff]  ;;  %v65_v24 = vunpack.c.l.u8.bf16 %v15_v21  ;;  %v118_v27 = vunpack.c.l.u8.bf16 %v42_v23  ;;  %v18_v29 = vld [vmem:[%s2379_s0 + $0x18] sm:$0xff]  ;;  %v67_v30 = vunpack.c.h.u8.bf16 %v15_v21  ;;  %v117_v31 = vunpack.c.l.u8.bf16 %v41_v28  ;;  %v17_v34 = vld [vmem:[%s2379_s0 + $0x10] sm:$0xff] }
   0x9   :  { %v115_v25 = vunpack.c.h.u8.bf16 %v1722_v22  ;;  %v70_v32 = vunpack.c.l.u8.bf16 %v18_v29  ;;  %v120_v33 = vunpack.c.h.u8.bf16 %v42_v23  ;;  %v44_v35 = vld [vmem:[%s2379_s0 + $0xe8] sm:$0xff]  ;;  %v69_v36 = vunpack.c.l.u8.bf16 %v17_v34  ;;  %v43_v40 = vld [vmem:[%s2379_s0 + $0xe0] sm:$0xff]  ;;  %v46_v47 = vld [vmem:[%s2379_s0 + $0xf8] sm:$0xff] }
   0xa   :  { %305 = vmatpush1.bf16.msra.mxu0 %v1590_v3  ;;  %1573 = vmatpush1.bf16.msra.mxu1 %v1590_v3  ;;  %v119_v37 = vunpack.c.h.u8.bf16 %v41_v28  ;;  %v72_v38 = vunpack.c.h.u8.bf16 %v18_v29  ;;  %v122_v39 = vunpack.c.l.u8.bf16 %v44_v35  ;;  %v20_v41 = vld [vmem:[%s2379_s0 + $0x28] sm:$0xff]  ;;  %v71_v42 = vunpack.c.h.u8.bf16 %v17_v34  ;;  %v19_v46 = vld [vmem:[%s2379_s0 + $0x20] sm:$0xff]  ;;  %v45_v52 = vld [vmem:[%s2379_s0 + $0xf0] sm:$0xff] }
   0xb   :  { %306 = vmatprep.subr.bf16.mxu0 %v1605_v0  ;;  %1558 = vmatprep.subr.bf16.mxu1 %v1605_v0  ;;  %v121_v43 = vunpack.c.l.u8.bf16 %v43_v40  ;;  %v74_v44 = vunpack.c.l.u8.bf16 %v20_v41  ;;  %v124_v45 = vunpack.c.h.u8.bf16 %v44_v35  ;;  %v73_v48 = vunpack.c.l.u8.bf16 %v19_v46  ;;  %v22_v53 = vld [vmem:[%s2379_s0 + $0x38] sm:$0xff]  ;;  %v21_v58 = vld [vmem:[%s2379_s0 + $0x30] sm:$0xff]  ;;  %v48_v59 = vld [vmem:[%s2379_s0 + $0x108] sm:$0xff] }
   0xc   :  { %v123_v49 = vunpack.c.h.u8.bf16 %v43_v40  ;;  %v76_v50 = vunpack.c.h.u8.bf16 %v20_v41  ;;  %v126_v51 = vunpack.c.l.u8.bf16 %v46_v47  ;;  %v75_v54 = vunpack.c.h.u8.bf16 %v19_v46  ;;  %v24_v1 = vld [vmem:[%s2379_s0 + $0x48] sm:$0xff]  ;;  %v23_v6 = vld [vmem:[%s2379_s0 + $0x40] sm:$0xff]  ;;  %v50_v8 = vld [vmem:[%s2379_s0 + $0x118] sm:$0xff] }
   0xd   :  { %v125_v55 = vunpack.c.l.u8.bf16 %v45_v52  ;;  %v78_v56 = vunpack.c.l.u8.bf16 %v22_v53  ;;  %v128_v57 = vunpack.c.h.u8.bf16 %v46_v47  ;;  %v77_v60 = vunpack.c.l.u8.bf16 %v21_v58 }
   0xe   :  { %307 = vmatpush1.bf16.msra.mxu0 %v1591_v4  ;;  %1574 = vmatpush1.bf16.msra.mxu1 %v1591_v4  ;;  %v127_v61 = vunpack.c.h.u8.bf16 %v45_v52  ;;  %v80_v62 = vunpack.c.h.u8.bf16 %v22_v53  ;;  %v130_v63 = vunpack.c.l.u8.bf16 %v48_v59  ;;  %v79_v2 = vunpack.c.h.u8.bf16 %v21_v58 }
   0xf   :  { %308 = vmatprep.subr.bf16.mxu0 %v1605_v0  ;;  %1559 = vmatprep.subr.bf16.mxu1 %v1605_v0  ;;  %v82_v4 = vunpack.c.l.u8.bf16 %v24_v1  ;;  %v81_v9 = vunpack.c.l.u8.bf16 %v23_v6 }
  0x12   :  { %309 = vmatpush1.bf16.msra.mxu0 %v1592_v5  ;;  %1575 = vmatpush1.bf16.msra.mxu1 %v1592_v5  ;;  %v132_v5 = vunpack.c.h.u8.bf16 %v48_v59 }
  0x13   :  { %310 = vmatprep.subr.bf16.mxu0 %v1605_v0  ;;  %1560 = vmatprep.subr.bf16.mxu1 %v1605_v0 }
  0x16   :  { %311 = vmatpush1.bf16.msra.mxu0 %v1593_v10  ;;  %1576 = vmatpush1.bf16.msra.mxu1 %v1593_v10 }
  0x17   :  { %312 = vmatprep.subr.bf16.mxu0 %v1605_v0  ;;  %1561 = vmatprep.subr.bf16.mxu1 %v1605_v0 }
  0x1a   :  { %313 = vmatpush1.bf16.msra.mxu0 %v1594_v11  ;;  %1577 = vmatpush1.bf16.msra.mxu1 %v1594_v11  ;;  %v84_v11 = vunpack.c.h.u8.bf16 %v24_v1 }
  0x1b   :  { %314 = vmatprep.subr.bf16.mxu0 %v1605_v0  ;;  %1562 = vmatprep.subr.bf16.mxu1 %v1605_v0 }
  0x1e   :  { %315 = vmatpush1.bf16.msra.mxu0 %v1595_v12  ;;  %1578 = vmatpush1.bf16.msra.mxu1 %v1595_v12  ;;  %v134_v12 = vunpack.c.l.u8.bf16 %v50_v8 }
  0x1f   :  { %316 = vmatprep.subr.bf16.mxu0 %v1605_v0  ;;  %1563 = vmatprep.subr.bf16.mxu1 %v1605_v0 }
  0x22   :  { %317 = vmatpush2.bf16.msra.mxu0 %v1596_v13  ;;  %1579 = vmatpush2.bf16.msra.mxu1 %v1596_v13  ;;  %v49_v13 = vld [vmem:[%s2379_s0 + $0x110] sm:$0xff] }
  0x23   :  { %318 = vmatprep.subr.bf16.mxu0 %v1605_v0  ;;  %1564 = vmatprep.subr.bf16.mxu1 %v1605_v0  ;;  %v135_v23 = vunpack.c.h.u8.bf16 %v49_v13 }
  0x26   :  { %319 = vmatpush2.bf16.msra.mxu0 %v1597_v14  ;;  %1580 = vmatpush2.bf16.msra.mxu1 %v1597_v14  ;;  %v26_v14 = vld [vmem:[%s2379_s0 + $0x58] sm:$0xff] }
  0x27   :  { %320 = vmatprep.subr.bf16.mxu0 %v1605_v0  ;;  %1565 = vmatprep.subr.bf16.mxu1 %v1605_v0 }
  0x2a   :  { %321 = vmatpush2.bf16.msra.mxu0 %v1598_v15  ;;  %1581 = vmatpush2.bf16.msra.mxu1 %v1598_v15  ;;  %v83_v15 = vunpack.c.h.u8.bf16 %v23_v6 }
  0x2b   :  { %322 = vmatprep.subr.bf16.mxu0 %v1605_v0  ;;  %1566 = vmatprep.subr.bf16.mxu1 %v1605_v0 }
  0x2e   :  { %323 = vmatpush2.bf16.msra.mxu0 %v1599_v16  ;;  %1582 = vmatpush2.bf16.msra.mxu1 %v1599_v16  ;;  %v133_v16 = vunpack.c.l.u8.bf16 %v49_v13 }
  0x2f   :  { %324 = vmatprep.subr.bf16.mxu0 %v1605_v0  ;;  %1567 = vmatprep.subr.bf16.mxu1 %v1605_v0 }
  0x32   :  { %325 = vmatpush2.bf16.msra.mxu0 %v1600_v17  ;;  %1583 = vmatpush2.bf16.msra.mxu1 %v1600_v17  ;;  %v86_v17 = vunpack.c.l.u8.bf16 %v26_v14 }
  0x33   :  { %326 = vmatprep.subr.bf16.mxu0 %v1605_v0  ;;  %1568 = vmatprep.subr.bf16.mxu1 %v1605_v0 }
  0x36   :  { %327 = vmatpush2.bf16.msra.mxu0 %v1601_v18  ;;  %1584 = vmatpush2.bf16.msra.mxu1 %v1601_v18  ;;  %v136_v18 = vunpack.c.h.u8.bf16 %v50_v8 }
  0x37   :  { %328 = vmatprep.subr.bf16.mxu0 %v1605_v0  ;;  %1569 = vmatprep.subr.bf16.mxu1 %v1605_v0 }
  0x3a   :  { %329 = vmatpush2.bf16.msra.mxu0 %v1602_v19  ;;  %1585 = vmatpush2.bf16.msra.mxu1 %v1602_v19  ;;  %v25_v19 = vld [vmem:[%s2379_s0 + $0x50] sm:$0xff] }
  0x3b   :  { %330 = vmatprep.subr.bf16.mxu0 %v1605_v0  ;;  %1570 = vmatprep.subr.bf16.mxu1 %v1605_v0  ;;  %v47_v0 = vld [vmem:[%s2379_s0 + $0x100] sm:$0xff]  ;;  %v85_v21 = vunpack.c.l.u8.bf16 %v25_v19  ;;  %v87_v28 = vunpack.c.h.u8.bf16 %v25_v19 }
  0x3c   :  { %v129_v3 = vunpack.c.l.u8.bf16 %v47_v0  ;;  %v131_v10 = vunpack.c.h.u8.bf16 %v47_v0 }
  0x3e   :  { %331 = vmatpush2.bf16.msra.mxu0 %v1603_v20  ;;  %1586 = vmatpush2.bf16.msra.mxu1 %v1603_v20  ;;  %v52_v20 = vld [vmem:[%s2379_s0 + $0x128] sm:$0xff] }
  0x41   :  { %333 = vmatmul.mubr.bf16.vlgmr.msra.gmra.mxu0 %v65_v24  ;;  %533 = vmatmul.mubr.bf16.vlgmr.msra.gmra.mxu1 %v115_v25  ;;  %v88_v24 = vunpack.c.h.u8.bf16 %v26_v14  ;;  %v138_v25 = vunpack.c.l.u8.bf16 %v52_v20 }
  0x42   :  { %340 = vmatprep.mubr.bf16.mxu0 %v68_v26  ;;  %540 = vmatprep.mubr.bf16.mxu1 %v118_v27  ;;  %v51_v26 = vld [vmem:[%s2379_s0 + $0x120] sm:$0xff]  ;;  %v28_v27 = vld [vmem:[%s2379_s0 + $0x68] sm:$0xff] }
  0x43   :  { %v137_v29 = vunpack.c.l.u8.bf16 %v51_v26  ;;  %v139_v35 = vunpack.c.h.u8.bf16 %v51_v26 }
  0x49   :  { %341 = vmatmul.mubr.bf16.gmra.mxu0 %v67_v30  ;;  %541 = vmatmul.mubr.bf16.gmra.mxu1 %v117_v31  ;;  %v90_v30 = vunpack.c.l.u8.bf16 %v28_v27  ;;  %v140_v31 = vunpack.c.h.u8.bf16 %v52_v20 }
  0x4a   :  { %348 = vmatprep.mubr.bf16.mxu0 %v70_v32  ;;  %548 = vmatprep.mubr.bf16.mxu1 %v120_v33  ;;  %v27_v32 = vld [vmem:[%s2379_s0 + $0x60] sm:$0xff]  ;;  %v54_v33 = vld [vmem:[%s2379_s0 + $0x138] sm:$0xff] }
  0x4b   :  { %v89_v34 = vunpack.c.l.u8.bf16 %v27_v32  ;;  %v91_v40 = vunpack.c.h.u8.bf16 %v27_v32 }
  0x51   :  { %349 = vmatmul.mubr.bf16.gmra.mxu0 %v69_v36  ;;  %549 = vmatmul.mubr.bf16.gmra.mxu1 %v119_v37  ;;  %v92_v36 = vunpack.c.h.u8.bf16 %v28_v27  ;;  %v142_v37 = vunpack.c.l.u8.bf16 %v54_v33 }
  0x52   :  { %356 = vmatprep.mubr.bf16.mxu0 %v72_v38  ;;  %556 = vmatprep.mubr.bf16.mxu1 %v122_v39  ;;  %v53_v38 = vld [vmem:[%s2379_s0 + $0x130] sm:$0xff]  ;;  %v30_v39 = vld [vmem:[%s2379_s0 + $0x78] sm:$0xff] }
  0x53   :  { %v141_v41 = vunpack.c.l.u8.bf16 %v53_v38  ;;  %v143_v47 = vunpack.c.h.u8.bf16 %v53_v38 }
  0x59   :  { %357 = vmatmul.mubr.bf16.gmra.mxu0 %v71_v42  ;;  %557 = vmatmul.mubr.bf16.gmra.mxu1 %v121_v43  ;;  %v94_v42 = vunpack.c.l.u8.bf16 %v30_v39  ;;  %v144_v43 = vunpack.c.h.u8.bf16 %v54_v33 }
  0x5a   :  { %364 = vmatprep.mubr.bf16.mxu0 %v74_v44  ;;  %564 = vmatprep.mubr.bf16.mxu1 %v124_v45  ;;  %v29_v44 = vld [vmem:[%s2379_s0 + $0x70] sm:$0xff]  ;;  %v56_v45 = vld [vmem:[%s2379_s0 + $0x148] sm:$0xff] }
  0x5b   :  { %v93_v46 = vunpack.c.l.u8.bf16 %v29_v44  ;;  %v95_v52 = vunpack.c.h.u8.bf16 %v29_v44 }
  0x61   :  { %365 = vmatmul.mubr.bf16.gmra.mxu0 %v73_v48  ;;  %565 = vmatmul.mubr.bf16.gmra.mxu1 %v123_v49  ;;  %v96_v48 = vunpack.c.h.u8.bf16 %v30_v39  ;;  %v146_v49 = vunpack.c.l.u8.bf16 %v56_v45  ;;  %v114_v39 = vunpack.c.l.u8.bf16 %v1659_v7 }
  0x62   :  { %372 = vmatprep.mubr.bf16.mxu0 %v76_v50  ;;  %572 = vmatprep.mubr.bf16.mxu1 %v126_v51  ;;  %v55_v50 = vld [vmem:[%s2379_s0 + $0x140] sm:$0xff]  ;;  %v32_v51 = vld [vmem:[%s2379_s0 + $0x88] sm:$0xff] }
  0x63   :  { %v145_v53 = vunpack.c.l.u8.bf16 %v55_v50  ;;  %v147_v59 = vunpack.c.h.u8.bf16 %v55_v50 }
  0x69   :  { %373 = vmatmul.mubr.bf16.gmra.mxu0 %v75_v54  ;;  %573 = vmatmul.mubr.bf16.gmra.mxu1 %v125_v55  ;;  %v98_v54 = vunpack.c.l.u8.bf16 %v32_v51  ;;  %v148_v55 = vunpack.c.h.u8.bf16 %v56_v45 }
  0x6a   :  { %380 = vmatprep.mubr.bf16.mxu0 %v78_v56  ;;  %580 = vmatprep.mubr.bf16.mxu1 %v128_v57  ;;  %v31_v56 = vld [vmem:[%s2379_s0 + $0x80] sm:$0xff]  ;;  %v58_v57 = vld [vmem:[%s2379_s0 + $0x158] sm:$0xff] }
  0x6b   :  { %v97_v58 = vunpack.c.l.u8.bf16 %v31_v56  ;;  %v99_v0 = vunpack.c.h.u8.bf16 %v31_v56 }
  0x71   :  { %381 = vmatmul.mubr.bf16.gmra.mxu0 %v77_v60  ;;  %581 = vmatmul.mubr.bf16.gmra.mxu1 %v127_v61  ;;  %v100_v60 = vunpack.c.h.u8.bf16 %v32_v51  ;;  %v150_v61 = vunpack.c.l.u8.bf16 %v58_v57 }
  0x72   :  { %388 = vmatprep.mubr.bf16.mxu0 %v80_v62  ;;  %588 = vmatprep.mubr.bf16.mxu1 %v130_v63  ;;  %v57_v62 = vld [vmem:[%s2379_s0 + $0x150] sm:$0xff]  ;;  %v34_v63 = vld [vmem:[%s2379_s0 + $0x98] sm:$0xff] }
  0x73   :  { %v149_v1 = vunpack.c.l.u8.bf16 %v57_v62  ;;  %v151_v8 = vunpack.c.h.u8.bf16 %v57_v62 }
  0x79   :  { %389 = vmatmul.mubr.bf16.gmra.mxu0 %v79_v2  ;;  %589 = vmatmul.mubr.bf16.gmra.mxu1 %v129_v3  ;;  %v102_v2 = vunpack.c.l.u8.bf16 %v34_v63  ;;  %v152_v3 = vunpack.c.h.u8.bf16 %v58_v57 }
  0x7a   :  { %396 = vmatprep.mubr.bf16.mxu0 %v82_v4  ;;  %596 = vmatprep.mubr.bf16.mxu1 %v132_v5  ;;  %v33_v4 = vld [vmem:[%s2379_s0 + $0x90] sm:$0xff]  ;;  %v60_v5 = vld [vmem:[%s2379_s0 + $0x168] sm:$0xff] }
  0x7b   :  { %v101_v6 = vunpack.c.l.u8.bf16 %v33_v4  ;;  %v103_v13 = vunpack.c.h.u8.bf16 %v33_v4 }
  0x81   :  { %397 = vmatmul.mubr.bf16.gmra.mxu0 %v81_v9  ;;  %597 = vmatmul.mubr.bf16.gmra.mxu1 %v131_v10  ;;  %v104_v9 = vunpack.c.h.u8.bf16 %v34_v63  ;;  %v154_v10 = vunpack.c.l.u8.bf16 %v60_v5 }
  0x82   :  { %404 = vmatprep.mubr.bf16.mxu0 %v84_v11  ;;  %604 = vmatprep.mubr.bf16.mxu1 %v134_v12  ;;  %v59_v11 = vld [vmem:[%s2379_s0 + $0x160] sm:$0xff]  ;;  %v36_v12 = vld [vmem:[%s2379_s0 + $0xa8] sm:$0xff] }
  0x83   :  { %v153_v14 = vunpack.c.l.u8.bf16 %v59_v11  ;;  %v155_v20 = vunpack.c.h.u8.bf16 %v59_v11 }
  0x89   :  { %405 = vmatmul.mubr.bf16.gmra.mxu0 %v83_v15  ;;  %605 = vmatmul.mubr.bf16.gmra.mxu1 %v133_v16  ;;  %v106_v15 = vunpack.c.l.u8.bf16 %v36_v12  ;;  %v156_v16 = vunpack.c.h.u8.bf16 %v60_v5 }
  0x8a   :  { %412 = vmatprep.mubr.bf16.mxu0 %v86_v17  ;;  %612 = vmatprep.mubr.bf16.mxu1 %v136_v18  ;;  %v35_v17 = vld [vmem:[%s2379_s0 + $0xa0] sm:$0xff]  ;;  %v62_v18 = vld [vmem:[%s2379_s0 + $0x178] sm:$0xff] }
  0x8b   :  { %v105_v19 = vunpack.c.l.u8.bf16 %v35_v17  ;;  %v107_v26 = vunpack.c.h.u8.bf16 %v35_v17 }
  0x91   :  { %413 = vmatmul.mubr.bf16.gmra.mxu0 %v85_v21  ;;  %613 = vmatmul.mubr.bf16.gmra.mxu1 %v135_v23  ;;  %v108_v21 = vunpack.c.h.u8.bf16 %v36_v12  ;;  %v158_v23 = vunpack.c.l.u8.bf16 %v62_v18 }
  0x92   :  { %420 = vmatprep.mubr.bf16.mxu0 %v88_v24  ;;  %620 = vmatprep.mubr.bf16.mxu1 %v138_v25  ;;  %v61_v24 = vld [vmem:[%s2379_s0 + $0x170] sm:$0xff]  ;;  %v38_v25 = vld [vmem:[%s2379_s0 + $0xb8] sm:$0xff] }
  0x93   :  { %v157_v27 = vunpack.c.l.u8.bf16 %v61_v24  ;;  %v159_v33 = vunpack.c.h.u8.bf16 %v61_v24 }
  0x99   :  { %421 = vmatmul.mubr.bf16.gmra.mxu0 %v87_v28  ;;  %621 = vmatmul.mubr.bf16.gmra.mxu1 %v137_v29  ;;  %v110_v28 = vunpack.c.l.u8.bf16 %v38_v25  ;;  %v160_v29 = vunpack.c.h.u8.bf16 %v62_v18 }
  0x9a   :  { %428 = vmatprep.mubr.bf16.mxu0 %v90_v30  ;;  %628 = vmatprep.mubr.bf16.mxu1 %v140_v31  ;;  %v37_v30 = vld [vmem:[%s2379_s0 + $0xb0] sm:$0xff]  ;;  %v64_v31 = vld [vmem:[%s2379_s0 + $0x188] sm:$0xff] }
  0x9b   :  { %v109_v32 = vunpack.c.l.u8.bf16 %v37_v30 }
  0xa1   :  { %429 = vmatmul.mubr.bf16.gmra.mxu0 %v89_v34  ;;  %629 = vmatmul.mubr.bf16.gmra.mxu1 %v139_v35  ;;  %v112_v34 = vunpack.c.h.u8.bf16 %v38_v25  ;;  %v162_v35 = vunpack.c.l.u8.bf16 %v64_v31 }
  0xa2   :  { %436 = vmatprep.mubr.bf16.mxu0 %v92_v36  ;;  %636 = vmatprep.mubr.bf16.mxu1 %v142_v37  ;;  %v63_v36 = vld [vmem:[%s2379_s0 + $0x180] sm:$0xff]  ;;  %v111_v37 = vunpack.c.h.u8.bf16 %v37_v30 }
  0xa3   :  { %v161_v38 = vunpack.c.l.u8.bf16 %v63_v36 }
  0xa9   :  { %437 = vmatmul.mubr.bf16.gmra.mxu0 %v91_v40  ;;  %637 = vmatmul.mubr.bf16.gmra.mxu1 %v141_v41  ;;  %v164_v40 = vunpack.c.h.u8.bf16 %v64_v31  ;;  %v113_v41 = vunpack.c.l.u8.bf16 %v1722_v22 }
  0xaa   :  { %444 = vmatprep.mubr.bf16.mxu0 %v94_v42  ;;  %644 = vmatprep.mubr.bf16.mxu1 %v144_v43  ;;  %v163_v42 = vunpack.c.h.u8.bf16 %v63_v36  ;;  %v1871_v43 = vld [vmem:[%s2380_s2] ss:$0 sm:$0xff] }
  0xb1   :  { %445 = vmatmul.mubr.bf16.gmra.mxu0 %v93_v46  ;;  %645 = vmatmul.mubr.bf16.gmra.mxu1 %v143_v47 }
  0xb2   :  { %452 = vmatprep.mubr.bf16.mxu0 %v96_v48  ;;  %652 = vmatprep.mubr.bf16.mxu1 %v146_v49 }
  0xb9   :  { %453 = vmatmul.mubr.bf16.gmra.mxu0 %v95_v52  ;;  %653 = vmatmul.mubr.bf16.gmra.mxu1 %v145_v53 }
  0xba   :  { %460 = vmatprep.mubr.bf16.mxu0 %v98_v54  ;;  %660 = vmatprep.mubr.bf16.mxu1 %v148_v55 }
  0xc1   :  { %461 = vmatmul.mubr.bf16.gmra.mxu0 %v97_v58  ;;  %661 = vmatmul.mubr.bf16.gmra.mxu1 %v147_v59 }
  0xc2   :  { %468 = vmatprep.mubr.bf16.mxu0 %v100_v60  ;;  %668 = vmatprep.mubr.bf16.mxu1 %v150_v61 }
  0xc9   :  { %469 = vmatmul.mubr.bf16.gmra.mxu0 %v99_v0  ;;  %669 = vmatmul.mubr.bf16.gmra.mxu1 %v149_v1 }
  0xca   :  { %476 = vmatprep.mubr.bf16.mxu0 %v102_v2  ;;  %676 = vmatprep.mubr.bf16.mxu1 %v152_v3 }
  0xd1   :  { %477 = vmatmul.mubr.bf16.gmra.mxu0 %v101_v6  ;;  %677 = vmatmul.mubr.bf16.gmra.mxu1 %v151_v8 }
  0xd2   :  { %484 = vmatprep.mubr.bf16.mxu0 %v104_v9  ;;  %684 = vmatprep.mubr.bf16.mxu1 %v154_v10 }
  0xd9   :  { %485 = vmatmul.mubr.bf16.gmra.mxu0 %v103_v13  ;;  %685 = vmatmul.mubr.bf16.gmra.mxu1 %v153_v14 }
  0xda   :  { %492 = vmatprep.mubr.bf16.mxu0 %v106_v15  ;;  %692 = vmatprep.mubr.bf16.mxu1 %v156_v16 }
  0xe1   :  { %493 = vmatmul.mubr.bf16.gmra.mxu0 %v105_v19  ;;  %693 = vmatmul.mubr.bf16.gmra.mxu1 %v155_v20 }
  0xe2   :  { %500 = vmatprep.mubr.bf16.mxu0 %v108_v21  ;;  %700 = vmatprep.mubr.bf16.mxu1 %v158_v23 }
  0xe9   :  { %501 = vmatmul.mubr.bf16.gmra.mxu0 %v107_v26  ;;  %701 = vmatmul.mubr.bf16.gmra.mxu1 %v157_v27 }
  0xea   :  { %508 = vmatprep.mubr.bf16.mxu0 %v110_v28  ;;  %708 = vmatprep.mubr.bf16.mxu1 %v160_v29 }
  0xf1   :  { %509 = vmatmul.mubr.bf16.gmra.mxu0 %v109_v32  ;;  %709 = vmatmul.mubr.bf16.gmra.mxu1 %v159_v33 }
  0xf2   :  { %516 = vmatprep.mubr.bf16.mxu0 %v112_v34  ;;  %716 = vmatprep.mubr.bf16.mxu1 %v162_v35 }
  0xf9   :  { %517 = vmatmul.mubr.bf16.gmra.mxu0 %v111_v37  ;;  %717 = vmatmul.mubr.bf16.gmra.mxu1 %v161_v38 }
  0xfa   :  { %524 = vmatprep.mubr.bf16.mxu0 %v114_v39  ;;  %724 = vmatprep.mubr.bf16.mxu1 %v164_v40 }
 0x101   :  { %v334_v44 = vpop.f32.mrf.mxu0  ;;  %525 = vmatmul.mubr.bf16.gmra.mxu0 %v113_v41  ;;  %v534_v45 = vpop.f32.mrf.mxu1  ;;  %725 = vmatmul.mubr.bf16.gmra.mxu1 %v163_v42 }
 0x102   :  { %v335_v46 = vadd.f32 %v1871_v43, %v334_v44  ;;  %v535_v7 = vadd.f32 %v1871_v43, %v534_v45 }
 0x103   :  { %v336_v47 = vpop.f32.mrf.mxu0  ;;  %v536_v48 = vpop.f32.mrf.mxu1 }
 0x104   :  { %v733_v49 = vmax.f32 %v335_v46, 0.0  ;;  %v783_v50 = vmax.f32 %v535_v7, 0.0 }
 0x105   :  { %v337_v22 = vpop.f32.mrf.mxu0  ;;  %v537_v51 = vpop.f32.mrf.mxu1 }
 0x106   :  { %v1455_v52 = vpack.c.bf16 %v733_v49, %v733_v49  ;;  %v1505_v53 = vpack.c.bf16 %v783_v50, %v783_v50  ;;  %v338_v54 = vadd.f32 %v1871_v43, %v337_v22  ;;  %v538_v55 = vadd.f32 %v1871_v43, %v537_v51 }
 0x107   :  { %v339_v56 = vpop.f32.mrf.mxu0  ;;  %v539_v57 = vpop.f32.mrf.mxu1 }
 0x108   :  { %1234 = vst.msk [vmem:[%s2381_s3] sm:$0xf] %vm1233_vm0, %v1455_v52  ;;  %1284 = vst.msk [vmem:[%s2381_s3 + $0xc8] sm:$0xf] %vm1233_vm0, %v1505_v53  ;;  %v734_v58 = vmax.f32 %v338_v54, 0.0  ;;  %v784_v59 = vmax.f32 %v538_v55, 0.0 }
 0x109   :  { %v342_v60 = vpop.f32.mrf.mxu0  ;;  %v542_v61 = vpop.f32.mrf.mxu1 }
 0x10a   :  { %v1456_v62 = vpack.c.bf16 %v734_v58, %v734_v58  ;;  %v1506_v63 = vpack.c.bf16 %v784_v59, %v784_v59  ;;  %v343_v0 = vadd.f32 %v1871_v43, %v342_v60  ;;  %v543_v1 = vadd.f32 %v1871_v43, %v542_v61 }
 0x10b   :  { %v344_v2 = vpop.f32.mrf.mxu0  ;;  %v544_v3 = vpop.f32.mrf.mxu1 }
 0x10c   :  { %1235 = vst.msk [vmem:[%s2381_s3 + $0x4] sm:$0xf] %vm1233_vm0, %v1456_v62  ;;  %1285 = vst.msk [vmem:[%s2381_s3 + $0xcc] sm:$0xf] %vm1233_vm0, %v1506_v63  ;;  %v735_v4 = vmax.f32 %v343_v0, 0.0  ;;  %v785_v5 = vmax.f32 %v543_v1, 0.0 }
 0x10d   :  { %v345_v6 = vpop.f32.mrf.mxu0  ;;  %v545_v8 = vpop.f32.mrf.mxu1 }
 0x10e   :  { %v1457_v9 = vpack.c.bf16 %v735_v4, %v735_v4  ;;  %v1507_v10 = vpack.c.bf16 %v785_v5, %v785_v5  ;;  %v346_v11 = vadd.f32 %v1871_v43, %v345_v6  ;;  %v546_v12 = vadd.f32 %v1871_v43, %v545_v8 }
 0x10f   :  { %v347_v13 = vpop.f32.mrf.mxu0  ;;  %v547_v14 = vpop.f32.mrf.mxu1 }
 0x110   :  { %1236 = vst.msk [vmem:[%s2381_s3 + $0x8] sm:$0xf] %vm1233_vm0, %v1457_v9  ;;  %1286 = vst.msk [vmem:[%s2381_s3 + $0xd0] sm:$0xf] %vm1233_vm0, %v1507_v10  ;;  %v736_v15 = vmax.f32 %v346_v11, 0.0  ;;  %v786_v16 = vmax.f32 %v546_v12, 0.0 }
 0x111   :  { %v350_v17 = vpop.f32.mrf.mxu0  ;;  %v550_v18 = vpop.f32.mrf.mxu1 }
 0x112   :  { %v1458_v19 = vpack.c.bf16 %v736_v15, %v736_v15  ;;  %v1508_v20 = vpack.c.bf16 %v786_v16, %v786_v16  ;;  %v351_v21 = vadd.f32 %v1871_v43, %v350_v17  ;;  %v551_v23 = vadd.f32 %v1871_v43, %v550_v18 }
 0x113   :  { %v352_v24 = vpop.f32.mrf.mxu0  ;;  %v552_v25 = vpop.f32.mrf.mxu1 }
 0x114   :  { %1237 = vst.msk [vmem:[%s2381_s3 + $0xc] sm:$0xf] %vm1233_vm0, %v1458_v19  ;;  %1287 = vst.msk [vmem:[%s2381_s3 + $0xd4] sm:$0xf] %vm1233_vm0, %v1508_v20  ;;  %v737_v26 = vmax.f32 %v351_v21, 0.0  ;;  %v787_v27 = vmax.f32 %v551_v23, 0.0 }
 0x115   :  { %v353_v28 = vpop.f32.mrf.mxu0  ;;  %v553_v29 = vpop.f32.mrf.mxu1 }
 0x116   :  { %v1459_v30 = vpack.c.bf16 %v737_v26, %v737_v26  ;;  %v1509_v31 = vpack.c.bf16 %v787_v27, %v787_v27  ;;  %v354_v32 = vadd.f32 %v1871_v43, %v353_v28  ;;  %v554_v33 = vadd.f32 %v1871_v43, %v553_v29 }
 0x117   :  { %v355_v34 = vpop.f32.mrf.mxu0  ;;  %v555_v35 = vpop.f32.mrf.mxu1 }
 0x118   :  { %1238 = vst.msk [vmem:[%s2381_s3 + $0x10] sm:$0xf] %vm1233_vm0, %v1459_v30  ;;  %1288 = vst.msk [vmem:[%s2381_s3 + $0xd8] sm:$0xf] %vm1233_vm0, %v1509_v31  ;;  %v738_v36 = vmax.f32 %v354_v32, 0.0  ;;  %v788_v37 = vmax.f32 %v554_v33, 0.0 }
 0x119   :  { %v358_v38 = vpop.f32.mrf.mxu0  ;;  %v558_v39 = vpop.f32.mrf.mxu1 }
 0x11a   :  { %v1460_v40 = vpack.c.bf16 %v738_v36, %v738_v36  ;;  %v1510_v41 = vpack.c.bf16 %v788_v37, %v788_v37  ;;  %v359_v42 = vadd.f32 %v1871_v43, %v358_v38  ;;  %v559_v44 = vadd.f32 %v1871_v43, %v558_v39 }
 0x11b   :  { %v360_v45 = vpop.f32.mrf.mxu0  ;;  %v560_v46 = vpop.f32.mrf.mxu1 }
 0x11c   :  { %1239 = vst.msk [vmem:[%s2381_s3 + $0x14] sm:$0xf] %vm1233_vm0, %v1460_v40  ;;  %1289 = vst.msk [vmem:[%s2381_s3 + $0xdc] sm:$0xf] %vm1233_vm0, %v1510_v41  ;;  %v739_v7 = vmax.f32 %v359_v42, 0.0  ;;  %v789_v47 = vmax.f32 %v559_v44, 0.0 }
 0x11d   :  { %v361_v48 = vpop.f32.mrf.mxu0  ;;  %v561_v49 = vpop.f32.mrf.mxu1 }
 0x11e   :  { %v1461_v50 = vpack.c.bf16 %v739_v7, %v739_v7  ;;  %v1511_v22 = vpack.c.bf16 %v789_v47, %v789_v47  ;;  %v362_v51 = vadd.f32 %v1871_v43, %v361_v48  ;;  %v562_v52 = vadd.f32 %v1871_v43, %v561_v49 }
 0x11f   :  { %v363_v53 = vpop.f32.mrf.mxu0  ;;  %v563_v54 = vpop.f32.mrf.mxu1 }
 0x120   :  { %1240 = vst.msk [vmem:[%s2381_s3 + $0x18] sm:$0xf] %vm1233_vm0, %v1461_v50  ;;  %1290 = vst.msk [vmem:[%s2381_s3 + $0xe0] sm:$0xf] %vm1233_vm0, %v1511_v22  ;;  %v740_v55 = vmax.f32 %v362_v51, 0.0  ;;  %v790_v56 = vmax.f32 %v562_v52, 0.0 }
 0x121   :  { %v366_v57 = vpop.f32.mrf.mxu0  ;;  %v566_v58 = vpop.f32.mrf.mxu1 }
 0x122   :  { %v1462_v59 = vpack.c.bf16 %v740_v55, %v740_v55  ;;  %v1512_v60 = vpack.c.bf16 %v790_v56, %v790_v56  ;;  %v367_v61 = vadd.f32 %v1871_v43, %v366_v57  ;;  %v567_v62 = vadd.f32 %v1871_v43, %v566_v58 }
 0x123   :  { %v368_v63 = vpop.f32.mrf.mxu0  ;;  %v568_v0 = vpop.f32.mrf.mxu1 }
 0x124   :  { %1241 = vst.msk [vmem:[%s2381_s3 + $0x1c] sm:$0xf] %vm1233_vm0, %v1462_v59  ;;  %1291 = vst.msk [vmem:[%s2381_s3 + $0xe4] sm:$0xf] %vm1233_vm0, %v1512_v60  ;;  %v741_v1 = vmax.f32 %v367_v61, 0.0  ;;  %v791_v2 = vmax.f32 %v567_v62, 0.0 }
 0x125   :  { %v369_v3 = vpop.f32.mrf.mxu0  ;;  %v569_v4 = vpop.f32.mrf.mxu1 }
 0x126   :  { %v1463_v5 = vpack.c.bf16 %v741_v1, %v741_v1  ;;  %v1513_v6 = vpack.c.bf16 %v791_v2, %v791_v2  ;;  %v370_v8 = vadd.f32 %v1871_v43, %v369_v3  ;;  %v570_v9 = vadd.f32 %v1871_v43, %v569_v4 }
 0x127   :  { %v371_v10 = vpop.f32.mrf.mxu0  ;;  %v571_v11 = vpop.f32.mrf.mxu1 }
 0x128   :  { %1242 = vst.msk [vmem:[%s2381_s3 + $0x20] sm:$0xf] %vm1233_vm0, %v1463_v5  ;;  %1292 = vst.msk [vmem:[%s2381_s3 + $0xe8] sm:$0xf] %vm1233_vm0, %v1513_v6  ;;  %v742_v12 = vmax.f32 %v370_v8, 0.0  ;;  %v792_v13 = vmax.f32 %v570_v9, 0.0 }
 0x129   :  { %v374_v14 = vpop.f32.mrf.mxu0  ;;  %v574_v15 = vpop.f32.mrf.mxu1 }
 0x12a   :  { %v1464_v16 = vpack.c.bf16 %v742_v12, %v742_v12  ;;  %v1514_v17 = vpack.c.bf16 %v792_v13, %v792_v13  ;;  %v375_v18 = vadd.f32 %v1871_v43, %v374_v14  ;;  %v575_v19 = vadd.f32 %v1871_v43, %v574_v15 }
 0x12b   :  { %v376_v20 = vpop.f32.mrf.mxu0  ;;  %v576_v21 = vpop.f32.mrf.mxu1 }
 0x12c   :  { %1243 = vst.msk [vmem:[%s2381_s3 + $0x24] sm:$0xf] %vm1233_vm0, %v1464_v16  ;;  %1293 = vst.msk [vmem:[%s2381_s3 + $0xec] sm:$0xf] %vm1233_vm0, %v1514_v17  ;;  %v743_v23 = vmax.f32 %v375_v18, 0.0  ;;  %v793_v24 = vmax.f32 %v575_v19, 0.0 }
 0x12d   :  { %v377_v25 = vpop.f32.mrf.mxu0  ;;  %v577_v26 = vpop.f32.mrf.mxu1 }
 0x12e   :  { %v1465_v27 = vpack.c.bf16 %v743_v23, %v743_v23  ;;  %v1515_v28 = vpack.c.bf16 %v793_v24, %v793_v24  ;;  %v378_v29 = vadd.f32 %v1871_v43, %v377_v25  ;;  %v578_v30 = vadd.f32 %v1871_v43, %v577_v26 }
 0x12f   :  { %v379_v31 = vpop.f32.mrf.mxu0  ;;  %v579_v32 = vpop.f32.mrf.mxu1 }
 0x130   :  { %1244 = vst.msk [vmem:[%s2381_s3 + $0x28] sm:$0xf] %vm1233_vm0, %v1465_v27  ;;  %1294 = vst.msk [vmem:[%s2381_s3 + $0xf0] sm:$0xf] %vm1233_vm0, %v1515_v28  ;;  %v744_v33 = vmax.f32 %v378_v29, 0.0  ;;  %v794_v34 = vmax.f32 %v578_v30, 0.0 }
 0x131   :  { %v382_v35 = vpop.f32.mrf.mxu0  ;;  %v582_v36 = vpop.f32.mrf.mxu1 }
 0x132   :  { %v1466_v37 = vpack.c.bf16 %v744_v33, %v744_v33  ;;  %v1516_v38 = vpack.c.bf16 %v794_v34, %v794_v34  ;;  %v383_v39 = vadd.f32 %v1871_v43, %v382_v35  ;;  %v583_v40 = vadd.f32 %v1871_v43, %v582_v36 }
 0x133   :  { %v384_v41 = vpop.f32.mrf.mxu0  ;;  %v584_v42 = vpop.f32.mrf.mxu1 }
 0x134   :  { %1245 = vst.msk [vmem:[%s2381_s3 + $0x2c] sm:$0xf] %vm1233_vm0, %v1466_v37  ;;  %1295 = vst.msk [vmem:[%s2381_s3 + $0xf4] sm:$0xf] %vm1233_vm0, %v1516_v38  ;;  %v745_v44 = vmax.f32 %v383_v39, 0.0  ;;  %v795_v45 = vmax.f32 %v583_v40, 0.0 }
 0x135   :  { %v385_v46 = vpop.f32.mrf.mxu0  ;;  %v585_v7 = vpop.f32.mrf.mxu1 }
 0x136   :  { %v1467_v47 = vpack.c.bf16 %v745_v44, %v745_v44  ;;  %v1517_v48 = vpack.c.bf16 %v795_v45, %v795_v45  ;;  %v386_v49 = vadd.f32 %v1871_v43, %v385_v46  ;;  %v586_v50 = vadd.f32 %v1871_v43, %v585_v7 }
 0x137   :  { %v387_v22 = vpop.f32.mrf.mxu0  ;;  %v587_v51 = vpop.f32.mrf.mxu1 }
 0x138   :  { %1246 = vst.msk [vmem:[%s2381_s3 + $0x30] sm:$0xf] %vm1233_vm0, %v1467_v47  ;;  %1296 = vst.msk [vmem:[%s2381_s3 + $0xf8] sm:$0xf] %vm1233_vm0, %v1517_v48  ;;  %v746_v52 = vmax.f32 %v386_v49, 0.0  ;;  %v796_v53 = vmax.f32 %v586_v50, 0.0 }
 0x139   :  { %v390_v54 = vpop.f32.mrf.mxu0  ;;  %v590_v55 = vpop.f32.mrf.mxu1 }
 0x13a   :  { %v1468_v56 = vpack.c.bf16 %v746_v52, %v746_v52  ;;  %v1518_v57 = vpack.c.bf16 %v796_v53, %v796_v53  ;;  %v391_v58 = vadd.f32 %v1871_v43, %v390_v54  ;;  %v591_v59 = vadd.f32 %v1871_v43, %v590_v55 }
 0x13b   :  { %v392_v60 = vpop.f32.mrf.mxu0  ;;  %v592_v61 = vpop.f32.mrf.mxu1 }
 0x13c   :  { %1247 = vst.msk [vmem:[%s2381_s3 + $0x34] sm:$0xf] %vm1233_vm0, %v1468_v56  ;;  %1297 = vst.msk [vmem:[%s2381_s3 + $0xfc] sm:$0xf] %vm1233_vm0, %v1518_v57  ;;  %v747_v62 = vmax.f32 %v391_v58, 0.0  ;;  %v797_v63 = vmax.f32 %v591_v59, 0.0 }
 0x13d   :  { %v393_v0 = vpop.f32.mrf.mxu0  ;;  %v593_v1 = vpop.f32.mrf.mxu1 }
 0x13e   :  { %v1469_v2 = vpack.c.bf16 %v747_v62, %v747_v62  ;;  %v1519_v3 = vpack.c.bf16 %v797_v63, %v797_v63  ;;  %v394_v4 = vadd.f32 %v1871_v43, %v393_v0  ;;  %v594_v5 = vadd.f32 %v1871_v43, %v593_v1 }
 0x13f   :  { %v395_v6 = vpop.f32.mrf.mxu0  ;;  %v595_v8 = vpop.f32.mrf.mxu1 }
 0x140   :  { %1248 = vst.msk [vmem:[%s2381_s3 + $0x38] sm:$0xf] %vm1233_vm0, %v1469_v2  ;;  %1298 = vst.msk [vmem:[%s2381_s3 + $0x100] sm:$0xf] %vm1233_vm0, %v1519_v3  ;;  %v748_v9 = vmax.f32 %v394_v4, 0.0  ;;  %v798_v10 = vmax.f32 %v594_v5, 0.0 }
 0x141   :  { %v398_v11 = vpop.f32.mrf.mxu0  ;;  %v598_v12 = vpop.f32.mrf.mxu1 }
 0x142   :  { %v1470_v13 = vpack.c.bf16 %v748_v9, %v748_v9  ;;  %v1520_v14 = vpack.c.bf16 %v798_v10, %v798_v10  ;;  %v399_v15 = vadd.f32 %v1871_v43, %v398_v11  ;;  %v599_v16 = vadd.f32 %v1871_v43, %v598_v12 }
 0x143   :  { %v400_v17 = vpop.f32.mrf.mxu0  ;;  %v600_v18 = vpop.f32.mrf.mxu1 }
 0x144   :  { %1249 = vst.msk [vmem:[%s2381_s3 + $0x3c] sm:$0xf] %vm1233_vm0, %v1470_v13  ;;  %1299 = vst.msk [vmem:[%s2381_s3 + $0x104] sm:$0xf] %vm1233_vm0, %v1520_v14  ;;  %v749_v19 = vmax.f32 %v399_v15, 0.0  ;;  %v799_v20 = vmax.f32 %v599_v16, 0.0 }
 0x145   :  { %v401_v21 = vpop.f32.mrf.mxu0  ;;  %v601_v23 = vpop.f32.mrf.mxu1 }
 0x146   :  { %v1471_v24 = vpack.c.bf16 %v749_v19, %v749_v19  ;;  %v1521_v25 = vpack.c.bf16 %v799_v20, %v799_v20  ;;  %v402_v26 = vadd.f32 %v1871_v43, %v401_v21  ;;  %v602_v27 = vadd.f32 %v1871_v43, %v601_v23 }
 0x147   :  { %v403_v28 = vpop.f32.mrf.mxu0  ;;  %v603_v29 = vpop.f32.mrf.mxu1 }
 0x148   :  { %1250 = vst.msk [vmem:[%s2381_s3 + $0x40] sm:$0xf] %vm1233_vm0, %v1471_v24  ;;  %1300 = vst.msk [vmem:[%s2381_s3 + $0x108] sm:$0xf] %vm1233_vm0, %v1521_v25  ;;  %v750_v30 = vmax.f32 %v402_v26, 0.0  ;;  %v800_v31 = vmax.f32 %v602_v27, 0.0 }
 0x149   :  { %v406_v32 = vpop.f32.mrf.mxu0  ;;  %v606_v33 = vpop.f32.mrf.mxu1 }
 0x14a   :  { %v1472_v34 = vpack.c.bf16 %v750_v30, %v750_v30  ;;  %v1522_v35 = vpack.c.bf16 %v800_v31, %v800_v31  ;;  %v407_v36 = vadd.f32 %v1871_v43, %v406_v32  ;;  %v607_v37 = vadd.f32 %v1871_v43, %v606_v33 }
 0x14b   :  { %v408_v38 = vpop.f32.mrf.mxu0  ;;  %v608_v39 = vpop.f32.mrf.mxu1 }
 0x14c   :  { %1251 = vst.msk [vmem:[%s2381_s3 + $0x44] sm:$0xf] %vm1233_vm0, %v1472_v34  ;;  %1301 = vst.msk [vmem:[%s2381_s3 + $0x10c] sm:$0xf] %vm1233_vm0, %v1522_v35  ;;  %v751_v40 = vmax.f32 %v407_v36, 0.0  ;;  %v801_v41 = vmax.f32 %v607_v37, 0.0 }
 0x14d   :  { %v409_v42 = vpop.f32.mrf.mxu0  ;;  %v609_v44 = vpop.f32.mrf.mxu1 }
 0x14e   :  { %v1473_v45 = vpack.c.bf16 %v751_v40, %v751_v40  ;;  %v1523_v46 = vpack.c.bf16 %v801_v41, %v801_v41  ;;  %v410_v7 = vadd.f32 %v1871_v43, %v409_v42  ;;  %v610_v47 = vadd.f32 %v1871_v43, %v609_v44 }
 0x14f   :  { %v411_v48 = vpop.f32.mrf.mxu0  ;;  %v611_v49 = vpop.f32.mrf.mxu1 }
 0x150   :  { %1252 = vst.msk [vmem:[%s2381_s3 + $0x48] sm:$0xf] %vm1233_vm0, %v1473_v45  ;;  %1302 = vst.msk [vmem:[%s2381_s3 + $0x110] sm:$0xf] %vm1233_vm0, %v1523_v46  ;;  %v752_v50 = vmax.f32 %v410_v7, 0.0  ;;  %v802_v22 = vmax.f32 %v610_v47, 0.0 }
 0x151   :  { %v414_v51 = vpop.f32.mrf.mxu0  ;;  %v614_v52 = vpop.f32.mrf.mxu1 }
 0x152   :  { %v1474_v53 = vpack.c.bf16 %v752_v50, %v752_v50  ;;  %v1524_v54 = vpack.c.bf16 %v802_v22, %v802_v22  ;;  %v415_v55 = vadd.f32 %v1871_v43, %v414_v51  ;;  %v615_v56 = vadd.f32 %v1871_v43, %v614_v52 }
 0x153   :  { %v416_v57 = vpop.f32.mrf.mxu0  ;;  %v616_v58 = vpop.f32.mrf.mxu1 }
 0x154   :  { %1253 = vst.msk [vmem:[%s2381_s3 + $0x4c] sm:$0xf] %vm1233_vm0, %v1474_v53  ;;  %1303 = vst.msk [vmem:[%s2381_s3 + $0x114] sm:$0xf] %vm1233_vm0, %v1524_v54  ;;  %v753_v59 = vmax.f32 %v415_v55, 0.0  ;;  %v803_v60 = vmax.f32 %v615_v56, 0.0 }
 0x155   :  { %v417_v61 = vpop.f32.mrf.mxu0  ;;  %v617_v62 = vpop.f32.mrf.mxu1 }
 0x156   :  { %v1475_v63 = vpack.c.bf16 %v753_v59, %v753_v59  ;;  %v1525_v0 = vpack.c.bf16 %v803_v60, %v803_v60  ;;  %v418_v1 = vadd.f32 %v1871_v43, %v417_v61  ;;  %v618_v2 = vadd.f32 %v1871_v43, %v617_v62 }
 0x157   :  { %v419_v3 = vpop.f32.mrf.mxu0  ;;  %v619_v4 = vpop.f32.mrf.mxu1 }
 0x158   :  { %1254 = vst.msk [vmem:[%s2381_s3 + $0x50] sm:$0xf] %vm1233_vm0, %v1475_v63  ;;  %1304 = vst.msk [vmem:[%s2381_s3 + $0x118] sm:$0xf] %vm1233_vm0, %v1525_v0  ;;  %v754_v5 = vmax.f32 %v418_v1, 0.0  ;;  %v804_v6 = vmax.f32 %v618_v2, 0.0 }
 0x159   :  { %v422_v8 = vpop.f32.mrf.mxu0  ;;  %v622_v9 = vpop.f32.mrf.mxu1 }
 0x15a   :  { %v1476_v10 = vpack.c.bf16 %v754_v5, %v754_v5  ;;  %v1526_v11 = vpack.c.bf16 %v804_v6, %v804_v6  ;;  %v423_v12 = vadd.f32 %v1871_v43, %v422_v8  ;;  %v623_v13 = vadd.f32 %v1871_v43, %v622_v9 }
 0x15b   :  { %v424_v14 = vpop.f32.mrf.mxu0  ;;  %v624_v15 = vpop.f32.mrf.mxu1 }
 0x15c   :  { %1255 = vst.msk [vmem:[%s2381_s3 + $0x54] sm:$0xf] %vm1233_vm0, %v1476_v10  ;;  %1305 = vst.msk [vmem:[%s2381_s3 + $0x11c] sm:$0xf] %vm1233_vm0, %v1526_v11  ;;  %v755_v16 = vmax.f32 %v423_v12, 0.0  ;;  %v805_v17 = vmax.f32 %v623_v13, 0.0 }
 0x15d   :  { %v425_v18 = vpop.f32.mrf.mxu0  ;;  %v625_v19 = vpop.f32.mrf.mxu1 }
 0x15e   :  { %v1477_v20 = vpack.c.bf16 %v755_v16, %v755_v16  ;;  %v1527_v21 = vpack.c.bf16 %v805_v17, %v805_v17  ;;  %v426_v23 = vadd.f32 %v1871_v43, %v425_v18  ;;  %v626_v24 = vadd.f32 %v1871_v43, %v625_v19 }
 0x15f   :  { %v427_v25 = vpop.f32.mrf.mxu0  ;;  %v627_v26 = vpop.f32.mrf.mxu1 }
 0x160   :  { %1256 = vst.msk [vmem:[%s2381_s3 + $0x58] sm:$0xf] %vm1233_vm0, %v1477_v20  ;;  %1306 = vst.msk [vmem:[%s2381_s3 + $0x120] sm:$0xf] %vm1233_vm0, %v1527_v21  ;;  %v756_v27 = vmax.f32 %v426_v23, 0.0  ;;  %v806_v28 = vmax.f32 %v626_v24, 0.0 }
 0x161   :  { %v430_v29 = vpop.f32.mrf.mxu0  ;;  %v630_v30 = vpop.f32.mrf.mxu1 }
 0x162   :  { %v1478_v31 = vpack.c.bf16 %v756_v27, %v756_v27  ;;  %v1528_v32 = vpack.c.bf16 %v806_v28, %v806_v28  ;;  %v431_v33 = vadd.f32 %v1871_v43, %v430_v29  ;;  %v631_v34 = vadd.f32 %v1871_v43, %v630_v30 }
 0x163   :  { %v432_v35 = vpop.f32.mrf.mxu0  ;;  %v632_v36 = vpop.f32.mrf.mxu1 }
 0x164   :  { %1257 = vst.msk [vmem:[%s2381_s3 + $0x5c] sm:$0xf] %vm1233_vm0, %v1478_v31  ;;  %1307 = vst.msk [vmem:[%s2381_s3 + $0x124] sm:$0xf] %vm1233_vm0, %v1528_v32  ;;  %v757_v37 = vmax.f32 %v431_v33, 0.0  ;;  %v807_v38 = vmax.f32 %v631_v34, 0.0 }
 0x165   :  { %v433_v39 = vpop.f32.mrf.mxu0  ;;  %v633_v40 = vpop.f32.mrf.mxu1 }
 0x166   :  { %v1479_v41 = vpack.c.bf16 %v757_v37, %v757_v37  ;;  %v1529_v42 = vpack.c.bf16 %v807_v38, %v807_v38  ;;  %v434_v44 = vadd.f32 %v1871_v43, %v433_v39  ;;  %v634_v45 = vadd.f32 %v1871_v43, %v633_v40 }
 0x167   :  { %v435_v46 = vpop.f32.mrf.mxu0  ;;  %v635_v7 = vpop.f32.mrf.mxu1 }
 0x168   :  { %1258 = vst.msk [vmem:[%s2381_s3 + $0x60] sm:$0xf] %vm1233_vm0, %v1479_v41  ;;  %1308 = vst.msk [vmem:[%s2381_s3 + $0x128] sm:$0xf] %vm1233_vm0, %v1529_v42  ;;  %v758_v47 = vmax.f32 %v434_v44, 0.0  ;;  %v808_v48 = vmax.f32 %v634_v45, 0.0 }
 0x169   :  { %v438_v49 = vpop.f32.mrf.mxu0  ;;  %v638_v50 = vpop.f32.mrf.mxu1 }
 0x16a   :  { %v1480_v22 = vpack.c.bf16 %v758_v47, %v758_v47  ;;  %v1530_v51 = vpack.c.bf16 %v808_v48, %v808_v48  ;;  %v439_v52 = vadd.f32 %v1871_v43, %v438_v49  ;;  %v639_v53 = vadd.f32 %v1871_v43, %v638_v50 }
 0x16b   :  { %v440_v54 = vpop.f32.mrf.mxu0  ;;  %v640_v55 = vpop.f32.mrf.mxu1 }
 0x16c   :  { %1259 = vst.msk [vmem:[%s2381_s3 + $0x64] sm:$0xf] %vm1233_vm0, %v1480_v22  ;;  %1309 = vst.msk [vmem:[%s2381_s3 + $0x12c] sm:$0xf] %vm1233_vm0, %v1530_v51  ;;  %v759_v56 = vmax.f32 %v439_v52, 0.0  ;;  %v809_v57 = vmax.f32 %v639_v53, 0.0 }
 0x16d   :  { %v441_v58 = vpop.f32.mrf.mxu0  ;;  %v641_v59 = vpop.f32.mrf.mxu1 }
 0x16e   :  { %v1481_v60 = vpack.c.bf16 %v759_v56, %v759_v56  ;;  %v1531_v61 = vpack.c.bf16 %v809_v57, %v809_v57  ;;  %v442_v62 = vadd.f32 %v1871_v43, %v441_v58  ;;  %v642_v63 = vadd.f32 %v1871_v43, %v641_v59 }
 0x16f   :  { %v443_v0 = vpop.f32.mrf.mxu0  ;;  %v643_v1 = vpop.f32.mrf.mxu1 }
 0x170   :  { %1260 = vst.msk [vmem:[%s2381_s3 + $0x68] sm:$0xf] %vm1233_vm0, %v1481_v60  ;;  %1310 = vst.msk [vmem:[%s2381_s3 + $0x130] sm:$0xf] %vm1233_vm0, %v1531_v61  ;;  %v760_v2 = vmax.f32 %v442_v62, 0.0  ;;  %v810_v3 = vmax.f32 %v642_v63, 0.0 }
 0x171   :  { %v446_v4 = vpop.f32.mrf.mxu0  ;;  %v646_v5 = vpop.f32.mrf.mxu1 }
 0x172   :  { %v1482_v6 = vpack.c.bf16 %v760_v2, %v760_v2  ;;  %v1532_v8 = vpack.c.bf16 %v810_v3, %v810_v3  ;;  %v447_v9 = vadd.f32 %v1871_v43, %v446_v4  ;;  %v647_v10 = vadd.f32 %v1871_v43, %v646_v5 }
 0x173   :  { %v448_v11 = vpop.f32.mrf.mxu0  ;;  %v648_v12 = vpop.f32.mrf.mxu1 }
 0x174   :  { %1261 = vst.msk [vmem:[%s2381_s3 + $0x6c] sm:$0xf] %vm1233_vm0, %v1482_v6  ;;  %1311 = vst.msk [vmem:[%s2381_s3 + $0x134] sm:$0xf] %vm1233_vm0, %v1532_v8  ;;  %v761_v13 = vmax.f32 %v447_v9, 0.0  ;;  %v811_v14 = vmax.f32 %v647_v10, 0.0 }
 0x175   :  { %v449_v15 = vpop.f32.mrf.mxu0  ;;  %v649_v16 = vpop.f32.mrf.mxu1 }
 0x176   :  { %v1483_v17 = vpack.c.bf16 %v761_v13, %v761_v13  ;;  %v1533_v18 = vpack.c.bf16 %v811_v14, %v811_v14  ;;  %v450_v19 = vadd.f32 %v1871_v43, %v449_v15  ;;  %v650_v20 = vadd.f32 %v1871_v43, %v649_v16 }
 0x177   :  { %v451_v21 = vpop.f32.mrf.mxu0  ;;  %v651_v23 = vpop.f32.mrf.mxu1 }
 0x178   :  { %1262 = vst.msk [vmem:[%s2381_s3 + $0x70] sm:$0xf] %vm1233_vm0, %v1483_v17  ;;  %1312 = vst.msk [vmem:[%s2381_s3 + $0x138] sm:$0xf] %vm1233_vm0, %v1533_v18  ;;  %v762_v24 = vmax.f32 %v450_v19, 0.0  ;;  %v812_v25 = vmax.f32 %v650_v20, 0.0 }
 0x179   :  { %v454_v26 = vpop.f32.mrf.mxu0  ;;  %v654_v27 = vpop.f32.mrf.mxu1 }
 0x17a   :  { %v1484_v28 = vpack.c.bf16 %v762_v24, %v762_v24  ;;  %v1534_v29 = vpack.c.bf16 %v812_v25, %v812_v25  ;;  %v455_v30 = vadd.f32 %v1871_v43, %v454_v26  ;;  %v655_v31 = vadd.f32 %v1871_v43, %v654_v27 }
 0x17b   :  { %v456_v32 = vpop.f32.mrf.mxu0  ;;  %v656_v33 = vpop.f32.mrf.mxu1 }
 0x17c   :  { %1263 = vst.msk [vmem:[%s2381_s3 + $0x74] sm:$0xf] %vm1233_vm0, %v1484_v28  ;;  %1313 = vst.msk [vmem:[%s2381_s3 + $0x13c] sm:$0xf] %vm1233_vm0, %v1534_v29  ;;  %v763_v34 = vmax.f32 %v455_v30, 0.0  ;;  %v813_v35 = vmax.f32 %v655_v31, 0.0 }
 0x17d   :  { %v457_v36 = vpop.f32.mrf.mxu0  ;;  %v657_v37 = vpop.f32.mrf.mxu1 }
 0x17e   :  { %v1485_v38 = vpack.c.bf16 %v763_v34, %v763_v34  ;;  %v1535_v39 = vpack.c.bf16 %v813_v35, %v813_v35  ;;  %v458_v40 = vadd.f32 %v1871_v43, %v457_v36  ;;  %v658_v41 = vadd.f32 %v1871_v43, %v657_v37 }
 0x17f   :  { %v459_v42 = vpop.f32.mrf.mxu0  ;;  %v659_v44 = vpop.f32.mrf.mxu1 }
 0x180   :  { %1264 = vst.msk [vmem:[%s2381_s3 + $0x78] sm:$0xf] %vm1233_vm0, %v1485_v38  ;;  %1314 = vst.msk [vmem:[%s2381_s3 + $0x140] sm:$0xf] %vm1233_vm0, %v1535_v39  ;;  %v764_v45 = vmax.f32 %v458_v40, 0.0  ;;  %v814_v46 = vmax.f32 %v658_v41, 0.0 }
 0x181   :  { %v462_v7 = vpop.f32.mrf.mxu0  ;;  %v662_v47 = vpop.f32.mrf.mxu1 }
 0x182   :  { %v1486_v48 = vpack.c.bf16 %v764_v45, %v764_v45  ;;  %v1536_v49 = vpack.c.bf16 %v814_v46, %v814_v46  ;;  %v463_v50 = vadd.f32 %v1871_v43, %v462_v7  ;;  %v663_v22 = vadd.f32 %v1871_v43, %v662_v47 }
 0x183   :  { %v464_v51 = vpop.f32.mrf.mxu0  ;;  %v664_v52 = vpop.f32.mrf.mxu1 }
 0x184   :  { %1265 = vst.msk [vmem:[%s2381_s3 + $0x7c] sm:$0xf] %vm1233_vm0, %v1486_v48  ;;  %1315 = vst.msk [vmem:[%s2381_s3 + $0x144] sm:$0xf] %vm1233_vm0, %v1536_v49  ;;  %v765_v53 = vmax.f32 %v463_v50, 0.0  ;;  %v815_v54 = vmax.f32 %v663_v22, 0.0 }
 0x185   :  { %v465_v55 = vpop.f32.mrf.mxu0  ;;  %v665_v56 = vpop.f32.mrf.mxu1 }
 0x186   :  { %v1487_v57 = vpack.c.bf16 %v765_v53, %v765_v53  ;;  %v1537_v58 = vpack.c.bf16 %v815_v54, %v815_v54  ;;  %v466_v59 = vadd.f32 %v1871_v43, %v465_v55  ;;  %v666_v60 = vadd.f32 %v1871_v43, %v665_v56 }
 0x187   :  { %v467_v61 = vpop.f32.mrf.mxu0  ;;  %v667_v62 = vpop.f32.mrf.mxu1 }
 0x188   :  { %1266 = vst.msk [vmem:[%s2381_s3 + $0x80] sm:$0xf] %vm1233_vm0, %v1487_v57  ;;  %1316 = vst.msk [vmem:[%s2381_s3 + $0x148] sm:$0xf] %vm1233_vm0, %v1537_v58  ;;  %v766_v63 = vmax.f32 %v466_v59, 0.0  ;;  %v816_v0 = vmax.f32 %v666_v60, 0.0 }
 0x189   :  { %v470_v1 = vpop.f32.mrf.mxu0  ;;  %v670_v2 = vpop.f32.mrf.mxu1 }
 0x18a   :  { %v1488_v3 = vpack.c.bf16 %v766_v63, %v766_v63  ;;  %v1538_v4 = vpack.c.bf16 %v816_v0, %v816_v0  ;;  %v471_v5 = vadd.f32 %v1871_v43, %v470_v1  ;;  %v671_v6 = vadd.f32 %v1871_v43, %v670_v2 }
 0x18b   :  { %v472_v8 = vpop.f32.mrf.mxu0  ;;  %v672_v9 = vpop.f32.mrf.mxu1 }
 0x18c   :  { %1267 = vst.msk [vmem:[%s2381_s3 + $0x84] sm:$0xf] %vm1233_vm0, %v1488_v3  ;;  %1317 = vst.msk [vmem:[%s2381_s3 + $0x14c] sm:$0xf] %vm1233_vm0, %v1538_v4  ;;  %v767_v10 = vmax.f32 %v471_v5, 0.0  ;;  %v817_v11 = vmax.f32 %v671_v6, 0.0 }
 0x18d   :  { %v473_v12 = vpop.f32.mrf.mxu0  ;;  %v673_v13 = vpop.f32.mrf.mxu1 }
 0x18e   :  { %v1489_v14 = vpack.c.bf16 %v767_v10, %v767_v10  ;;  %v1539_v15 = vpack.c.bf16 %v817_v11, %v817_v11  ;;  %v474_v16 = vadd.f32 %v1871_v43, %v473_v12  ;;  %v674_v17 = vadd.f32 %v1871_v43, %v673_v13 }
 0x18f   :  { %v475_v18 = vpop.f32.mrf.mxu0  ;;  %v675_v19 = vpop.f32.mrf.mxu1 }
 0x190   :  { %1268 = vst.msk [vmem:[%s2381_s3 + $0x88] sm:$0xf] %vm1233_vm0, %v1489_v14  ;;  %1318 = vst.msk [vmem:[%s2381_s3 + $0x150] sm:$0xf] %vm1233_vm0, %v1539_v15  ;;  %v768_v20 = vmax.f32 %v474_v16, 0.0  ;;  %v818_v21 = vmax.f32 %v674_v17, 0.0 }
 0x191   :  { %v478_v23 = vpop.f32.mrf.mxu0  ;;  %v678_v24 = vpop.f32.mrf.mxu1 }
 0x192   :  { %v1490_v25 = vpack.c.bf16 %v768_v20, %v768_v20  ;;  %v1540_v26 = vpack.c.bf16 %v818_v21, %v818_v21  ;;  %v479_v27 = vadd.f32 %v1871_v43, %v478_v23  ;;  %v679_v28 = vadd.f32 %v1871_v43, %v678_v24 }
 0x193   :  { %v480_v29 = vpop.f32.mrf.mxu0  ;;  %v680_v30 = vpop.f32.mrf.mxu1 }
 0x194   :  { %1269 = vst.msk [vmem:[%s2381_s3 + $0x8c] sm:$0xf] %vm1233_vm0, %v1490_v25  ;;  %1319 = vst.msk [vmem:[%s2381_s3 + $0x154] sm:$0xf] %vm1233_vm0, %v1540_v26  ;;  %v769_v31 = vmax.f32 %v479_v27, 0.0  ;;  %v819_v32 = vmax.f32 %v679_v28, 0.0 }
 0x195   :  { %v481_v33 = vpop.f32.mrf.mxu0  ;;  %v681_v34 = vpop.f32.mrf.mxu1 }
 0x196   :  { %v1491_v35 = vpack.c.bf16 %v769_v31, %v769_v31  ;;  %v1541_v36 = vpack.c.bf16 %v819_v32, %v819_v32  ;;  %v482_v37 = vadd.f32 %v1871_v43, %v481_v33  ;;  %v682_v38 = vadd.f32 %v1871_v43, %v681_v34 }
 0x197   :  { %v483_v39 = vpop.f32.mrf.mxu0  ;;  %v683_v40 = vpop.f32.mrf.mxu1 }
 0x198   :  { %1270 = vst.msk [vmem:[%s2381_s3 + $0x90] sm:$0xf] %vm1233_vm0, %v1491_v35  ;;  %1320 = vst.msk [vmem:[%s2381_s3 + $0x158] sm:$0xf] %vm1233_vm0, %v1541_v36  ;;  %v770_v41 = vmax.f32 %v482_v37, 0.0  ;;  %v820_v42 = vmax.f32 %v682_v38, 0.0 }
 0x199   :  { %v486_v44 = vpop.f32.mrf.mxu0  ;;  %v686_v45 = vpop.f32.mrf.mxu1 }
 0x19a   :  { %v1492_v46 = vpack.c.bf16 %v770_v41, %v770_v41  ;;  %v1542_v7 = vpack.c.bf16 %v820_v42, %v820_v42  ;;  %v487_v47 = vadd.f32 %v1871_v43, %v486_v44  ;;  %v687_v48 = vadd.f32 %v1871_v43, %v686_v45 }
 0x19b   :  { %v488_v49 = vpop.f32.mrf.mxu0  ;;  %v688_v50 = vpop.f32.mrf.mxu1 }
 0x19c   :  { %1271 = vst.msk [vmem:[%s2381_s3 + $0x94] sm:$0xf] %vm1233_vm0, %v1492_v46  ;;  %1321 = vst.msk [vmem:[%s2381_s3 + $0x15c] sm:$0xf] %vm1233_vm0, %v1542_v7  ;;  %v771_v22 = vmax.f32 %v487_v47, 0.0  ;;  %v821_v51 = vmax.f32 %v687_v48, 0.0 }
 0x19d   :  { %v489_v52 = vpop.f32.mrf.mxu0  ;;  %v689_v53 = vpop.f32.mrf.mxu1 }
 0x19e   :  { %v1493_v54 = vpack.c.bf16 %v771_v22, %v771_v22  ;;  %v1543_v55 = vpack.c.bf16 %v821_v51, %v821_v51  ;;  %v490_v56 = vadd.f32 %v1871_v43, %v489_v52  ;;  %v690_v57 = vadd.f32 %v1871_v43, %v689_v53 }
 0x19f   :  { %v491_v58 = vpop.f32.mrf.mxu0  ;;  %v691_v59 = vpop.f32.mrf.mxu1 }
 0x1a0   :  { %1272 = vst.msk [vmem:[%s2381_s3 + $0x98] sm:$0xf] %vm1233_vm0, %v1493_v54  ;;  %1322 = vst.msk [vmem:[%s2381_s3 + $0x160] sm:$0xf] %vm1233_vm0, %v1543_v55  ;;  %v772_v60 = vmax.f32 %v490_v56, 0.0  ;;  %v822_v61 = vmax.f32 %v690_v57, 0.0 }
 0x1a1   :  { %v494_v62 = vpop.f32.mrf.mxu0  ;;  %v694_v63 = vpop.f32.mrf.mxu1 }
 0x1a2   :  { %v1494_v0 = vpack.c.bf16 %v772_v60, %v772_v60  ;;  %v1544_v1 = vpack.c.bf16 %v822_v61, %v822_v61  ;;  %v495_v2 = vadd.f32 %v1871_v43, %v494_v62  ;;  %v695_v3 = vadd.f32 %v1871_v43, %v694_v63 }
 0x1a3   :  { %v496_v4 = vpop.f32.mrf.mxu0  ;;  %v696_v5 = vpop.f32.mrf.mxu1 }
 0x1a4   :  { %1273 = vst.msk [vmem:[%s2381_s3 + $0x9c] sm:$0xf] %vm1233_vm0, %v1494_v0  ;;  %1323 = vst.msk [vmem:[%s2381_s3 + $0x164] sm:$0xf] %vm1233_vm0, %v1544_v1  ;;  %v773_v6 = vmax.f32 %v495_v2, 0.0  ;;  %v823_v8 = vmax.f32 %v695_v3, 0.0 }
 0x1a5   :  { %v497_v9 = vpop.f32.mrf.mxu0  ;;  %v697_v10 = vpop.f32.mrf.mxu1 }
 0x1a6   :  { %v1495_v11 = vpack.c.bf16 %v773_v6, %v773_v6  ;;  %v1545_v12 = vpack.c.bf16 %v823_v8, %v823_v8  ;;  %v498_v13 = vadd.f32 %v1871_v43, %v497_v9  ;;  %v698_v14 = vadd.f32 %v1871_v43, %v697_v10 }
 0x1a7   :  { %v499_v15 = vpop.f32.mrf.mxu0  ;;  %v699_v16 = vpop.f32.mrf.mxu1 }
 0x1a8   :  { %1274 = vst.msk [vmem:[%s2381_s3 + $0xa0] sm:$0xf] %vm1233_vm0, %v1495_v11  ;;  %1324 = vst.msk [vmem:[%s2381_s3 + $0x168] sm:$0xf] %vm1233_vm0, %v1545_v12  ;;  %v774_v17 = vmax.f32 %v498_v13, 0.0  ;;  %v824_v18 = vmax.f32 %v698_v14, 0.0 }
 0x1a9   :  { %v502_v19 = vpop.f32.mrf.mxu0  ;;  %v702_v20 = vpop.f32.mrf.mxu1 }
 0x1aa   :  { %v1496_v21 = vpack.c.bf16 %v774_v17, %v774_v17  ;;  %v1546_v23 = vpack.c.bf16 %v824_v18, %v824_v18  ;;  %v503_v24 = vadd.f32 %v1871_v43, %v502_v19  ;;  %v703_v25 = vadd.f32 %v1871_v43, %v702_v20  ;;  %v2298_v43 = vld [vmem:[%s2380_s2] ss:$0 sm:$0xff] }
 0x1ab   :  { %v504_v26 = vpop.f32.mrf.mxu0  ;;  %v704_v27 = vpop.f32.mrf.mxu1 }
 0x1ac   :  { %1275 = vst.msk [vmem:[%s2381_s3 + $0xa4] sm:$0xf] %vm1233_vm0, %v1496_v21  ;;  %1325 = vst.msk [vmem:[%s2381_s3 + $0x16c] sm:$0xf] %vm1233_vm0, %v1546_v23  ;;  %v775_v28 = vmax.f32 %v503_v24, 0.0  ;;  %v825_v29 = vmax.f32 %v703_v25, 0.0 }
 0x1ad   :  { %v505_v30 = vpop.f32.mrf.mxu0  ;;  %v705_v31 = vpop.f32.mrf.mxu1 }
 0x1ae   :  { %v1497_v32 = vpack.c.bf16 %v775_v28, %v775_v28  ;;  %v1547_v33 = vpack.c.bf16 %v825_v29, %v825_v29  ;;  %v506_v34 = vadd.f32 %v2298_v43, %v505_v30  ;;  %v706_v35 = vadd.f32 %v2298_v43, %v705_v31 }
 0x1af   :  { %v507_v36 = vpop.f32.mrf.mxu0  ;;  %v707_v37 = vpop.f32.mrf.mxu1 }
 0x1b0   :  { %1276 = vst.msk [vmem:[%s2381_s3 + $0xa8] sm:$0xf] %vm1233_vm0, %v1497_v32  ;;  %1326 = vst.msk [vmem:[%s2381_s3 + $0x170] sm:$0xf] %vm1233_vm0, %v1547_v33  ;;  %v776_v38 = vmax.f32 %v506_v34, 0.0  ;;  %v826_v39 = vmax.f32 %v706_v35, 0.0 }
 0x1b1   :  { %v510_v40 = vpop.f32.mrf.mxu0  ;;  %v710_v41 = vpop.f32.mrf.mxu1 }
 0x1b2   :  { %v1498_v42 = vpack.c.bf16 %v776_v38, %v776_v38  ;;  %v1548_v44 = vpack.c.bf16 %v826_v39, %v826_v39  ;;  %v511_v45 = vadd.f32 %v2298_v43, %v510_v40  ;;  %v711_v46 = vadd.f32 %v2298_v43, %v710_v41 }
 0x1b3   :  { %v512_v7 = vpop.f32.mrf.mxu0  ;;  %v712_v47 = vpop.f32.mrf.mxu1 }
 0x1b4   :  { %1277 = vst.msk [vmem:[%s2381_s3 + $0xac] sm:$0xf] %vm1233_vm0, %v1498_v42  ;;  %1327 = vst.msk [vmem:[%s2381_s3 + $0x174] sm:$0xf] %vm1233_vm0, %v1548_v44  ;;  %v777_v48 = vmax.f32 %v511_v45, 0.0  ;;  %v827_v49 = vmax.f32 %v711_v46, 0.0 }
 0x1b5   :  { %v513_v50 = vpop.f32.mrf.mxu0  ;;  %v713_v22 = vpop.f32.mrf.mxu1 }
 0x1b6   :  { %v1499_v51 = vpack.c.bf16 %v777_v48, %v777_v48  ;;  %v1549_v52 = vpack.c.bf16 %v827_v49, %v827_v49  ;;  %v514_v53 = vadd.f32 %v2298_v43, %v513_v50  ;;  %v714_v54 = vadd.f32 %v2298_v43, %v713_v22 }
 0x1b7   :  { %v515_v55 = vpop.f32.mrf.mxu0  ;;  %v715_v56 = vpop.f32.mrf.mxu1 }
 0x1b8   :  { %1278 = vst.msk [vmem:[%s2381_s3 + $0xb0] sm:$0xf] %vm1233_vm0, %v1499_v51  ;;  %1328 = vst.msk [vmem:[%s2381_s3 + $0x178] sm:$0xf] %vm1233_vm0, %v1549_v52  ;;  %v778_v57 = vmax.f32 %v514_v53, 0.0  ;;  %v828_v58 = vmax.f32 %v714_v54, 0.0 }
 0x1b9   :  { %v518_v59 = vpop.f32.mrf.mxu0  ;;  %v718_v60 = vpop.f32.mrf.mxu1 }
 0x1ba   :  { %v1500_v61 = vpack.c.bf16 %v778_v57, %v778_v57  ;;  %v1550_v62 = vpack.c.bf16 %v828_v58, %v828_v58  ;;  %v519_v63 = vadd.f32 %v2298_v43, %v518_v59  ;;  %v719_v0 = vadd.f32 %v2298_v43, %v718_v60 }
 0x1bb   :  { %v520_v1 = vpop.f32.mrf.mxu0  ;;  %v720_v2 = vpop.f32.mrf.mxu1 }
 0x1bc   :  { %1279 = vst.msk [vmem:[%s2381_s3 + $0xb4] sm:$0xf] %vm1233_vm0, %v1500_v61  ;;  %1329 = vst.msk [vmem:[%s2381_s3 + $0x17c] sm:$0xf] %vm1233_vm0, %v1550_v62  ;;  %v779_v3 = vmax.f32 %v519_v63, 0.0  ;;  %v829_v4 = vmax.f32 %v719_v0, 0.0 }
 0x1bd   :  { %v521_v5 = vpop.f32.mrf.mxu0  ;;  %v721_v6 = vpop.f32.mrf.mxu1 }
 0x1be   :  { %v1501_v8 = vpack.c.bf16 %v779_v3, %v779_v3  ;;  %v1551_v9 = vpack.c.bf16 %v829_v4, %v829_v4  ;;  %v522_v10 = vadd.f32 %v2298_v43, %v521_v5  ;;  %v722_v11 = vadd.f32 %v2298_v43, %v721_v6 }
 0x1bf   :  { %v523_v12 = vpop.f32.mrf.mxu0  ;;  %v723_v13 = vpop.f32.mrf.mxu1 }
 0x1c0   :  { %1280 = vst.msk [vmem:[%s2381_s3 + $0xb8] sm:$0xf] %vm1233_vm0, %v1501_v8  ;;  %1330 = vst.msk [vmem:[%s2381_s3 + $0x180] sm:$0xf] %vm1233_vm0, %v1551_v9  ;;  %v780_v14 = vmax.f32 %v522_v10, 0.0  ;;  %v830_v15 = vmax.f32 %v722_v11, 0.0 }
 0x1c1   :  { %v526_v16 = vpop.f32.mrf.mxu0  ;;  %v726_v17 = vpop.f32.mrf.mxu1 }
 0x1c2   :  { %v1502_v18 = vpack.c.bf16 %v780_v14, %v780_v14  ;;  %v1552_v19 = vpack.c.bf16 %v830_v15, %v830_v15  ;;  %v527_v20 = vadd.f32 %v2298_v43, %v526_v16  ;;  %v727_v21 = vadd.f32 %v2298_v43, %v726_v17 }
 0x1c3   :  { %v528_v23 = vpop.f32.mrf.mxu0  ;;  %v728_v24 = vpop.f32.mrf.mxu1 }
 0x1c4   :  { %1281 = vst.msk [vmem:[%s2381_s3 + $0xbc] sm:$0xf] %vm1233_vm0, %v1502_v18  ;;  %1331 = vst.msk [vmem:[%s2381_s3 + $0x184] sm:$0xf] %vm1233_vm0, %v1552_v19  ;;  %v781_v25 = vmax.f32 %v527_v20, 0.0  ;;  %v831_v26 = vmax.f32 %v727_v21, 0.0 }
 0x1c5   :  { %v529_v27 = vpop.f32.mrf.mxu0  ;;  %v729_v28 = vpop.f32.mrf.mxu1 }
 0x1c6   :  { %v1503_v29 = vpack.c.bf16 %v781_v25, %v781_v25  ;;  %v1553_v30 = vpack.c.bf16 %v831_v26, %v831_v26  ;;  %v530_v31 = vadd.f32 %v2298_v43, %v529_v27  ;;  %v730_v32 = vadd.f32 %v2298_v43, %v729_v28 }
 0x1c7   :  { %v531_v33 = vpop.f32.mrf.mxu0  ;;  %v731_v34 = vpop.f32.mrf.mxu1 }
 0x1c8   :  { %1282 = vst.msk [vmem:[%s2381_s3 + $0xc0] sm:$0xf] %vm1233_vm0, %v1503_v29  ;;  %1332 = vst.msk [vmem:[%s2381_s3 + $0x188] sm:$0xf] %vm1233_vm0, %v1553_v30  ;;  %v782_v35 = vmax.f32 %v530_v31, 0.0  ;;  %v832_v36 = vmax.f32 %v730_v32, 0.0 }
 0x1ca   :  { %v1504_v37 = vpack.c.bf16 %v782_v35, %v782_v35  ;;  %v1554_v38 = vpack.c.bf16 %v832_v36, %v832_v36 }
 0x1cc   :  { %1283 = vst.msk [vmem:[%s2381_s3 + $0xc4] sm:$0xf] %vm1233_vm0, %v1504_v37  ;;  %1333 = vst.msk [vmem:[%s2381_s3 + $0x18c] sm:$0xf] %vm1233_vm0, %v1554_v38 }

// kernel: double_duel_q_forward.5
= control target key start
LH: loop header
LB: loop body
LE: loop exit
PB: predicated region body
PF: predicated region fallthrough
CT: control target
= control target key end

     0   :  { %s1708_s12 = smov 0   ;;  %s1710_s13 = smov 0   ;;  %s1897_s0 = inlined_call_operand.vmem [shape: bf16[2,162,512], index: 0, kind: input, shape index: {}]   ;;  %s1898_s1 = inlined_call_operand.vmem [shape: bf16[2,512,64], index: 1, kind: input, shape index: {}]   ;;  %s1899_s2 = inlined_call_operand.vmem [shape: f32[2,1,64], index: 2, kind: input, shape index: {}]   ;;  %s1900_s3 = inlined_call_operand.vmem [shape: bf16[2,162,64], index: 3, kind: output, shape index: {}]  }
   0x1   :  { %s1712_s14 = smov 0  }
   0x2 LB: > { %s25_s15 = sadd.s32 1, %s1682_s13  ;;  %p1251_p0 = scmp.ge.s32.totalorder %s1686_s14, 1  ;;  %s1686_s14 = sphi %s1712_s14, %s13_s14   ;;  %s1682_s13 = sphi %s1710_s13, %s1902_s13   ;;  %s1678_s12 = sphi %s1708_s12, %s1901_s12  }
   0x3   : > { %p27_p1 = scmp.ge.s32.totalorder %s25_s15, 2  ;;  %p177_p2 = scmp.lt.s32.totalorder %s1686_s14, 3 }
   0x5   : > { %s1904_s15 = smov (%p27_p1, %s25_s15), 0  ;;  %p178_p3 = pnand %p1251_p0, %p177_p2 }
   0x6   : > { %p219_p4 = scmp.lt.s32.totalorder (!%p178_p3), %s1678_s12, 1 }
   0x7   : > { %181 = sbr.rel (%p178_p3) target bundleno = 335 (0x14f), region = 32 }
   0xc   : > { %s1906_s12 = smov (!%p219_p4, %s1678_s12), 1  ;;  %vm1113_vm0 = vcmask 519168   ;;  %vm1134_vm1 = vcmask 516096  }
   0xd   : > { %s1356_s16 = sshll.u32 %s1906_s12, 8  ;;  %s1542_s20 = smul.u32 336, %s1906_s12 }
   0xe   : > { %s1732_s19 = scalar_lea.vmem %s1898_s1, %s1356_s16  ;;  %s236_s26 = scalar_lea.vmem %s1899_s2, %s1906_s12 }
   0xf   : > { %v1568_v0 = vld [vmem:[%s1732_s19 + $0x78] sm:$0xff]   ;;  %v1572_v4 = vld [vmem:[%s1732_s19 + $0x70] sm:$0xff]   ;;  %v1576_v8 = vld [vmem:[%s1732_s19 + $0x68] sm:$0xff]   ;;  %s1768_s23 = scalar_lea.vmem %s1897_s0, %s1542_s20  ;;  %s1543_s27 = smul.u32 84, %s1906_s12 }
  0x10   : > { %v1569_v1 = vld [vmem:[%s1732_s19 + $0xf8] sm:$0xff]   ;;  %1378 = vmatprep.subr.bf16.mxu0 %v1568_v0  ;;  %v1573_v5 = vld [vmem:[%s1732_s19 + $0xf0] sm:$0xff]   ;;  %v1577_v9 = vld [vmem:[%s1732_s19 + $0xe8] sm:$0xff]  }
  0x11   : > { %v1570_v2 = vld [vmem:[%s1732_s19 + $0x38] sm:$0xff]   ;;  %1460 = vmatprep.subr.bf16.mxu1 %v1569_v1  ;;  %v1574_v6 = vld [vmem:[%s1732_s19 + $0x30] sm:$0xff]   ;;  %v1578_v10 = vld [vmem:[%s1732_s19 + $0x28] sm:$0xff]   ;;  %s1826_s30 = scalar_lea.vmem %s1900_s3, %s1543_s27 }
  0x12   : > { %v1571_v3 = vld [vmem:[%s1732_s19 + $0xb8] sm:$0xff]   ;;  %1379 = vmatpush3.bf16.msra.mxu0 %v1570_v2  ;;  %v1575_v7 = vld [vmem:[%s1732_s19 + $0xb0] sm:$0xff]   ;;  %v1579_v11 = vld [vmem:[%s1732_s19 + $0xa8] sm:$0xff]  }
  0x13   : > { %1461 = vmatpush3.bf16.msra.mxu1 %v1571_v3  ;;  %1380 = vmatprep.subr.bf16.mxu0 %v1572_v4  ;;  %v1580_v12 = vld [vmem:[%s1732_s19 + $0x60] sm:$0xff]   ;;  %v1584_v16 = vld [vmem:[%s1732_s19 + $0x58] sm:$0xff]   ;;  %v1588_v20 = vld [vmem:[%s1732_s19 + $0x50] sm:$0xff]  }
  0x14   : > { %1462 = vmatprep.subr.bf16.mxu1 %v1573_v5  ;;  %v1581_v13 = vld [vmem:[%s1732_s19 + $0xe0] sm:$0xff]   ;;  %v1585_v17 = vld [vmem:[%s1732_s19 + $0xd8] sm:$0xff]   ;;  %v1589_v21 = vld [vmem:[%s1732_s19 + $0xd0] sm:$0xff]  }
  0x15   : > { %v1582_v14 = vld [vmem:[%s1732_s19 + $0x20] sm:$0xff]   ;;  %v1586_v18 = vld [vmem:[%s1732_s19 + $0x18] sm:$0xff]   ;;  %v1590_v22 = vld [vmem:[%s1732_s19 + $0x10] sm:$0xff]  }
  0x16   : > { %1381 = vmatpush3.bf16.msra.mxu0 %v1574_v6  ;;  %v1583_v15 = vld [vmem:[%s1732_s19 + $0xa0] sm:$0xff]   ;;  %v1587_v19 = vld [vmem:[%s1732_s19 + $0x98] sm:$0xff]   ;;  %v1591_v23 = vld [vmem:[%s1732_s19 + $0x90] sm:$0xff]  }
  0x17   : > { %1463 = vmatpush3.bf16.msra.mxu1 %v1575_v7  ;;  %1382 = vmatprep.subr.bf16.mxu0 %v1576_v8  ;;  %v1592_v24 = vld [vmem:[%s1732_s19 + $0x48] sm:$0xff]   ;;  %v1596_v28 = vld [vmem:[%s1732_s19 + $0x40] sm:$0xff]  }
  0x18   : > { %1464 = vmatprep.subr.bf16.mxu1 %v1577_v9  ;;  %v1593_v25 = vld [vmem:[%s1732_s19 + $0xc8] sm:$0xff]   ;;  %v1597_v29 = vld [vmem:[%s1732_s19 + $0xc0] sm:$0xff]  }
  0x19   : > { %v1594_v26 = vld [vmem:[%s1732_s19 + $0x8] sm:$0xff]   ;;  %v1598_v30 = vld [vmem:[%s1732_s19] sm:$0xff]  }
  0x1a   : > { %1383 = vmatpush3.bf16.msra.mxu0 %v1578_v10  ;;  %v1595_v27 = vld [vmem:[%s1732_s19 + $0x88] sm:$0xff]   ;;  %v1599_v31 = vld [vmem:[%s1732_s19 + $0x80] sm:$0xff]  }
  0x1b   : > { %1465 = vmatpush3.bf16.msra.mxu1 %v1579_v11  ;;  %1384 = vmatprep.subr.bf16.mxu0 %v1580_v12  ;;  %v1600_v32 = vld [vmem:[%s1768_s23] ss:$16 sps:$4 sm:$0xff]   ;;  %v1602_v33 = vld [vmem:[%s1768_s23 + $0x4] ss:$16 sps:$4 sm:$0xff]   ;;  %v1603_v34 = vld [vmem:[%s1768_s23 + $0x8] ss:$16 sps:$4 sm:$0xff]  }
  0x1c   : > { %1466 = vmatprep.subr.bf16.mxu1 %v1581_v13  ;;  %v1605_v35 = vld [vmem:[%s1768_s23 + $0xc] ss:$16 sps:$4 sm:$0xff]   ;;  %799 = vmatprep.mubr.bf16.mxu0 %v1602_v33  ;;  %v1606_v36 = vld [vmem:[%s1768_s23 + $0x24] ss:$16 sps:$4 sm:$0xff]   ;;  %v1610_v38 = vld [vmem:[%s1768_s23 + $0x20] ss:$16 sps:$4 sm:$0xff]  }
  0x1d   : > { %919 = vmatprep.mubr.bf16.mxu1 %v1605_v35  ;;  %v1608_v37 = vld [vmem:[%s1768_s23 + $0x2c] ss:$16 sps:$4 sm:$0xff]   ;;  %v1611_v39 = vld [vmem:[%s1768_s23 + $0x28] ss:$16 sps:$4 sm:$0xff]   ;;  %v1612_v40 = vld [vmem:[%s1768_s23 + $0x44] ss:$16 sps:$4 sm:$0xff]  }
  0x1e   : > { %1385 = vmatpush3.bf16.msra.mxu0 %v1582_v14  ;;  %v1614_v41 = vld [vmem:[%s1768_s23 + $0x4c] ss:$16 sps:$4 sm:$0xff]   ;;  %v1616_v42 = vld [vmem:[%s1768_s23 + $0x40] ss:$16 sps:$4 sm:$0xff]   ;;  %v1617_v43 = vld [vmem:[%s1768_s23 + $0x48] ss:$16 sps:$4 sm:$0xff]  }
  0x1f   : > { %1467 = vmatpush3.bf16.msra.mxu1 %v1583_v15  ;;  %1386 = vmatprep.subr.bf16.mxu0 %v1584_v16  ;;  %v1618_v44 = vld [vmem:[%s1768_s23 + $0x64] ss:$16 sps:$4 sm:$0xff]   ;;  %v1620_v45 = vld [vmem:[%s1768_s23 + $0x6c] ss:$16 sps:$4 sm:$0xff]   ;;  %v1622_v46 = vld [vmem:[%s1768_s23 + $0x60] ss:$16 sps:$4 sm:$0xff]  }
  0x20   : > { %1468 = vmatprep.subr.bf16.mxu1 %v1585_v17  ;;  %v1623_v47 = vld [vmem:[%s1768_s23 + $0x68] ss:$16 sps:$4 sm:$0xff]   ;;  %v1624_v48 = vld [vmem:[%s1768_s23 + $0x84] ss:$16 sps:$4 sm:$0xff]   ;;  %v1626_v49 = vld [vmem:[%s1768_s23 + $0x8c] ss:$16 sps:$4 sm:$0xff]  }
  0x21   : > { %v1628_v50 = vld [vmem:[%s1768_s23 + $0x80] ss:$16 sps:$4 sm:$0xff]   ;;  %v1629_v51 = vld [vmem:[%s1768_s23 + $0x88] ss:$16 sps:$4 sm:$0xff]   ;;  %v1630_v52 = vld [vmem:[%s1768_s23 + $0xa4] ss:$16 sps:$4 sm:$0xff]  }
  0x22   : > { %1387 = vmatpush3.bf16.msra.mxu0 %v1586_v18  ;;  %v1632_v53 = vld [vmem:[%s1768_s23 + $0xac] ss:$16 sps:$4 sm:$0xff]   ;;  %v1634_v54 = vld [vmem:[%s1768_s23 + $0xa0] ss:$16 sps:$4 sm:$0xff]   ;;  %v1635_v55 = vld [vmem:[%s1768_s23 + $0xa8] ss:$16 sps:$4 sm:$0xff]  }
  0x23   : > { %1469 = vmatpush3.bf16.msra.mxu1 %v1587_v19  ;;  %1388 = vmatprep.subr.bf16.mxu0 %v1588_v20  ;;  %v1636_v56 = vld [vmem:[%s1768_s23 + $0xc4] ss:$16 sps:$4 sm:$0xff]   ;;  %v1638_v57 = vld [vmem:[%s1768_s23 + $0xcc] ss:$16 sps:$4 sm:$0xff]   ;;  %v1640_v58 = vld [vmem:[%s1768_s23 + $0xc0] ss:$16 sps:$4 sm:$0xff]  }
  0x24   : > { %1470 = vmatprep.subr.bf16.mxu1 %v1589_v21  ;;  %v1641_v59 = vld [vmem:[%s1768_s23 + $0xc8] ss:$16 sps:$4 sm:$0xff]   ;;  %v1642_v60 = vld [vmem:[%s1768_s23 + $0xe4] ss:$16 sps:$4 sm:$0xff]   ;;  %v1644_v61 = vld [vmem:[%s1768_s23 + $0xec] ss:$16 sps:$4 sm:$0xff]  }
  0x25   : > { %v1646_v62 = vld [vmem:[%s1768_s23 + $0xe0] ss:$16 sps:$4 sm:$0xff]   ;;  %v1647_v63 = vld [vmem:[%s1768_s23 + $0xe8] ss:$16 sps:$4 sm:$0xff]   ;;  %v1648_v0 = vld [vmem:[%s1768_s23 + $0x104] ss:$16 sps:$4 sm:$0xff]  }
  0x26   : > { %1389 = vmatpush3.bf16.msra.mxu0 %v1590_v22  ;;  %v1650_v1 = vld [vmem:[%s1768_s23 + $0x10c] ss:$16 sps:$4 sm:$0xff]   ;;  %v1652_v2 = vld [vmem:[%s1768_s23 + $0x100] ss:$16 sps:$4 sm:$0xff]   ;;  %v1653_v3 = vld [vmem:[%s1768_s23 + $0x108] ss:$16 sps:$4 sm:$0xff]  }
  0x27   : > { %1471 = vmatpush3.bf16.msra.mxu1 %v1591_v23  ;;  %1390 = vmatprep.subr.bf16.mxu0 %v1592_v24  ;;  %v1654_v4 = vld [vmem:[%s1768_s23 + $0x124] ss:$16 sps:$4 sm:$0xff]   ;;  %v1656_v5 = vld [vmem:[%s1768_s23 + $0x12c] ss:$16 sps:$4 sm:$0xff]   ;;  %v1658_v8 = vld [vmem:[%s1768_s23 + $0x120] ss:$16 sps:$4 sm:$0xff]  }
  0x28   : > { %1472 = vmatprep.subr.bf16.mxu1 %v1593_v25  ;;  %v288_v6 = vld [vmem:[%s1768_s23 + $0x140] sm:$0x11]  ;;  %v289_v7 = vld [vmem:[%s1768_s23 + $0x148] sm:$0x11] }
  0x29   : > { %v1659_v9 = vld [vmem:[%s1768_s23 + $0x128] ss:$16 sps:$4 sm:$0xff]   ;;  %v1298_v10 = vcombine.high %v288_v6, %v288_v6  ;;  %v1300_v11 = vcombine.high %v289_v7, %v289_v7  ;;  %v1297_v12 = vcombine.low %v288_v6, %v288_v6  ;;  %v1299_v13 = vcombine.low %v289_v7, %v289_v7  ;;  %v1818_v16 = vld [vmem:[%s236_s26] ss:$0 sm:$0xff] }
  0x2a   : > { %1391 = vmatpush3.bf16.msra.mxu0 %v1594_v26 }
  0x2b   : > { %1473 = vmatpush3.bf16.msra.mxu1 %v1595_v27  ;;  %1392 = vmatprep.subr.bf16.mxu0 %v1596_v28 }
  0x2c   : > { %1474 = vmatprep.subr.bf16.mxu1 %v1597_v29 }
  0x2e   : > { %1393 = vmatpush3.bf16.msra.mxu0 %v1598_v30 }
  0x2f   : > { %1475 = vmatpush3.bf16.msra.mxu1 %v1599_v31 }
  0x31   : > { %800 = vmatmul.mubr.bf16.vlgmr.msra.gmra.mxu0 %v1600_v32 }
  0x32   : > { %920 = vmatmul.mubr.bf16.vlgmr.msra.gmra.mxu1 %v1603_v34  ;;  %807 = vmatprep.mubr.bf16.mxu0 %v1606_v36 }
  0x33   : > { %927 = vmatprep.mubr.bf16.mxu1 %v1608_v37 }
  0x39   : > { %808 = vmatmul.mubr.bf16.gmra.mxu0 %v1610_v38 }
  0x3a   : > { %928 = vmatmul.mubr.bf16.gmra.mxu1 %v1611_v39  ;;  %815 = vmatprep.mubr.bf16.mxu0 %v1612_v40 }
  0x3b   : > { %935 = vmatprep.mubr.bf16.mxu1 %v1614_v41 }
  0x41   : > { %816 = vmatmul.mubr.bf16.gmra.mxu0 %v1616_v42 }
  0x42   : > { %936 = vmatmul.mubr.bf16.gmra.mxu1 %v1617_v43  ;;  %823 = vmatprep.mubr.bf16.mxu0 %v1618_v44 }
  0x43   : > { %943 = vmatprep.mubr.bf16.mxu1 %v1620_v45 }
  0x49   : > { %824 = vmatmul.mubr.bf16.gmra.mxu0 %v1622_v46 }
  0x4a   : > { %944 = vmatmul.mubr.bf16.gmra.mxu1 %v1623_v47  ;;  %831 = vmatprep.mubr.bf16.mxu0 %v1624_v48 }
  0x4b   : > { %951 = vmatprep.mubr.bf16.mxu1 %v1626_v49 }
  0x51   : > { %832 = vmatmul.mubr.bf16.gmra.mxu0 %v1628_v50 }
  0x52   : > { %952 = vmatmul.mubr.bf16.gmra.mxu1 %v1629_v51  ;;  %839 = vmatprep.mubr.bf16.mxu0 %v1630_v52 }
  0x53   : > { %959 = vmatprep.mubr.bf16.mxu1 %v1632_v53 }
  0x59   : > { %840 = vmatmul.mubr.bf16.gmra.mxu0 %v1634_v54 }
  0x5a   : > { %960 = vmatmul.mubr.bf16.gmra.mxu1 %v1635_v55  ;;  %847 = vmatprep.mubr.bf16.mxu0 %v1636_v56 }
  0x5b   : > { %967 = vmatprep.mubr.bf16.mxu1 %v1638_v57 }
  0x61   : > { %848 = vmatmul.mubr.bf16.gmra.mxu0 %v1640_v58 }
  0x62   : > { %968 = vmatmul.mubr.bf16.gmra.mxu1 %v1641_v59  ;;  %855 = vmatprep.mubr.bf16.mxu0 %v1642_v60 }
  0x63   : > { %975 = vmatprep.mubr.bf16.mxu1 %v1644_v61 }
  0x69   : > { %856 = vmatmul.mubr.bf16.gmra.mxu0 %v1646_v62 }
  0x6a   : > { %976 = vmatmul.mubr.bf16.gmra.mxu1 %v1647_v63  ;;  %863 = vmatprep.mubr.bf16.mxu0 %v1648_v0 }
  0x6b   : > { %983 = vmatprep.mubr.bf16.mxu1 %v1650_v1 }
  0x71   : > { %864 = vmatmul.mubr.bf16.gmra.mxu0 %v1652_v2 }
  0x72   : > { %984 = vmatmul.mubr.bf16.gmra.mxu1 %v1653_v3  ;;  %871 = vmatprep.mubr.bf16.mxu0 %v1654_v4 }
  0x73   : > { %991 = vmatprep.mubr.bf16.mxu1 %v1656_v5 }
  0x79   : > { %872 = vmatmul.mubr.bf16.gmra.mxu0 %v1658_v8 }
  0x7a   : > { %992 = vmatmul.mubr.bf16.gmra.mxu1 %v1659_v9  ;;  %879 = vmatprep.mubr.bf16.mxu0 %v1298_v10 }
  0x7b   : > { %999 = vmatprep.mubr.bf16.mxu1 %v1300_v11 }
  0x81   : > { %880 = vmatmul.mubr.bf16.gmra.mxu0 %v1297_v12 }
  0x82   : > { %1000 = vmatmul.mubr.bf16.gmra.mxu1 %v1299_v13 }
  0xf1   : > { %v1394_v14 = vpop.f32.mrf.mxu0 }
  0xf2   : > { %v1476_v15 = vpop.f32.mrf.mxu1 }
  0xf3   : > { %v1395_v17 = vpop.f32.mrf.mxu0 }
  0xf4   : > { %v1396_v18 = vadd.f32 %v1395_v17, %v1394_v14  ;;  %v1477_v19 = vpop.f32.mrf.mxu1 }
  0xf5   : > { %v1397_v20 = vpop.f32.mrf.mxu0  ;;  %v1478_v22 = vadd.f32 %v1477_v19, %v1476_v15 }
  0xf6   : > { %v802_v21 = vadd.f32 %v1396_v18, %v1818_v16  ;;  %v1479_v23 = vpop.f32.mrf.mxu1 }
  0xf7   : > { %v1398_v24 = vpop.f32.mrf.mxu0 }
  0xf8   : > { %v922_v25 = vadd.f32 %v1478_v22, %v802_v21  ;;  %v1399_v26 = vadd.f32 %v1398_v24, %v1397_v20  ;;  %v1480_v27 = vpop.f32.mrf.mxu1 }
  0xf9   : > { %v1400_v28 = vpop.f32.mrf.mxu0  ;;  %v1481_v31 = vadd.f32 %v1480_v27, %v1479_v23 }
  0xfa   : > { %v1007_v29 = vmax.f32 %v922_v25, 0.0  ;;  %v805_v30 = vadd.f32 %v1399_v26, %v1818_v16  ;;  %v1482_v32 = vpop.f32.mrf.mxu1 }
  0xfb   : > { %v1401_v33 = vpop.f32.mrf.mxu0 }
  0xfc   : > { %v1357_v34 = vpack.c.bf16 %v1007_v29, %v1007_v29  ;;  %v925_v35 = vadd.f32 %v1481_v31, %v805_v30  ;;  %v1402_v36 = vadd.f32 %v1401_v33, %v1400_v28  ;;  %v1483_v37 = vpop.f32.mrf.mxu1 }
  0xfd   : > { %v1403_v38 = vpop.f32.mrf.mxu0  ;;  %v1484_v41 = vadd.f32 %v1483_v37, %v1482_v32 }
  0xfe   : > { %1114 = vst.msk [vmem:[%s1826_s30] sm:$0xf] %vm1113_vm0, %v1357_v34  ;;  %v1008_v39 = vmax.f32 %v925_v35, 0.0  ;;  %v810_v40 = vadd.f32 %v1402_v36, %v1818_v16  ;;  %v1485_v42 = vpop.f32.mrf.mxu1 }
  0xff   : > { %v1404_v43 = vpop.f32.mrf.mxu0 }
 0x100   : > { %v1358_v44 = vpack.c.bf16 %v1008_v39, %v1008_v39  ;;  %v930_v45 = vadd.f32 %v1484_v41, %v810_v40  ;;  %v1405_v46 = vadd.f32 %v1404_v43, %v1403_v38  ;;  %v1486_v47 = vpop.f32.mrf.mxu1 }
 0x101   : > { %v1406_v48 = vpop.f32.mrf.mxu0  ;;  %v1487_v51 = vadd.f32 %v1486_v47, %v1485_v42 }
 0x102   : > { %1115 = vst.msk [vmem:[%s1826_s30 + $0x4] sm:$0xf] %vm1113_vm0, %v1358_v44  ;;  %v1009_v49 = vmax.f32 %v930_v45, 0.0  ;;  %v813_v50 = vadd.f32 %v1405_v46, %v1818_v16  ;;  %v1488_v52 = vpop.f32.mrf.mxu1 }
 0x103   : > { %v1407_v53 = vpop.f32.mrf.mxu0 }
 0x104   : > { %v1359_v54 = vpack.c.bf16 %v1009_v49, %v1009_v49  ;;  %v933_v55 = vadd.f32 %v1487_v51, %v813_v50  ;;  %v1408_v56 = vadd.f32 %v1407_v53, %v1406_v48  ;;  %v1489_v57 = vpop.f32.mrf.mxu1 }
 0x105   : > { %v1409_v58 = vpop.f32.mrf.mxu0  ;;  %v1490_v61 = vadd.f32 %v1489_v57, %v1488_v52 }
 0x106   : > { %1116 = vst.msk [vmem:[%s1826_s30 + $0x8] sm:$0xf] %vm1113_vm0, %v1359_v54  ;;  %v1010_v59 = vmax.f32 %v933_v55, 0.0  ;;  %v818_v60 = vadd.f32 %v1408_v56, %v1818_v16  ;;  %v1491_v62 = vpop.f32.mrf.mxu1 }
 0x107   : > { %v1410_v63 = vpop.f32.mrf.mxu0 }
 0x108   : > { %v1360_v0 = vpack.c.bf16 %v1010_v59, %v1010_v59  ;;  %v938_v1 = vadd.f32 %v1490_v61, %v818_v60  ;;  %v1411_v2 = vadd.f32 %v1410_v63, %v1409_v58  ;;  %v1492_v3 = vpop.f32.mrf.mxu1 }
 0x109   : > { %v1412_v4 = vpop.f32.mrf.mxu0  ;;  %v1493_v7 = vadd.f32 %v1492_v3, %v1491_v62 }
 0x10a   : > { %1117 = vst.msk [vmem:[%s1826_s30 + $0xc] sm:$0xf] %vm1113_vm0, %v1360_v0  ;;  %v1011_v5 = vmax.f32 %v938_v1, 0.0  ;;  %v821_v6 = vadd.f32 %v1411_v2, %v1818_v16  ;;  %v1494_v8 = vpop.f32.mrf.mxu1 }
 0x10b   : > { %v1413_v9 = vpop.f32.mrf.mxu0 }
 0x10c   : > { %v1361_v10 = vpack.c.bf16 %v1011_v5, %v1011_v5  ;;  %v941_v11 = vadd.f32 %v1493_v7, %v821_v6  ;;  %v1414_v12 = vadd.f32 %v1413_v9, %v1412_v4  ;;  %v1495_v13 = vpop.f32.mrf.mxu1 }
 0x10d   : > { %v1415_v14 = vpop.f32.mrf.mxu0  ;;  %v1496_v18 = vadd.f32 %v1495_v13, %v1494_v8 }
 0x10e   : > { %1118 = vst.msk [vmem:[%s1826_s30 + $0x10] sm:$0xf] %vm1113_vm0, %v1361_v10  ;;  %v1012_v15 = vmax.f32 %v941_v11, 0.0  ;;  %v826_v17 = vadd.f32 %v1414_v12, %v1818_v16  ;;  %v1497_v19 = vpop.f32.mrf.mxu1 }
 0x10f   : > { %v1416_v20 = vpop.f32.mrf.mxu0 }
 0x110   : > { %v1362_v21 = vpack.c.bf16 %v1012_v15, %v1012_v15  ;;  %v946_v22 = vadd.f32 %v1496_v18, %v826_v17  ;;  %v1417_v23 = vadd.f32 %v1416_v20, %v1415_v14  ;;  %v1498_v24 = vpop.f32.mrf.mxu1 }
 0x111   : > { %v1418_v25 = vpop.f32.mrf.mxu0  ;;  %v1499_v28 = vadd.f32 %v1498_v24, %v1497_v19 }
 0x112   : > { %1119 = vst.msk [vmem:[%s1826_s30 + $0x14] sm:$0xf] %vm1113_vm0, %v1362_v21  ;;  %v1013_v26 = vmax.f32 %v946_v22, 0.0  ;;  %v829_v27 = vadd.f32 %v1417_v23, %v1818_v16  ;;  %v1500_v29 = vpop.f32.mrf.mxu1 }
 0x113   : > { %v1419_v30 = vpop.f32.mrf.mxu0 }
 0x114   : > { %v1363_v31 = vpack.c.bf16 %v1013_v26, %v1013_v26  ;;  %v949_v32 = vadd.f32 %v1499_v28, %v829_v27  ;;  %v1420_v33 = vadd.f32 %v1419_v30, %v1418_v25  ;;  %v1501_v34 = vpop.f32.mrf.mxu1 }
 0x115   : > { %v1421_v35 = vpop.f32.mrf.mxu0  ;;  %v1502_v38 = vadd.f32 %v1501_v34, %v1500_v29 }
 0x116   : > { %1120 = vst.msk [vmem:[%s1826_s30 + $0x18] sm:$0xf] %vm1113_vm0, %v1363_v31  ;;  %v1014_v36 = vmax.f32 %v949_v32, 0.0  ;;  %v834_v37 = vadd.f32 %v1420_v33, %v1818_v16  ;;  %v1503_v39 = vpop.f32.mrf.mxu1 }
 0x117   : > { %v1422_v40 = vpop.f32.mrf.mxu0 }
 0x118   : > { %v1364_v41 = vpack.c.bf16 %v1014_v36, %v1014_v36  ;;  %v954_v42 = vadd.f32 %v1502_v38, %v834_v37  ;;  %v1423_v43 = vadd.f32 %v1422_v40, %v1421_v35  ;;  %v1504_v44 = vpop.f32.mrf.mxu1 }
 0x119   : > { %v1424_v45 = vpop.f32.mrf.mxu0  ;;  %v1505_v48 = vadd.f32 %v1504_v44, %v1503_v39 }
 0x11a   : > { %1121 = vst.msk [vmem:[%s1826_s30 + $0x1c] sm:$0xf] %vm1113_vm0, %v1364_v41  ;;  %v1015_v46 = vmax.f32 %v954_v42, 0.0  ;;  %v837_v47 = vadd.f32 %v1423_v43, %v1818_v16  ;;  %v1506_v49 = vpop.f32.mrf.mxu1 }
 0x11b   : > { %v1425_v50 = vpop.f32.mrf.mxu0 }
 0x11c   : > { %v1365_v51 = vpack.c.bf16 %v1015_v46, %v1015_v46  ;;  %v957_v52 = vadd.f32 %v1505_v48, %v837_v47  ;;  %v1426_v53 = vadd.f32 %v1425_v50, %v1424_v45  ;;  %v1507_v54 = vpop.f32.mrf.mxu1 }
 0x11d   : > { %v1427_v55 = vpop.f32.mrf.mxu0  ;;  %v1508_v58 = vadd.f32 %v1507_v54, %v1506_v49 }
 0x11e   : > { %1122 = vst.msk [vmem:[%s1826_s30 + $0x20] sm:$0xf] %vm1113_vm0, %v1365_v51  ;;  %v1016_v56 = vmax.f32 %v957_v52, 0.0  ;;  %v842_v57 = vadd.f32 %v1426_v53, %v1818_v16  ;;  %v1509_v59 = vpop.f32.mrf.mxu1 }
 0x11f   : > { %v1428_v60 = vpop.f32.mrf.mxu0 }
 0x120   : > { %v1366_v61 = vpack.c.bf16 %v1016_v56, %v1016_v56  ;;  %v962_v62 = vadd.f32 %v1508_v58, %v842_v57  ;;  %v1429_v63 = vadd.f32 %v1428_v60, %v1427_v55  ;;  %v1510_v0 = vpop.f32.mrf.mxu1 }
 0x121   : > { %v1430_v1 = vpop.f32.mrf.mxu0  ;;  %v1511_v4 = vadd.f32 %v1510_v0, %v1509_v59 }
 0x122   : > { %1123 = vst.msk [vmem:[%s1826_s30 + $0x24] sm:$0xf] %vm1113_vm0, %v1366_v61  ;;  %v1017_v2 = vmax.f32 %v962_v62, 0.0  ;;  %v845_v3 = vadd.f32 %v1429_v63, %v1818_v16  ;;  %v1512_v5 = vpop.f32.mrf.mxu1 }
 0x123   : > { %v1431_v6 = vpop.f32.mrf.mxu0 }
 0x124   : > { %v1367_v7 = vpack.c.bf16 %v1017_v2, %v1017_v2  ;;  %v965_v8 = vadd.f32 %v1511_v4, %v845_v3  ;;  %v1432_v9 = vadd.f32 %v1431_v6, %v1430_v1  ;;  %v1513_v10 = vpop.f32.mrf.mxu1 }
 0x125   : > { %v1433_v11 = vpop.f32.mrf.mxu0  ;;  %v1514_v14 = vadd.f32 %v1513_v10, %v1512_v5 }
 0x126   : > { %1124 = vst.msk [vmem:[%s1826_s30 + $0x28] sm:$0xf] %vm1113_vm0, %v1367_v7  ;;  %v1018_v12 = vmax.f32 %v965_v8, 0.0  ;;  %v850_v13 = vadd.f32 %v1432_v9, %v1818_v16  ;;  %v1515_v15 = vpop.f32.mrf.mxu1 }
 0x127   : > { %v1434_v17 = vpop.f32.mrf.mxu0 }
 0x128   : > { %v1368_v18 = vpack.c.bf16 %v1018_v12, %v1018_v12  ;;  %v970_v19 = vadd.f32 %v1514_v14, %v850_v13  ;;  %v1435_v20 = vadd.f32 %v1434_v17, %v1433_v11  ;;  %v1516_v21 = vpop.f32.mrf.mxu1 }
 0x129   : > { %v1436_v22 = vpop.f32.mrf.mxu0  ;;  %v1517_v25 = vadd.f32 %v1516_v21, %v1515_v15 }
 0x12a   : > { %1125 = vst.msk [vmem:[%s1826_s30 + $0x2c] sm:$0xf] %vm1113_vm0, %v1368_v18  ;;  %v1019_v23 = vmax.f32 %v970_v19, 0.0  ;;  %v853_v24 = vadd.f32 %v1435_v20, %v1818_v16  ;;  %v1518_v26 = vpop.f32.mrf.mxu1 }
 0x12b   : > { %v1437_v27 = vpop.f32.mrf.mxu0 }
 0x12c   : > { %v1369_v28 = vpack.c.bf16 %v1019_v23, %v1019_v23  ;;  %v973_v29 = vadd.f32 %v1517_v25, %v853_v24  ;;  %v1438_v30 = vadd.f32 %v1437_v27, %v1436_v22  ;;  %v1519_v31 = vpop.f32.mrf.mxu1 }
 0x12d   : > { %v1439_v32 = vpop.f32.mrf.mxu0  ;;  %v1520_v35 = vadd.f32 %v1519_v31, %v1518_v26 }
 0x12e   : > { %1126 = vst.msk [vmem:[%s1826_s30 + $0x30] sm:$0xf] %vm1113_vm0, %v1369_v28  ;;  %v1020_v33 = vmax.f32 %v973_v29, 0.0  ;;  %v858_v34 = vadd.f32 %v1438_v30, %v1818_v16  ;;  %v1521_v36 = vpop.f32.mrf.mxu1 }
 0x12f   : > { %v1440_v37 = vpop.f32.mrf.mxu0 }
 0x130   : > { %v1370_v38 = vpack.c.bf16 %v1020_v33, %v1020_v33  ;;  %v978_v39 = vadd.f32 %v1520_v35, %v858_v34  ;;  %v1441_v40 = vadd.f32 %v1440_v37, %v1439_v32  ;;  %v1522_v41 = vpop.f32.mrf.mxu1 }
 0x131   : > { %v1442_v42 = vpop.f32.mrf.mxu0  ;;  %v1523_v45 = vadd.f32 %v1522_v41, %v1521_v36 }
 0x132   : > { %1127 = vst.msk [vmem:[%s1826_s30 + $0x34] sm:$0xf] %vm1113_vm0, %v1370_v38  ;;  %v1021_v43 = vmax.f32 %v978_v39, 0.0  ;;  %v861_v44 = vadd.f32 %v1441_v40, %v1818_v16  ;;  %v1524_v46 = vpop.f32.mrf.mxu1 }
 0x133   : > { %v1443_v47 = vpop.f32.mrf.mxu0 }
 0x134   : > { %v1371_v48 = vpack.c.bf16 %v1021_v43, %v1021_v43  ;;  %v981_v49 = vadd.f32 %v1523_v45, %v861_v44  ;;  %v1444_v50 = vadd.f32 %v1443_v47, %v1442_v42  ;;  %v1525_v51 = vpop.f32.mrf.mxu1 }
 0x135   : > { %v1445_v52 = vpop.f32.mrf.mxu0  ;;  %v1526_v55 = vadd.f32 %v1525_v51, %v1524_v46 }
 0x136   : > { %1128 = vst.msk [vmem:[%s1826_s30 + $0x38] sm:$0xf] %vm1113_vm0, %v1371_v48  ;;  %v1022_v53 = vmax.f32 %v981_v49, 0.0  ;;  %v866_v54 = vadd.f32 %v1444_v50, %v1818_v16  ;;  %v1527_v56 = vpop.f32.mrf.mxu1 }
 0x137   : > { %v1446_v57 = vpop.f32.mrf.mxu0 }
 0x138   : > { %v1372_v58 = vpack.c.bf16 %v1022_v53, %v1022_v53  ;;  %v986_v59 = vadd.f32 %v1526_v55, %v866_v54  ;;  %v1447_v60 = vadd.f32 %v1446_v57, %v1445_v52  ;;  %v1528_v61 = vpop.f32.mrf.mxu1 }
 0x139   : > { %v1448_v62 = vpop.f32.mrf.mxu0  ;;  %v1529_v1 = vadd.f32 %v1528_v61, %v1527_v56 }
 0x13a   : > { %1129 = vst.msk [vmem:[%s1826_s30 + $0x3c] sm:$0xf] %vm1113_vm0, %v1372_v58  ;;  %v1023_v63 = vmax.f32 %v986_v59, 0.0  ;;  %v869_v0 = vadd.f32 %v1447_v60, %v1818_v16  ;;  %v1530_v2 = vpop.f32.mrf.mxu1 }
 0x13b   : > { %v1449_v3 = vpop.f32.mrf.mxu0 }
 0x13c   : > { %v1373_v4 = vpack.c.bf16 %v1023_v63, %v1023_v63  ;;  %v989_v5 = vadd.f32 %v1529_v1, %v869_v0  ;;  %v1450_v6 = vadd.f32 %v1449_v3, %v1448_v62  ;;  %v1531_v7 = vpop.f32.mrf.mxu1 }
 0x13d   : > { %v1451_v8 = vpop.f32.mrf.mxu0  ;;  %v1532_v11 = vadd.f32 %v1531_v7, %v1530_v2 }
 0x13e   : > { %1130 = vst.msk [vmem:[%s1826_s30 + $0x40] sm:$0xf] %vm1113_vm0, %v1373_v4  ;;  %v1024_v9 = vmax.f32 %v989_v5, 0.0  ;;  %v874_v10 = vadd.f32 %v1450_v6, %v1818_v16  ;;  %v1533_v12 = vpop.f32.mrf.mxu1 }
 0x13f   : > { %v1452_v13 = vpop.f32.mrf.mxu0 }
 0x140   : > { %v1374_v14 = vpack.c.bf16 %v1024_v9, %v1024_v9  ;;  %v994_v15 = vadd.f32 %v1532_v11, %v874_v10  ;;  %v1453_v17 = vadd.f32 %v1452_v13, %v1451_v8  ;;  %v1534_v18 = vpop.f32.mrf.mxu1 }
 0x141   : > { %v1454_v19 = vpop.f32.mrf.mxu0  ;;  %v1535_v22 = vadd.f32 %v1534_v18, %v1533_v12 }
 0x142   : > { %1131 = vst.msk [vmem:[%s1826_s30 + $0x44] sm:$0xf] %vm1113_vm0, %v1374_v14  ;;  %v1025_v20 = vmax.f32 %v994_v15, 0.0  ;;  %v877_v21 = vadd.f32 %v1453_v17, %v1818_v16  ;;  %v1536_v23 = vpop.f32.mrf.mxu1 }
 0x143   : > { %v1455_v24 = vpop.f32.mrf.mxu0 }
 0x144   : > { %v1375_v25 = vpack.c.bf16 %v1025_v20, %v1025_v20  ;;  %v997_v26 = vadd.f32 %v1535_v22, %v877_v21  ;;  %v1456_v27 = vadd.f32 %v1455_v24, %v1454_v19  ;;  %v1537_v28 = vpop.f32.mrf.mxu1 }
 0x145   : > { %v1457_v29 = vpop.f32.mrf.mxu0  ;;  %v1538_v32 = vadd.f32 %v1537_v28, %v1536_v23 }
 0x146   : > { %1132 = vst.msk [vmem:[%s1826_s30 + $0x48] sm:$0xf] %vm1113_vm0, %v1375_v25  ;;  %v1026_v30 = vmax.f32 %v997_v26, 0.0  ;;  %v882_v31 = vadd.f32 %v1456_v27, %v1818_v16  ;;  %v1539_v33 = vpop.f32.mrf.mxu1 }
 0x147   : > { %v1458_v34 = vpop.f32.mrf.mxu0 }
 0x148   : > { %v1376_v35 = vpack.c.bf16 %v1026_v30, %v1026_v30  ;;  %v1002_v36 = vadd.f32 %v1538_v32, %v882_v31  ;;  %v1540_v37 = vpop.f32.mrf.mxu1 }
 0x14a   : > { %1133 = vst.msk [vmem:[%s1826_s30 + $0x4c] sm:$0xf] %vm1113_vm0, %v1376_v35  ;;  %v1027_v38 = vmax.f32 %v1002_v36, 0.0 }
 0x14c   : > { %v1377_v39 = vpack.c.bf16 %v1027_v38, %v1027_v38 }
 0x14e   : > { %1135 = vst.msk [vmem:[%s1826_s30 + $0x50] sm:$0x1] %vm1134_vm1, %v1377_v39 }
 0x14f PF: > { %s13_s14 = sadd.s32 1, %s1686_s14   ;;  %s1901_s12 = smov %s1682_s13 }
 0x150   : > { %p10_p5 = scmp.ge.s32.totalorder %s13_s14, 4   ;;  %s1902_s13 = smov %s1904_s15 }
 0x152   :  { %12 = sbr.rel (!%p10_p5) target bundleno = 2 (0x2), region = 68 }

// kernel: double_duel_q_forward.6
= control target key start
LH: loop header
LB: loop body
LE: loop exit
PB: predicated region body
PF: predicated region fallthrough
CT: control target
= control target key end

     0   :  { %s1671_s12 = smov 0   ;;  %s1673_s13 = smov 0   ;;  %s1935_s0 = inlined_call_operand.vmem [shape: bf16[2,98,576], index: 0, kind: input, shape index: {}]   ;;  %s1936_s1 = inlined_call_operand.vmem [shape: bf16[2,576,64], index: 1, kind: input, shape index: {}]   ;;  %s1937_s2 = inlined_call_operand.vmem [shape: f32[2,1,64], index: 2, kind: input, shape index: {}]   ;;  %s1938_s3 = inlined_call_operand.vmem [shape: bf16[2,98,64], index: 3, kind: output, shape index: {}]  }
   0x1   :  { %s1675_s14 = smov 0  }
   0x2 LB: > { %s25_s15 = sadd.s32 1, %s1643_s13  ;;  %p1231_p0 = scmp.ge.s32.totalorder %s1647_s14, 1  ;;  %s1647_s14 = sphi %s1675_s14, %s13_s14   ;;  %s1643_s13 = sphi %s1673_s13, %s1944_s13   ;;  %s1639_s12 = sphi %s1671_s12, %s1943_s12  }
   0x3   : > { %p27_p1 = scmp.ge.s32.totalorder %s25_s15, 2  ;;  %p177_p2 = scmp.lt.s32.totalorder %s1647_s14, 3 }
   0x5   : > { %s1946_s15 = smov (%p27_p1, %s25_s15), 0  ;;  %p178_p3 = pnand %p1231_p0, %p177_p2 }
   0x7   : > { %181 = sbr.rel (%p178_p3) target bundleno = 336 (0x150), region = 32 }
   0xc   : > { %p219_p4 = scmp.lt.s32.totalorder %s1639_s12, 1  ;;  %v1649_v34 = vmov 0.0   ;;  %vm1650_vm0 = vmmov 0   ;;  %vm749_vm1 = vcmask 523264   ;;  %vm1101_vm2 = vcmask 519168  }
   0xd   : > { %vm1114_vm3 = vcmask 516096  }
   0xe   : > { %s1948_s12 = smov (!%p219_p4, %s1639_s12), 1 }
   0xf   : > { %s1514_s16 = smul.u32 288, %s1948_s12  ;;  %s236_s26 = scalar_lea.vmem %s1937_s2, %s1948_s12 }
  0x10   : > { %s1513_s20 = smul.u32 260, %s1948_s12 }
  0x11   : > { %s1695_s19 = scalar_lea.vmem %s1936_s1, %s1514_s16  ;;  %s1515_s27 = smul.u32 52, %s1948_s12 }
  0x12   : > { %v1542_v0 = vld [vmem:[%s1695_s19 + $0x78] sm:$0xff]   ;;  %v1546_v4 = vld [vmem:[%s1695_s19 + $0x70] sm:$0xff]   ;;  %v1550_v8 = vld [vmem:[%s1695_s19 + $0x68] sm:$0xff]   ;;  %s1731_s23 = scalar_lea.vmem %s1935_s0, %s1513_s20 }
  0x13   : > { %v1543_v1 = vld [vmem:[%s1695_s19 + $0xf8] sm:$0xff]   ;;  %1342 = vmatprep.subr.bf16.mxu0 %v1542_v0  ;;  %v1547_v5 = vld [vmem:[%s1695_s19 + $0xf0] sm:$0xff]   ;;  %v1551_v9 = vld [vmem:[%s1695_s19 + $0xe8] sm:$0xff]   ;;  %s1871_s30 = scalar_lea.vmem %s1938_s3, %s1515_s27 }
  0x14   : > { %v1544_v2 = vld [vmem:[%s1695_s19 + $0x38] sm:$0xff]   ;;  %1400 = vmatprep.subr.bf16.mxu1 %v1543_v1  ;;  %v1548_v6 = vld [vmem:[%s1695_s19 + $0x30] sm:$0xff]   ;;  %v1552_v10 = vld [vmem:[%s1695_s19 + $0x28] sm:$0xff]  }
  0x15   : > { %v1545_v3 = vld [vmem:[%s1695_s19 + $0xb8] sm:$0xff]   ;;  %1343 = vmatpush3.bf16.msra.mxu0 %v1544_v2  ;;  %v1549_v7 = vld [vmem:[%s1695_s19 + $0xb0] sm:$0xff]   ;;  %v1553_v11 = vld [vmem:[%s1695_s19 + $0xa8] sm:$0xff]  }
  0x16   : > { %1401 = vmatpush3.bf16.msra.mxu1 %v1545_v3  ;;  %1344 = vmatprep.subr.bf16.mxu0 %v1546_v4  ;;  %v1554_v12 = vld [vmem:[%s1695_s19 + $0x60] sm:$0xff]   ;;  %v1558_v16 = vld [vmem:[%s1695_s19 + $0x58] sm:$0xff]   ;;  %v1562_v20 = vld [vmem:[%s1695_s19 + $0x50] sm:$0xff]  }
  0x17   : > { %1402 = vmatprep.subr.bf16.mxu1 %v1547_v5  ;;  %v1555_v13 = vld [vmem:[%s1695_s19 + $0xe0] sm:$0xff]   ;;  %v1559_v17 = vld [vmem:[%s1695_s19 + $0xd8] sm:$0xff]   ;;  %v1563_v21 = vld [vmem:[%s1695_s19 + $0xd0] sm:$0xff]  }
  0x18   : > { %v1556_v14 = vld [vmem:[%s1695_s19 + $0x20] sm:$0xff]   ;;  %v1560_v18 = vld [vmem:[%s1695_s19 + $0x18] sm:$0xff]   ;;  %v1564_v22 = vld [vmem:[%s1695_s19 + $0x10] sm:$0xff]  }
  0x19   : > { %1345 = vmatpush3.bf16.msra.mxu0 %v1548_v6  ;;  %v1557_v15 = vld [vmem:[%s1695_s19 + $0xa0] sm:$0xff]   ;;  %v1561_v19 = vld [vmem:[%s1695_s19 + $0x98] sm:$0xff]   ;;  %v1565_v23 = vld [vmem:[%s1695_s19 + $0x90] sm:$0xff]  }
  0x1a   : > { %1403 = vmatpush3.bf16.msra.mxu1 %v1549_v7  ;;  %1346 = vmatprep.subr.bf16.mxu0 %v1550_v8  ;;  %v1566_v24 = vld [vmem:[%s1695_s19 + $0x48] sm:$0xff]   ;;  %v1570_v28 = vld [vmem:[%s1695_s19 + $0x40] sm:$0xff]   ;;  %v1580_v37 = vld [vmem:[%s1695_s19 + $0x118] sm:$0xff]  }
  0x1b   : > { %1404 = vmatprep.subr.bf16.mxu1 %v1551_v9  ;;  %v1567_v25 = vld [vmem:[%s1695_s19 + $0xc8] sm:$0xff]   ;;  %v1571_v29 = vld [vmem:[%s1695_s19 + $0xc0] sm:$0xff]   ;;  %v1591_v43 = vld [vmem:[%s1695_s19 + $0x110] sm:$0xff]  }
  0x1c   : > { %v1568_v26 = vld [vmem:[%s1695_s19 + $0x8] sm:$0xff]   ;;  %v1572_v30 = vld [vmem:[%s1695_s19] sm:$0xff]   ;;  %v1589_v44 = vld [vmem:[%s1731_s23 + $0x5c] ss:$20 sps:$4 sm:$0xff]  }
  0x1d   : > { %1347 = vmatpush3.bf16.msra.mxu0 %v1552_v10  ;;  %v1569_v27 = vld [vmem:[%s1695_s19 + $0x88] sm:$0xff]   ;;  %v1573_v31 = vld [vmem:[%s1695_s19 + $0x80] sm:$0xff]   ;;  %v1594_v48 = vld [vmem:[%s1731_s23 + $0x7c] ss:$20 sps:$4 sm:$0xff]  }
  0x1e   : > { %1405 = vmatpush3.bf16.msra.mxu1 %v1553_v11  ;;  %1348 = vmatprep.subr.bf16.mxu0 %v1554_v12  ;;  %v1574_v32 = vld [vmem:[%s1731_s23] ss:$20 sps:$4 sm:$0xff]   ;;  %v1576_v33 = vld [vmem:[%s1731_s23 + $0x4] ss:$20 sps:$4 sm:$0xff]   ;;  %v1577_v35 = vld [vmem:[%s1731_s23 + $0x8] ss:$20 sps:$4 sm:$0xff]  }
  0x1f   : > { %1406 = vmatprep.subr.bf16.mxu1 %v1555_v13  ;;  %v1579_v36 = vld [vmem:[%s1731_s23 + $0xc] ss:$20 sps:$4 sm:$0xff]   ;;  %803 = vmatprep.mubr.bf16.mxu0 %v1576_v33  ;;  %v1583_v39 = vld [vmem:[%s1731_s23 + $0x34] ss:$20 sps:$4 sm:$0xff]   ;;  %v1586_v41 = vld [vmem:[%s1731_s23 + $0x30] ss:$20 sps:$4 sm:$0xff]  }
  0x20   : > { %891 = vmatprep.mubr.bf16.mxu1 %v1579_v36  ;;  %v1581_v38 = vld [vmem:[%s1731_s23 + $0x2c] ss:$20 sps:$4 sm:$0xff]   ;;  %v1585_v40 = vld [vmem:[%s1731_s23 + $0x28] ss:$20 sps:$4 sm:$0xff]   ;;  %v1592_v46 = vld [vmem:[%s1731_s23 + $0x50] ss:$20 sps:$4 sm:$0xff]  }
  0x21   : > { %1349 = vmatpush3.bf16.msra.mxu0 %v1556_v14  ;;  %v1587_v42 = vld [vmem:[%s1731_s23 + $0x54] ss:$20 sps:$4 sm:$0xff]   ;;  %v1593_v47 = vld [vmem:[%s1731_s23 + $0x58] ss:$20 sps:$4 sm:$0xff]   ;;  %v1613_v50 = vld [vmem:[%s1695_s19 + $0x100] sm:$0xff]  }
  0x22   : > { %1407 = vmatpush3.bf16.msra.mxu1 %v1557_v15  ;;  %1350 = vmatprep.subr.bf16.mxu0 %v1558_v16  ;;  %v1600_v45 = vld [vmem:[%s1695_s19 + $0x108] sm:$0xff]   ;;  %v1596_v49 = vld [vmem:[%s1731_s23 + $0x84] ss:$20 sps:$4 sm:$0xff]   ;;  %v1599_v52 = vld [vmem:[%s1731_s23 + $0x80] ss:$20 sps:$4 sm:$0xff]  }
  0x23   : > { %1408 = vmatprep.subr.bf16.mxu1 %v1559_v17  ;;  %v1598_v51 = vld [vmem:[%s1731_s23 + $0x78] ss:$20 sps:$4 sm:$0xff]   ;;  %v1605_v55 = vld [vmem:[%s1731_s23 + $0xa0] ss:$20 sps:$4 sm:$0xff]   ;;  %v1606_v56 = vld [vmem:[%s1731_s23 + $0xa8] ss:$20 sps:$4 sm:$0xff]  }
  0x24   : > { %v1601_v53 = vld [vmem:[%s1731_s23 + $0xa4] ss:$20 sps:$4 sm:$0xff]   ;;  %v1603_v54 = vld [vmem:[%s1731_s23 + $0xac] ss:$20 sps:$4 sm:$0xff]   ;;  %v1609_v58 = vld [vmem:[%s1731_s23 + $0xd4] ss:$20 sps:$4 sm:$0xff]  }
  0x25   : > { %1351 = vmatpush3.bf16.msra.mxu0 %v1560_v18  ;;  %v1607_v57 = vld [vmem:[%s1731_s23 + $0xcc] ss:$20 sps:$4 sm:$0xff]   ;;  %v284_v59 = vld [vmem:[%s1731_s23 + $0xf0] sm:$0x11]  ;;  %v285_v60 = vld [vmem:[%s1731_s23 + $0xf8] sm:$0x11] }
  0x26   : > { %1409 = vmatpush3.bf16.msra.mxu1 %v1561_v19  ;;  %1352 = vmatprep.subr.bf16.mxu0 %v1562_v20  ;;  %v1611_v61 = vld [vmem:[%s1731_s23 + $0xc8] ss:$20 sps:$4 sm:$0xff]   ;;  %v1612_v62 = vld [vmem:[%s1731_s23 + $0xd0] ss:$20 sps:$4 sm:$0xff]   ;;  %v1267_v63 = vcombine.high %v284_v59, %v284_v59  ;;  %v1269_v0 = vcombine.high %v285_v60, %v285_v60  ;;  %v1266_v1 = vcombine.low %v284_v59, %v284_v59  ;;  %v1620_v5 = vld [vmem:[%s1731_s23 + $0x38] ss:$20 sps:$4 sm:$0xff]  }
  0x27   : > { %1410 = vmatprep.subr.bf16.mxu1 %v1563_v21  ;;  %v1268_v2 = vcombine.low %v285_v60, %v285_v60  ;;  %v1618_v3 = vld [vmem:[%s1731_s23 + $0x10] ss:$20 sps:$4 sm:$0xff]   ;;  %v1621_v6 = vld [vmem:[%s1731_s23 + $0xd8] ss:$20 sps:$4 sm:$0xff]   ;;  %v1622_v7 = vld [vmem:[%s1731_s23 + $0x60] ss:$20 sps:$4 sm:$0xff]  }
  0x28   : > { %v1619_v4 = vld [vmem:[%s1731_s23 + $0xb0] ss:$20 sps:$4 sm:$0xff]   ;;  %v1623_v8 = vld [vmem:[%s1731_s23 + $0x100] ss:$0 sps:$4 sm:$0x11]  }
  0x29   : > { %1353 = vmatpush3.bf16.msra.mxu0 %v1564_v22  ;;  %v1624_v9 = vld [vmem:[%s1731_s23 + $0x88] ss:$20 sps:$4 sm:$0xff]   ;;  %v1851_v59 = vld [vmem:[%s236_s26] ss:$0 sm:$0xff] }
  0x2a   : > { %1411 = vmatpush3.bf16.msra.mxu1 %v1565_v23  ;;  %1354 = vmatprep.subr.bf16.mxu0 %v1566_v24 }
  0x2b   : > { %1412 = vmatprep.subr.bf16.mxu1 %v1567_v25 }
  0x2d   : > { %1355 = vmatpush3.bf16.msra.mxu0 %v1568_v26 }
  0x2e   : > { %1413 = vmatpush3.bf16.msra.mxu1 %v1569_v27  ;;  %1356 = vmatprep.subr.bf16.mxu0 %v1570_v28 }
  0x2f   : > { %1414 = vmatprep.subr.bf16.mxu1 %v1571_v29 }
  0x31   : > { %1357 = vmatpush3.bf16.msra.mxu0 %v1572_v30 }
  0x32   : > { %1415 = vmatpush3.bf16.msra.mxu1 %v1573_v31  ;;  %1469 = vmatprep.subr.bf16.mxu0 %v1649_v34 }
  0x33   : > { %1505 = vmatprep.subr.bf16.mxu1 %v1649_v34 }
  0x34   : > { %804 = vmatmul.mubr.bf16.vlgmr.msra.gmra.mxu0 %v1574_v32 }
  0x35   : > { %892 = vmatmul.mubr.bf16.vlgmr.msra.gmra.mxu1 %v1577_v35  ;;  %1470 = vmatpush3.bf16.msra.mxu0 %v1580_v37 }
  0x36   : > { %811 = vmatprep.mubr.bf16.mxu0 %v1581_v38  ;;  %1509 = vmatpush3.bf16.msra.mxu1 %v1580_v37 }
  0x37   : > { %899 = vmatprep.mubr.bf16.mxu1 %v1583_v39  ;;  %1471 = vmatprep.subr.bf16.mxu0 %v1649_v34 }
  0x38   : > { %1506 = vmatprep.subr.bf16.mxu1 %v1649_v34 }
  0x39   : > { %1472 = vmatpush3.bf16.msra.mxu0 %v1591_v43 }
  0x3a   : > { %1510 = vmatpush3.bf16.msra.mxu1 %v1591_v43  ;;  %1473 = vmatprep.subr.bf16.mxu0 %v1649_v34 }
  0x3b   : > { %1507 = vmatprep.subr.bf16.mxu1 %v1649_v34 }
  0x3c   : > { %812 = vmatmul.mubr.bf16.gmra.mxu0 %v1585_v40 }
  0x3d   : > { %900 = vmatmul.mubr.bf16.gmra.mxu1 %v1586_v41  ;;  %819 = vmatprep.mubr.bf16.mxu0 %v1587_v42 }
  0x3e   : > { %907 = vmatprep.mubr.bf16.mxu1 %v1589_v44  ;;  %1474 = vmatpush3.bf16.msra.mxu0 %v1600_v45 }
  0x3f   : > { %1511 = vmatpush3.bf16.msra.mxu1 %v1600_v45  ;;  %1475 = vmatprep.subr.bf16.mxu0 %v1649_v34 }
  0x40   : > { %1508 = vmatprep.subr.bf16.mxu1 %v1649_v34 }
  0x42   : > { %1476 = vmatpush3.bf16.msra.mxu0 %v1613_v50 }
  0x43   : > { %1512 = vmatpush3.bf16.msra.mxu1 %v1613_v50 }
  0x44   : > { %820 = vmatmul.mubr.bf16.gmra.mxu0 %v1592_v46 }
  0x45   : > { %908 = vmatmul.mubr.bf16.gmra.mxu1 %v1593_v47  ;;  %827 = vmatprep.mubr.bf16.mxu0 %v1594_v48 }
  0x46   : > { %915 = vmatprep.mubr.bf16.mxu1 %v1596_v49 }
  0x4c   : > { %828 = vmatmul.mubr.bf16.gmra.mxu0 %v1598_v51 }
  0x4d   : > { %916 = vmatmul.mubr.bf16.gmra.mxu1 %v1599_v52  ;;  %835 = vmatprep.mubr.bf16.mxu0 %v1601_v53 }
  0x4e   : > { %923 = vmatprep.mubr.bf16.mxu1 %v1603_v54 }
  0x54   : > { %836 = vmatmul.mubr.bf16.gmra.mxu0 %v1605_v55 }
  0x55   : > { %924 = vmatmul.mubr.bf16.gmra.mxu1 %v1606_v56  ;;  %843 = vmatprep.mubr.bf16.mxu0 %v1607_v57 }
  0x56   : > { %931 = vmatprep.mubr.bf16.mxu1 %v1609_v58 }
  0x5c   : > { %844 = vmatmul.mubr.bf16.gmra.mxu0 %v1611_v61 }
  0x5d   : > { %932 = vmatmul.mubr.bf16.gmra.mxu1 %v1612_v62  ;;  %851 = vmatprep.mubr.bf16.mxu0 %v1267_v63 }
  0x5e   : > { %939 = vmatprep.mubr.bf16.mxu1 %v1269_v0 }
  0x64   : > { %852 = vmatmul.mubr.bf16.gmra.mxu0 %v1266_v1 }
  0x65   : > { %940 = vmatmul.mubr.bf16.gmra.mxu1 %v1268_v2  ;;  %1477 = vmatprep.mubr.msk.bf16.mxu0 %vm1650_vm0, %v1649_v34 }
  0x66   : > { %1493 = vmatprep.mubr.msk.bf16.mxu1 %vm1650_vm0, %v1649_v34 }
  0x6c   : > { %1478 = vmatmul.mubr.msk.bf16.vlgmr.msra.gmra.mxu0 %vm749_vm1, %v1618_v3 }
  0x6d   : > { %1494 = vmatmul.mubr.msk.bf16.vlgmr.msra.gmra.mxu1 %vm749_vm1, %v1619_v4  ;;  %1481 = vmatprep.mubr.msk.bf16.mxu0 %vm1650_vm0, %v1649_v34 }
  0x6e   : > { %1497 = vmatprep.mubr.msk.bf16.mxu1 %vm1650_vm0, %v1649_v34 }
  0x74   : > { %1482 = vmatmul.mubr.msk.bf16.gmra.mxu0 %vm749_vm1, %v1620_v5 }
  0x75   : > { %1498 = vmatmul.mubr.msk.bf16.gmra.mxu1 %vm749_vm1, %v1621_v6  ;;  %1485 = vmatprep.mubr.msk.bf16.mxu0 %vm1650_vm0, %v1649_v34 }
  0x76   : > { %1501 = vmatprep.mubr.msk.bf16.mxu1 %vm1650_vm0, %v1649_v34 }
  0x7c   : > { %1486 = vmatmul.mubr.msk.bf16.gmra.mxu0 %vm749_vm1, %v1622_v7 }
  0x7d   : > { %1502 = vmatmul.mubr.msk.bf16.gmra.mxu1 %vm749_vm1, %v1623_v8  ;;  %1489 = vmatprep.mubr.msk.bf16.mxu0 %vm1650_vm0, %v1649_v34 }
  0x84   : > { %1490 = vmatmul.mubr.msk.bf16.gmra.mxu0 %vm749_vm1, %v1624_v9 }
  0xf4   : > { %v1358_v10 = vpop.f32.mrf.mxu0 }
  0xf5   : > { %v1416_v11 = vpop.f32.mrf.mxu1 }
  0xf6   : > { %v1359_v12 = vpop.f32.mrf.mxu0 }
  0xf7   : > { %v1417_v13 = vpop.f32.mrf.mxu1  ;;  %v1360_v57 = vadd.f32 %v1359_v12, %v1358_v10 }
  0xf8   : > { %v1361_v14 = vpop.f32.mrf.mxu0  ;;  %v1418_v2 = vadd.f32 %v1417_v13, %v1416_v11 }
  0xf9   : > { %v1419_v15 = vpop.f32.mrf.mxu1  ;;  %v806_v1 = vadd.f32 %v1360_v57, %v1851_v59 }
  0xfa   : > { %v1362_v16 = vpop.f32.mrf.mxu0 }
  0xfb   : > { %v1420_v17 = vpop.f32.mrf.mxu1  ;;  %v1363_v63 = vadd.f32 %v1362_v16, %v1361_v14  ;;  %v894_v16 = vadd.f32 %v1418_v2, %v806_v1 }
  0xfc   : > { %v1364_v18 = vpop.f32.mrf.mxu0  ;;  %v1421_v10 = vadd.f32 %v1420_v17, %v1419_v15 }
  0xfd   : > { %v1801_v19 = vpop.f32.mrf.mxu1  ;;  %v809_v9 = vadd.f32 %v1363_v63, %v1851_v59 }
  0xfe   : > { %v1365_v20 = vpop.f32.mrf.mxu0 }
  0xff   : > { %v1803_v21 = vpop.f32.mrf.mxu1  ;;  %v1366_v12 = vadd.f32 %v1365_v20, %v1364_v18  ;;  %v897_v17 = vadd.f32 %v1421_v10, %v809_v9 }
 0x100   : > { %v1805_v22 = vpop.f32.mrf.mxu0 }
 0x101   : > { %v1807_v23 = vpop.f32.mrf.mxu1 }
 0x102   : > { %v1809_v24 = vpop.f32.mrf.mxu0 }
 0x103   : > { %v1811_v25 = vpop.f32.mrf.mxu1  ;;  %v1369_v18 = vadd.f32 %v1809_v24, %v1805_v22 }
 0x104   : > { %v1813_v26 = vpop.f32.mrf.mxu0  ;;  %v1427_v24 = vadd.f32 %v1811_v25, %v1807_v23 }
 0x105   : > { %v1815_v27 = vpop.f32.mrf.mxu1 }
 0x106   : > { %v1817_v28 = vpop.f32.mrf.mxu0 }
 0x107   : > { %v1819_v29 = vpop.f32.mrf.mxu1  ;;  %v1372_v1 = vadd.f32 %v1817_v28, %v1813_v26 }
 0x108   : > { %v1821_v30 = vpop.f32.mrf.mxu0 }
 0x109   : > { %v1823_v31 = vpop.f32.mrf.mxu1 }
 0x10a   : > { %v1825_v32 = vpop.f32.mrf.mxu0 }
 0x10b   : > { %v1827_v33 = vpop.f32.mrf.mxu1  ;;  %v1375_v26 = vadd.f32 %v1825_v32, %v1821_v30 }
 0x10c   : > { %v1829_v34 = vpop.f32.mrf.mxu0 }
 0x10d   : > { %v1831_v35 = vpop.f32.mrf.mxu1 }
 0x10e   : > { %v1833_v36 = vpop.f32.mrf.mxu0 }
 0x10f   : > { %v1835_v37 = vpop.f32.mrf.mxu1 }
 0x110   : > { %v1837_v38 = vpop.f32.mrf.mxu0 }
 0x111   : > { %v1839_v39 = vpop.f32.mrf.mxu1 }
 0x112   : > { %1939 = vst [vmem:[#allocation2_spill] sm:$0xff] %v1839_v39  ;;  %v1841_v40 = vpop.f32.mrf.mxu0 }
 0x113   : > { %v1843_v41 = vpop.f32.mrf.mxu1 }
 0x114   : > { %1940 = vst [vmem:[#allocation3_spill] sm:$0xff] %v1843_v41  ;;  %v1382_v42 = vpop.f32.mrf.mxu0 }
 0x115   : > { %v1440_v43 = vpop.f32.mrf.mxu1 }
 0x116   : > { %v1383_v44 = vpop.f32.mrf.mxu0 }
 0x117   : > { %v1441_v45 = vpop.f32.mrf.mxu1  ;;  %v1384_v60 = vadd.f32 %v1383_v44, %v1382_v42 }
 0x118   : > { %v1385_v46 = vpop.f32.mrf.mxu0  ;;  %v1442_v5 = vadd.f32 %v1441_v45, %v1440_v43  ;;  %v814_v43 = vadd.f32 %v1366_v12, %v1851_v59  ;;  %v1424_v45 = vadd.f32 %v1803_v21, %v1801_v19 }
 0x119   : > { %v1443_v47 = vpop.f32.mrf.mxu1  ;;  %v838_v4 = vadd.f32 %v1384_v60, %v1851_v59 }
 0x11a   : > { %v1386_v48 = vpop.f32.mrf.mxu0 }
 0x11b   : > { %v1444_v49 = vpop.f32.mrf.mxu1  ;;  %v1387_v6 = vadd.f32 %v1386_v48, %v1385_v46  ;;  %v926_v41 = vadd.f32 %v1442_v5, %v838_v4 }
 0x11c   : > { %v1388_v50 = vpop.f32.mrf.mxu0  ;;  %v1445_v11 = vadd.f32 %v1444_v49, %v1443_v47 }
 0x11d   : > { %v1446_v51 = vpop.f32.mrf.mxu1  ;;  %v841_v57 = vadd.f32 %v1387_v6, %v1851_v59 }
 0x11e   : > { %v1389_v52 = vpop.f32.mrf.mxu0 }
 0x11f   : > { %v1447_v53 = vpop.f32.mrf.mxu1  ;;  %v1390_v44 = vadd.f32 %v1389_v52, %v1388_v50 }
 0x120   : > { %v1391_v54 = vpop.f32.mrf.mxu0  ;;  %v1448_v48 = vadd.f32 %v1447_v53, %v1446_v51 }
 0x121   : > { %v1849_v55 = vpop.f32.mrf.mxu1  ;;  %v846_v20 = vadd.f32 %v1390_v44, %v1851_v59 }
 0x122   : > { %v1392_v56 = vpop.f32.mrf.mxu0 }
 0x123   : > { %v1450_v58 = vpop.f32.mrf.mxu1  ;;  %v1393_v50 = vadd.f32 %v1392_v56, %v1391_v54  ;;  %v902_v54 = vadd.f32 %v1424_v45, %v814_v43  ;;  %v817_v56 = vadd.f32 %v1369_v18, %v1851_v59  ;;  %v934_v5 = vadd.f32 %v1448_v48, %v846_v20 }
 0x124   : > { %v1394_v61 = vpop.f32.mrf.mxu0  ;;  %v1433_v43 = vadd.f32 %v1827_v33, %v1823_v31 }
 0x125   : > { %v1853_v62 = vpop.f32.mrf.mxu1  ;;  %v849_v6 = vadd.f32 %v1393_v50, %v1851_v59 }
 0x126   : > { %v1395_v0 = vpop.f32.mrf.mxu0 }
 0x127   : > { %v1856_v3 = vpop.f32.mrf.mxu1  ;;  %v1396_v23 = vadd.f32 %v1395_v0, %v1394_v61  ;;  %v905_v0 = vadd.f32 %v1427_v24, %v817_v56 }
 0x128   : > { %v1397_v7 = vpop.f32.mrf.mxu0 }
 0x129   : > { %v1455_v8 = vpop.f32.mrf.mxu1  ;;  %v1451_v7 = vadd.f32 %v1450_v58, %v1849_v55  ;;  %v1430_v55 = vadd.f32 %v1819_v29, %v1815_v27  ;;  %v825_v29 = vadd.f32 %v1375_v26, %v1851_v59 }
 0x12a   : > { %v1398_v42 = vpop.f32.mrf.mxu0 }
 0x12b   : > { %v1456_v14 = vpop.f32.mrf.mxu1 }
 0x12c   : > { %v981_v13 = vpop.f32.mrf.mxu0  ;;  %v822_v14 = vadd.f32 %v1372_v1, %v1851_v59  ;;  %v1941_v1 = vld [vmem:[#allocation2_spill] sm:$0xff] }
 0x12d   : > { %v982_v39 = vadd.f32 %v981_v13, %v894_v16  ;;  %v1013_v60 = vpop.f32.mrf.mxu1  ;;  %v854_v16 = vadd.f32 %v1396_v23, %v1851_v59 }
 0x12e   : > { %v1014_v46 = vadd.f32 %v1013_v60, %v926_v41  ;;  %v1479_v15 = vpop.f32.mrf.mxu0  ;;  %v929_v41 = vadd.f32 %v1445_v11, %v841_v57  ;;  %v1454_v57 = vadd.f32 %v1856_v3, %v1853_v62  ;;  %v937_v11 = vadd.f32 %v1451_v7, %v849_v6 }
 0x12f   : > { %v1035_v47 = vmax.f32 %v982_v39, 0.0  ;;  %v1495_v49 = vpop.f32.mrf.mxu1  ;;  %v1378_v62 = vadd.f32 %v1833_v36, %v1829_v34  ;;  %v910_v18 = vadd.f32 %v1430_v55, %v822_v14  ;;  %v1436_v36 = vadd.f32 %v1835_v37, %v1831_v35 }
 0x130   : > { %v1043_v19 = vmax.f32 %v1014_v46, 0.0  ;;  %v984_v21 = vpop.f32.mrf.mxu0 }
 0x131   : > { %v1329_v52 = vpack.c.bf16 %v1035_v47, %v1035_v47  ;;  %v985_v63 = vadd.f32 %v984_v21, %v897_v17  ;;  %v1016_v22 = vpop.f32.mrf.mxu1  ;;  %v942_v47 = vadd.f32 %v1454_v57, %v854_v16  ;;  %v830_v34 = vadd.f32 %v1378_v62, %v1851_v59 }
 0x132   : > { %v1337_v39 = vpack.c.bf16 %v1043_v19, %v1043_v19  ;;  %v1017_v51 = vadd.f32 %v1016_v22, %v929_v41  ;;  %v1480_v53 = vpop.f32.mrf.mxu0  ;;  %v913_v41 = vadd.f32 %v1433_v43, %v825_v29 }
 0x133   : > { %1102 = vst.msk [vmem:[%s1871_s30] sm:$0xf] %vm1101_vm2, %v1329_v52  ;;  %v1036_v2 = vmax.f32 %v985_v63, 0.0  ;;  %v1496_v4 = vpop.f32.mrf.mxu1  ;;  %v1381_v52 = vadd.f32 %v1841_v40, %v1837_v38  ;;  %v1942_v38 = vld [vmem:[#allocation3_spill] sm:$0xff] }
 0x134   : > { %1110 = vst.msk [vmem:[%s1871_s30 + $0x20] sm:$0xf] %vm1101_vm2, %v1337_v39  ;;  %v1044_v25 = vmax.f32 %v1017_v51, 0.0  ;;  %v989_v8 = vpop.f32.mrf.mxu0  ;;  %v1439_v40 = vadd.f32 %v1942_v38, %v1941_v1  ;;  %v918_v4 = vadd.f32 %v1436_v36, %v830_v34 }
 0x135   : > { %v1330_v9 = vpack.c.bf16 %v1036_v2, %v1036_v2  ;;  %v990_v10 = vadd.f32 %v989_v8, %v902_v54  ;;  %v1021_v12 = vpop.f32.mrf.mxu1  ;;  %v833_v37 = vadd.f32 %v1381_v52, %v1851_v59 }
 0x136   : > { %v1338_v28 = vpack.c.bf16 %v1044_v25, %v1044_v25  ;;  %v1022_v42 = vadd.f32 %v1021_v12, %v934_v5  ;;  %v1483_v44 = vpop.f32.mrf.mxu0 }
 0x137   : > { %1103 = vst.msk [vmem:[%s1871_s30 + $0x4] sm:$0xf] %vm1101_vm2, %v1330_v9  ;;  %v1037_v58 = vmax.f32 %v990_v10, 0.0  ;;  %v1499_v61 = vpop.f32.mrf.mxu1  ;;  %v921_v9 = vadd.f32 %v1439_v40, %v833_v37 }
 0x138   : > { %1111 = vst.msk [vmem:[%s1871_s30 + $0x24] sm:$0xf] %vm1101_vm2, %v1338_v28  ;;  %v1045_v30 = vmax.f32 %v1022_v42, 0.0  ;;  %v992_v32 = vpop.f32.mrf.mxu0 }
 0x139   : > { %v1331_v13 = vpack.c.bf16 %v1037_v58, %v1037_v58  ;;  %v993_v60 = vadd.f32 %v992_v32, %v905_v0  ;;  %v1024_v27 = vpop.f32.mrf.mxu1 }
 0x13a   : > { %v1339_v45 = vpack.c.bf16 %v1045_v30, %v1045_v30  ;;  %v1025_v46 = vadd.f32 %v1024_v27, %v937_v11  ;;  %v1484_v15 = vpop.f32.mrf.mxu0 }
 0x13b   : > { %1104 = vst.msk [vmem:[%s1871_s30 + $0x8] sm:$0xf] %vm1101_vm2, %v1331_v13  ;;  %v1038_v3 = vmax.f32 %v993_v60, 0.0  ;;  %v1500_v17 = vpop.f32.mrf.mxu1 }
 0x13c   : > { %1112 = vst.msk [vmem:[%s1871_s30 + $0x28] sm:$0xf] %vm1101_vm2, %v1339_v45  ;;  %v1046_v20 = vmax.f32 %v1025_v46, 0.0  ;;  %v997_v48 = vpop.f32.mrf.mxu0 }
 0x13d   : > { %v1332_v49 = vpack.c.bf16 %v1038_v3, %v1038_v3  ;;  %v998_v31 = vadd.f32 %v997_v48, %v910_v18  ;;  %v1029_v33 = vpop.f32.mrf.mxu1 }
 0x13e   : > { %v1340_v50 = vpack.c.bf16 %v1046_v20, %v1046_v20  ;;  %v1030_v19 = vadd.f32 %v1029_v33, %v942_v47  ;;  %v1487_v21 = vpop.f32.mrf.mxu0 }
 0x13f   : > { %1105 = vst.msk [vmem:[%s1871_s30 + $0xc] sm:$0xf] %vm1101_vm2, %v1332_v49  ;;  %v1039_v63 = vmax.f32 %v998_v31, 0.0  ;;  %v1503_v22 = vpop.f32.mrf.mxu1 }
 0x140   : > { %1113 = vst.msk [vmem:[%s1871_s30 + $0x2c] sm:$0xf] %vm1101_vm2, %v1340_v50  ;;  %v1047_v24 = vmax.f32 %v1030_v19, 0.0  ;;  %v1000_v39 = vpop.f32.mrf.mxu0 }
 0x141   : > { %v1333_v51 = vpack.c.bf16 %v1039_v63, %v1039_v63  ;;  %v1001_v53 = vadd.f32 %v1000_v39, %v913_v41  ;;  %v1032_v54 = vpop.f32.mrf.mxu1 }
 0x142   : > { %v1341_v56 = vpack.c.bf16 %v1047_v24, %v1047_v24  ;;  %v1488_v35 = vpop.f32.mrf.mxu0 }
 0x143   : > { %1106 = vst.msk [vmem:[%s1871_s30 + $0x10] sm:$0xf] %vm1101_vm2, %v1333_v51  ;;  %v1040_v2 = vmax.f32 %v1001_v53, 0.0  ;;  %v1504_v5 = vpop.f32.mrf.mxu1 }
 0x144   : > { %1115 = vst.msk [vmem:[%s1871_s30 + $0x30] sm:$0x1] %vm1114_vm3, %v1341_v56  ;;  %v1005_v6 = vpop.f32.mrf.mxu0 }
 0x145   : > { %v1334_v7 = vpack.c.bf16 %v1040_v2, %v1040_v2  ;;  %v1006_v23 = vadd.f32 %v1005_v6, %v918_v4 }
 0x146   : > { %v1491_v25 = vpop.f32.mrf.mxu0 }
 0x147   : > { %1107 = vst.msk [vmem:[%s1871_s30 + $0x14] sm:$0xf] %vm1101_vm2, %v1334_v7  ;;  %v1041_v8 = vmax.f32 %v1006_v23, 0.0 }
 0x148   : > { %v1008_v59 = vpop.f32.mrf.mxu0 }
 0x149   : > { %v1335_v10 = vpack.c.bf16 %v1041_v8, %v1041_v8  ;;  %v1009_v12 = vadd.f32 %v1008_v59, %v921_v9 }
 0x14a   : > { %v1492_v26 = vpop.f32.mrf.mxu0 }
 0x14b   : > { %1108 = vst.msk [vmem:[%s1871_s30 + $0x18] sm:$0xf] %vm1101_vm2, %v1335_v10  ;;  %v1042_v28 = vmax.f32 %v1009_v12, 0.0 }
 0x14d   : > { %v1336_v42 = vpack.c.bf16 %v1042_v28, %v1042_v28 }
 0x14f   : > { %1109 = vst.msk [vmem:[%s1871_s30 + $0x1c] sm:$0xf] %vm1101_vm2, %v1336_v42 }
 0x150 PF: > { %s13_s14 = sadd.s32 1, %s1647_s14   ;;  %s1943_s12 = smov %s1643_s13 }
 0x151   : > { %p10_p5 = scmp.ge.s32.totalorder %s13_s14, 4   ;;  %s1944_s13 = smov %s1946_s15 }
 0x153   :  { %12 = sbr.rel (!%p10_p5) target bundleno = 2 (0x2), region = 68 }

// kernel: double_duel_q_forward.7
= control target key start
LH: loop header
LB: loop body
LE: loop exit
PB: predicated region body
PF: predicated region fallthrough
CT: control target
= control target key end

     0   :  { %s4859_s18 = smov 0   ;;  %s4861_s19 = smov 0   ;;  %s5406_s0 = inlined_call_operand.vmem [shape: bf16[2,2,3136], index: 0, kind: input, shape index: {}]   ;;  %s5407_s1 = inlined_call_operand.vmem [shape: bf16[2,3136,256], index: 1, kind: input, shape index: {}]   ;;  %s5408_s2 = inlined_call_operand.vmem [shape: f32[2,1,256], index: 2, kind: input, shape index: {}]   ;;  %s5409_s3 = inlined_call_operand.vmem [shape: bf16[2,256,128], index: 3, kind: input, shape index: {}]   ;;  %s5410_s4 = inlined_call_operand.vmem [shape: f32[2,1,128], index: 4, kind: input, shape index: {}]   ;;  %s5411_s5 = inlined_call_operand.vmem [shape: f32[2,2,128], index: 5, kind: output, shape index: {}]  }
   0x1   :  { %s4863_s20 = smov 0  }
   0x2 LB: > { %s27_s21 = sadd.s32 1, %s4821_s19  ;;  %p3726_p0 = scmp.ge.s32.totalorder %s4825_s20, 1  ;;  %s4825_s20 = sphi %s4863_s20, %s15_s20   ;;  %s4821_s19 = sphi %s4861_s19, %s5413_s19   ;;  %s4817_s18 = sphi %s4859_s18, %s5412_s18  }
   0x3   : > { %p29_p1 = scmp.ge.s32.totalorder %s27_s21, 2  ;;  %p243_p2 = scmp.lt.s32.totalorder %s4825_s20, 3 }
   0x5   : > { %s5415_s21 = smov (%p29_p1, %s27_s21), 0  ;;  %p244_p3 = pnand %p3726_p0, %p243_p2 }
   0x6   : > { %p293_p4 = scmp.lt.s32.totalorder (!%p244_p3), %s4817_s18, 1 }
   0x7   : > { %247 = sbr.rel (%p244_p3) target bundleno = 819 (0x333), region = 40 }
   0xc   : > { %s5417_s18 = smov (!%p293_p4, %s4817_s18), 1  ;;  %v724_v35 = vlaneseq  ;;  %v4827_v36 = vmov 1966171168   ;;  %vm2883_vm0 = vcmask 523264  }
   0xd   : > { %s4169_s22 = smul.u32 3136, %s5417_s18  ;;  %v740_v37 = vunpack.c.l.s4 %v4827_v36  ;;  %s3728_s30 = sshll.u32 %s5417_s18, 1 }
   0xe   : > { %s4168_s26 = smul.u32 25, %s5417_s18  ;;  %v4925_v42 = vshrl.u32 %v724_v35, 7  ;;  %s309_s8 = scalar_lea.vmem %s5408_s2, %s3728_s30 }
   0xf   : > { %s4883_s25 = scalar_lea.vmem %s5407_s1, %s4169_s22  ;;  %v741_v43 = vunpack.c.0.s8 %v740_v37  ;;  %s4145_s9 = sshll.u32 %s5417_s18, 7 }
  0x10   : > { %v4196_v0 = vld [vmem:[%s4883_s25 + $0x74] ss:$8 sps:$4 sm:$0xff]   ;;  %v4198_v1 = vld [vmem:[%s4883_s25 + $0x70] ss:$8 sps:$4 sm:$0xff]   ;;  %v4202_v4 = vld [vmem:[%s4883_s25 + $0x64] ss:$8 sps:$4 sm:$0xff]   ;;  %s4934_s29 = scalar_lea.vmem %s5406_s0, %s4168_s26  ;;  %s5369_s12 = scalar_lea.vmem %s5409_s3, %s4145_s9 }
  0x11   : > { %2887 = vmatprep.subr.bf16.mxu0 %v4196_v0  ;;  %v4199_v2 = vld [vmem:[%s4883_s25 + $0x174] ss:$8 sps:$4 sm:$0xff]   ;;  %v4201_v3 = vld [vmem:[%s4883_s25 + $0x170] ss:$8 sps:$4 sm:$0xff]   ;;  %v4204_v5 = vld [vmem:[%s4883_s25 + $0x60] ss:$8 sps:$4 sm:$0xff]   ;;  %v4937_v48 = vsub.s32 %v741_v43, %v4925_v42  ;;  %s317_s15 = scalar_lea.vmem %s5410_s4, %s5417_s18  ;;  %s324_s22 = scalar_lea.vmem %s5411_s5, %s3728_s30 }
  0x12   : > { %2888 = vmatpush1.bf16.msra.mxu0 %v4198_v1  ;;  %2928 = vmatprep.subr.bf16.mxu1 %v4199_v2  ;;  %v4205_v6 = vld [vmem:[%s4883_s25 + $0x164] ss:$8 sps:$4 sm:$0xff]   ;;  %v4207_v7 = vld [vmem:[%s4883_s25 + $0x160] ss:$8 sps:$4 sm:$0xff]   ;;  %v4208_v8 = vld [vmem:[%s4883_s25 + $0x54] ss:$8 sps:$4 sm:$0xff]  }
  0x13   : > { %2929 = vmatpush1.bf16.msra.mxu1 %v4201_v3  ;;  %2889 = vmatprep.subr.bf16.mxu0 %v4202_v4  ;;  %v4210_v9 = vld [vmem:[%s4883_s25 + $0x50] ss:$8 sps:$4 sm:$0xff]   ;;  %v4211_v10 = vld [vmem:[%s4883_s25 + $0x154] ss:$8 sps:$4 sm:$0xff]   ;;  %v4214_v11 = vld [vmem:[%s4883_s25 + $0x44] ss:$8 sps:$4 sm:$0xff]  }
  0x14   : > { %2930 = vmatprep.subr.bf16.mxu1 %v4205_v6  ;;  %v4213_v12 = vld [vmem:[%s4883_s25 + $0x150] ss:$8 sps:$4 sm:$0xff]   ;;  %v4217_v13 = vld [vmem:[%s4883_s25 + $0x144] ss:$8 sps:$4 sm:$0xff]   ;;  %v4216_v14 = vld [vmem:[%s4883_s25 + $0x40] ss:$8 sps:$4 sm:$0xff]  }
  0x15   : > { %v4220_v15 = vld [vmem:[%s4883_s25 + $0x34] ss:$8 sps:$4 sm:$0xff]   ;;  %v4219_v16 = vld [vmem:[%s4883_s25 + $0x140] ss:$8 sps:$4 sm:$0xff]   ;;  %v4222_v18 = vld [vmem:[%s4883_s25 + $0x30] ss:$8 sps:$4 sm:$0xff]  }
  0x16   : > { %2890 = vmatpush1.bf16.msra.mxu0 %v4204_v5  ;;  %v4223_v17 = vld [vmem:[%s4883_s25 + $0x134] ss:$8 sps:$4 sm:$0xff]   ;;  %v4226_v19 = vld [vmem:[%s4883_s25 + $0x24] ss:$8 sps:$4 sm:$0xff]   ;;  %v4225_v20 = vld [vmem:[%s4883_s25 + $0x130] ss:$8 sps:$4 sm:$0xff]  }
  0x17   : > { %2891 = vmatprep.subr.bf16.mxu0 %v4208_v8  ;;  %2931 = vmatpush1.bf16.msra.mxu1 %v4207_v7  ;;  %v4229_v21 = vld [vmem:[%s4883_s25 + $0x124] ss:$8 sps:$4 sm:$0xff]   ;;  %v4228_v22 = vld [vmem:[%s4883_s25 + $0x20] ss:$8 sps:$4 sm:$0xff]   ;;  %v4232_v23 = vld [vmem:[%s4883_s25 + $0x14] ss:$8 sps:$4 sm:$0xff]  }
  0x18   : > { %2932 = vmatprep.subr.bf16.mxu1 %v4211_v10  ;;  %v4231_v24 = vld [vmem:[%s4883_s25 + $0x120] ss:$8 sps:$4 sm:$0xff]   ;;  %v4235_v25 = vld [vmem:[%s4883_s25 + $0x114] ss:$8 sps:$4 sm:$0xff]   ;;  %v4234_v26 = vld [vmem:[%s4883_s25 + $0x10] ss:$8 sps:$4 sm:$0xff]  }
  0x19   : > { %v4238_v27 = vld [vmem:[%s4883_s25 + $0x4] ss:$8 sps:$4 sm:$0xff]   ;;  %v4237_v28 = vld [vmem:[%s4883_s25 + $0x110] ss:$8 sps:$4 sm:$0xff]   ;;  %v4240_v30 = vld [vmem:[%s4883_s25] ss:$8 sps:$4 sm:$0xff]  }
  0x1a   : > { %2892 = vmatpush1.bf16.msra.mxu0 %v4210_v9  ;;  %v4241_v29 = vld [vmem:[%s4883_s25 + $0x104] ss:$8 sps:$4 sm:$0xff]   ;;  %v4244_v31 = vld [vmem:[%s4883_s25 + $0xf4] ss:$8 sps:$4 sm:$0xff]   ;;  %v4243_v32 = vld [vmem:[%s4883_s25 + $0x100] ss:$8 sps:$4 sm:$0xff]  }
  0x1b   : > { %2893 = vmatprep.subr.bf16.mxu0 %v4214_v11  ;;  %2933 = vmatpush1.bf16.msra.mxu1 %v4213_v12  ;;  %v4247_v33 = vld [vmem:[%s4883_s25 + $0x1f4] ss:$8 sps:$4 sm:$0xff]   ;;  %v4246_v34 = vld [vmem:[%s4883_s25 + $0xf0] ss:$8 sps:$4 sm:$0xff]   ;;  %v4250_v38 = vld [vmem:[%s4883_s25 + $0xe4] ss:$8 sps:$4 sm:$0xff]  }
  0x1c   : > { %2934 = vmatprep.subr.bf16.mxu1 %v4217_v13  ;;  %v4249_v39 = vld [vmem:[%s4883_s25 + $0x1f0] ss:$8 sps:$4 sm:$0xff]   ;;  %v4253_v40 = vld [vmem:[%s4883_s25 + $0x1e4] ss:$8 sps:$4 sm:$0xff]   ;;  %v4252_v41 = vld [vmem:[%s4883_s25 + $0xe0] ss:$8 sps:$4 sm:$0xff]  }
  0x1d   : > { %v4256_v44 = vld [vmem:[%s4883_s25 + $0xd4] ss:$8 sps:$4 sm:$0xff]   ;;  %v4255_v45 = vld [vmem:[%s4883_s25 + $0x1e0] ss:$8 sps:$4 sm:$0xff]   ;;  %v4258_v47 = vld [vmem:[%s4883_s25 + $0xd0] ss:$8 sps:$4 sm:$0xff]  }
  0x1e   : > { %2894 = vmatpush1.bf16.msra.mxu0 %v4216_v14  ;;  %v4259_v46 = vld [vmem:[%s4883_s25 + $0x1d4] ss:$8 sps:$4 sm:$0xff]   ;;  %v4262_v49 = vld [vmem:[%s4883_s25 + $0xc4] ss:$8 sps:$4 sm:$0xff]   ;;  %v4261_v50 = vld [vmem:[%s4883_s25 + $0x1d0] ss:$8 sps:$4 sm:$0xff]  }
  0x1f   : > { %2895 = vmatprep.subr.bf16.mxu0 %v4220_v15  ;;  %2935 = vmatpush1.bf16.msra.mxu1 %v4219_v16  ;;  %v4265_v51 = vld [vmem:[%s4883_s25 + $0x1c4] ss:$8 sps:$4 sm:$0xff]   ;;  %v4264_v53 = vld [vmem:[%s4883_s25 + $0xc0] ss:$8 sps:$4 sm:$0xff]   ;;  %v4268_v55 = vld [vmem:[%s4883_s25 + $0xb4] ss:$8 sps:$4 sm:$0xff]  }
  0x20   : > { %2936 = vmatprep.subr.bf16.mxu1 %v4223_v17  ;;  %v326_v52 = vld [vmem:[%s4934_s29] sm:$0xff]  ;;  %v4271_v58 = vld [vmem:[%s4883_s25 + $0x1b4] ss:$8 sps:$4 sm:$0xff]   ;;  %v4270_v59 = vld [vmem:[%s4883_s25 + $0xb0] ss:$8 sps:$4 sm:$0xff]  }
  0x21   : > { %v745_v54 = vrot.slane %v326_v52, %v4937_v48  ;;  %v4267_v56 = vld [vmem:[%s4883_s25 + $0x1c0] ss:$8 sps:$4 sm:$0xff]   ;;  %v4274_v61 = vld [vmem:[%s4883_s25 + $0xa4] ss:$8 sps:$4 sm:$0xff]   ;;  %v4273_v62 = vld [vmem:[%s4883_s25 + $0x1b0] ss:$8 sps:$4 sm:$0xff]   ;;  %v738_v63 = vcombine.high %v326_v52, %v326_v52 }
  0x22   : > { %2896 = vmatpush1.bf16.msra.mxu0 %v4222_v18  ;;  %v4277_v1 = vld [vmem:[%s4883_s25 + $0x1a4] ss:$8 sps:$4 sm:$0xff]   ;;  %v4276_v2 = vld [vmem:[%s4883_s25 + $0xa0] ss:$8 sps:$4 sm:$0xff]   ;;  %v4280_v3 = vld [vmem:[%s4883_s25 + $0x94] ss:$8 sps:$4 sm:$0xff]  }
  0x23   : > { %2897 = vmatprep.subr.bf16.mxu0 %v4226_v19  ;;  %2937 = vmatpush1.bf16.msra.mxu1 %v4225_v20  ;;  %v753_v57 = vcombine.high %v745_v54, %v745_v54  ;;  %v4279_v4 = vld [vmem:[%s4883_s25 + $0x1a0] ss:$8 sps:$4 sm:$0xff]   ;;  %v4957_v5 = vrot.slane %v738_v63, %v4937_v48  ;;  %v4283_v6 = vld [vmem:[%s4883_s25 + $0x194] ss:$8 sps:$4 sm:$0xff]   ;;  %v4282_v7 = vld [vmem:[%s4883_s25 + $0x90] ss:$8 sps:$4 sm:$0xff]   ;;  %v761_v13 = vrot.slane %v745_v54, %v4937_v48 }
  0x24   : > { %2938 = vmatprep.subr.bf16.mxu1 %v4229_v21  ;;  %v4286_v8 = vld [vmem:[%s4883_s25 + $0x84] ss:$8 sps:$4 sm:$0xff]   ;;  %v4285_v9 = vld [vmem:[%s4883_s25 + $0x190] ss:$8 sps:$4 sm:$0xff]   ;;  %v4288_v12 = vld [vmem:[%s4883_s25 + $0x80] ss:$8 sps:$4 sm:$0xff]  }
  0x25   : > { %v775_v60 = vrot.slane %v753_v57, %v4937_v48  ;;  %v754_v10 = vcombine.high %v4957_v5, %v4957_v5  ;;  %v4289_v11 = vld [vmem:[%s4883_s25 + $0x184] ss:$8 sps:$4 sm:$0xff]   ;;  %v4295_v14 = vld [vmem:[%s4883_s25 + $0x274] ss:$8 sps:$4 sm:$0xff]   ;;  %v4292_v15 = vld [vmem:[%s4883_s25 + $0x180] ss:$8 sps:$4 sm:$0xff]   ;;  %v783_v19 = vcombine.high %v761_v13, %v761_v13 }
  0x26   : > { %2898 = vmatpush1.bf16.msra.mxu0 %v4228_v22  ;;  %v4298_v17 = vld [vmem:[%s4883_s25 + $0x374] ss:$8 sps:$4 sm:$0xff]   ;;  %v4293_v18 = vld [vmem:[%s4883_s25 + $0x270] ss:$8 sps:$4 sm:$0xff]   ;;  %v4301_v20 = vld [vmem:[%s4883_s25 + $0x264] ss:$8 sps:$4 sm:$0xff]  }
  0x27   : > { %2899 = vmatprep.subr.bf16.mxu0 %v4232_v23  ;;  %2939 = vmatpush1.bf16.msra.mxu1 %v4231_v24  ;;  %v785_v0 = vcombine.high %v775_v60, %v775_v60  ;;  %v782_v16 = vrot.slane %v754_v10, %v4937_v48  ;;  %v4296_v21 = vld [vmem:[%s4883_s25 + $0x370] ss:$8 sps:$4 sm:$0xff]   ;;  %v4304_v23 = vld [vmem:[%s4883_s25 + $0x364] ss:$8 sps:$4 sm:$0xff]   ;;  %v4299_v24 = vld [vmem:[%s4883_s25 + $0x260] ss:$8 sps:$4 sm:$0xff]  }
  0x28   : > { %2940 = vmatprep.subr.bf16.mxu1 %v4235_v25  ;;  %2919 = vmatprep.mubr.bf16.mxu0 %v775_v60  ;;  %v4307_v25 = vld [vmem:[%s4883_s25 + $0x254] ss:$8 sps:$4 sm:$0xff]   ;;  %v4317_v36 = vld [vmem:[%s4883_s25 + $0x230] ss:$8 sps:$4 sm:$0xff]   ;;  %v4325_v37 = vld [vmem:[%s4883_s25 + $0x224] ss:$8 sps:$4 sm:$0xff]  }
  0x29   : > { %2960 = vmatprep.mubr.bf16.mxu1 %v785_v0  ;;  %v786_v22 = vcombine.high %v782_v16, %v782_v16  ;;  %v4322_v35 = vld [vmem:[%s4883_s25 + $0x334] ss:$8 sps:$4 sm:$0xff]   ;;  %v4326_v43 = vld [vmem:[%s4883_s25 + $0x320] ss:$8 sps:$4 sm:$0xff]   ;;  %v4341_v54 = vld [vmem:[%s4883_s25 + $0x2f0] ss:$8 sps:$4 sm:$0xff]  }
  0x2a   : > { %2900 = vmatpush1.bf16.msra.mxu0 %v4234_v26  ;;  %v4302_v26 = vld [vmem:[%s4883_s25 + $0x360] ss:$8 sps:$4 sm:$0xff]   ;;  %v4352_v57 = vld [vmem:[%s4883_s25 + $0x3e4] ss:$8 sps:$4 sm:$0xff]   ;;  %v4356_v0 = vld [vmem:[%s4883_s25 + $0x3d0] ss:$8 sps:$4 sm:$0xff]  }
  0x2b   : > { %2901 = vmatprep.subr.bf16.mxu0 %v4238_v27  ;;  %2941 = vmatpush1.bf16.msra.mxu1 %v4237_v28  ;;  %v4310_v27 = vld [vmem:[%s4883_s25 + $0x354] ss:$8 sps:$4 sm:$0xff]   ;;  %v4305_v28 = vld [vmem:[%s4883_s25 + $0x250] ss:$8 sps:$4 sm:$0xff]   ;;  %v4338_v52 = vld [vmem:[%s4883_s25 + $0x300] ss:$8 sps:$4 sm:$0xff]  }
  0x2c   : > { %2942 = vmatprep.subr.bf16.mxu1 %v4241_v29  ;;  %v4313_v29 = vld [vmem:[%s4883_s25 + $0x244] ss:$8 sps:$4 sm:$0xff]   ;;  %v4350_v60 = vld [vmem:[%s4883_s25 + $0x3e0] ss:$8 sps:$4 sm:$0xff]  }
  0x2d   : > { %v4361_v63 = vld [vmem:[%s4883_s25 + $0x2c4] ss:$8 sps:$4 sm:$0xff]  }
  0x2e   : > { %2902 = vmatpush1.bf16.msra.mxu0 %v4240_v30  ;;  %v4308_v30 = vld [vmem:[%s4883_s25 + $0x350] ss:$8 sps:$4 sm:$0xff]   ;;  %v4376_v10 = vld [vmem:[%s4883_s25 + $0x3a4] ss:$8 sps:$4 sm:$0xff]  }
  0x2f   : > { %2903 = vmatprep.subr.bf16.mxu0 %v4244_v31  ;;  %2943 = vmatpush1.bf16.msra.mxu1 %v4243_v32  ;;  %v4316_v31 = vld [vmem:[%s4883_s25 + $0x344] ss:$8 sps:$4 sm:$0xff]   ;;  %v4311_v32 = vld [vmem:[%s4883_s25 + $0x240] ss:$8 sps:$4 sm:$0xff]  }
  0x30   : > { %2944 = vmatprep.subr.bf16.mxu1 %v4247_v33  ;;  %v4319_v33 = vld [vmem:[%s4883_s25 + $0x234] ss:$8 sps:$4 sm:$0xff]  }
  0x32   : > { %2904 = vmatpush2.bf16.msra.mxu0 %v4246_v34  ;;  %v4314_v34 = vld [vmem:[%s4883_s25 + $0x340] ss:$8 sps:$4 sm:$0xff]  }
  0x33   : > { %2905 = vmatprep.subr.bf16.mxu0 %v4250_v38  ;;  %2945 = vmatpush2.bf16.msra.mxu1 %v4249_v39  ;;  %v4320_v38 = vld [vmem:[%s4883_s25 + $0x330] ss:$8 sps:$4 sm:$0xff]   ;;  %v4328_v39 = vld [vmem:[%s4883_s25 + $0x324] ss:$8 sps:$4 sm:$0xff]  }
  0x34   : > { %2946 = vmatprep.subr.bf16.mxu1 %v4253_v40  ;;  %v4323_v40 = vld [vmem:[%s4883_s25 + $0x220] ss:$8 sps:$4 sm:$0xff]  }
  0x36   : > { %2906 = vmatpush2.bf16.msra.mxu0 %v4252_v41  ;;  %v4331_v41 = vld [vmem:[%s4883_s25 + $0x214] ss:$8 sps:$4 sm:$0xff]  }
  0x37   : > { %2907 = vmatprep.subr.bf16.mxu0 %v4256_v44  ;;  %2947 = vmatpush2.bf16.msra.mxu1 %v4255_v45  ;;  %v4334_v44 = vld [vmem:[%s4883_s25 + $0x314] ss:$8 sps:$4 sm:$0xff]   ;;  %v4329_v45 = vld [vmem:[%s4883_s25 + $0x210] ss:$8 sps:$4 sm:$0xff]  }
  0x38   : > { %2948 = vmatprep.subr.bf16.mxu1 %v4259_v46  ;;  %v4337_v46 = vld [vmem:[%s4883_s25 + $0x204] ss:$8 sps:$4 sm:$0xff]  }
  0x3a   : > { %2908 = vmatpush2.bf16.msra.mxu0 %v4258_v47  ;;  %v4332_v47 = vld [vmem:[%s4883_s25 + $0x310] ss:$8 sps:$4 sm:$0xff]  }
  0x3b   : > { %2909 = vmatprep.subr.bf16.mxu0 %v4262_v49  ;;  %2949 = vmatpush2.bf16.msra.mxu1 %v4261_v50  ;;  %v4340_v49 = vld [vmem:[%s4883_s25 + $0x304] ss:$8 sps:$4 sm:$0xff]   ;;  %v4335_v50 = vld [vmem:[%s4883_s25 + $0x200] ss:$8 sps:$4 sm:$0xff]  }
  0x3c   : > { %2950 = vmatprep.subr.bf16.mxu1 %v4265_v51  ;;  %v4343_v51 = vld [vmem:[%s4883_s25 + $0x2f4] ss:$8 sps:$4 sm:$0xff]  }
  0x3e   : > { %2910 = vmatpush2.bf16.msra.mxu0 %v4264_v53  ;;  %v4346_v53 = vld [vmem:[%s4883_s25 + $0x3f4] ss:$8 sps:$4 sm:$0xff]  }
  0x3f   : > { %2911 = vmatprep.subr.bf16.mxu0 %v4268_v55  ;;  %2951 = vmatpush2.bf16.msra.mxu1 %v4267_v56  ;;  %v4349_v55 = vld [vmem:[%s4883_s25 + $0x2e4] ss:$8 sps:$4 sm:$0xff]   ;;  %v4344_v56 = vld [vmem:[%s4883_s25 + $0x3f0] ss:$8 sps:$4 sm:$0xff]  }
  0x40   : > { %2952 = vmatprep.subr.bf16.mxu1 %v4271_v58  ;;  %v4347_v58 = vld [vmem:[%s4883_s25 + $0x2e0] ss:$8 sps:$4 sm:$0xff]  }
  0x42   : > { %2912 = vmatpush2.bf16.msra.mxu0 %v4270_v59  ;;  %v4355_v59 = vld [vmem:[%s4883_s25 + $0x2d4] ss:$8 sps:$4 sm:$0xff]  }
  0x43   : > { %2913 = vmatprep.subr.bf16.mxu0 %v4274_v61  ;;  %2953 = vmatpush2.bf16.msra.mxu1 %v4273_v62  ;;  %v4358_v61 = vld [vmem:[%s4883_s25 + $0x3d4] ss:$8 sps:$4 sm:$0xff]   ;;  %v4353_v62 = vld [vmem:[%s4883_s25 + $0x2d0] ss:$8 sps:$4 sm:$0xff]  }
  0x44   : > { %2954 = vmatprep.subr.bf16.mxu1 %v4277_v1  ;;  %v4364_v1 = vld [vmem:[%s4883_s25 + $0x3c4] ss:$8 sps:$4 sm:$0xff]  }
  0x46   : > { %2914 = vmatpush2.bf16.msra.mxu0 %v4276_v2  ;;  %v4359_v2 = vld [vmem:[%s4883_s25 + $0x2c0] ss:$8 sps:$4 sm:$0xff]  }
  0x47   : > { %2915 = vmatprep.subr.bf16.mxu0 %v4280_v3  ;;  %2955 = vmatpush2.bf16.msra.mxu1 %v4279_v4  ;;  %v4367_v3 = vld [vmem:[%s4883_s25 + $0x2b4] ss:$8 sps:$4 sm:$0xff]   ;;  %v4362_v4 = vld [vmem:[%s4883_s25 + $0x3c0] ss:$8 sps:$4 sm:$0xff]  }
  0x48   : > { %2956 = vmatprep.subr.bf16.mxu1 %v4283_v6  ;;  %v4370_v6 = vld [vmem:[%s4883_s25 + $0x3b4] ss:$8 sps:$4 sm:$0xff]  }
  0x4a   : > { %2916 = vmatpush2.bf16.msra.mxu0 %v4282_v7  ;;  %v4365_v7 = vld [vmem:[%s4883_s25 + $0x2b0] ss:$8 sps:$4 sm:$0xff]  }
  0x4b   : > { %2917 = vmatprep.subr.bf16.mxu0 %v4286_v8  ;;  %2957 = vmatpush2.bf16.msra.mxu1 %v4285_v9  ;;  %v4373_v8 = vld [vmem:[%s4883_s25 + $0x2a4] ss:$8 sps:$4 sm:$0xff]   ;;  %v4368_v9 = vld [vmem:[%s4883_s25 + $0x3b0] ss:$8 sps:$4 sm:$0xff]  }
  0x4c   : > { %2958 = vmatprep.subr.bf16.mxu1 %v4289_v11  ;;  %v4371_v11 = vld [vmem:[%s4883_s25 + $0x2a0] ss:$8 sps:$4 sm:$0xff]  }
  0x4e   : > { %2918 = vmatpush2.bf16.msra.mxu0 %v4288_v12  ;;  %v4379_v12 = vld [vmem:[%s4883_s25 + $0x294] ss:$8 sps:$4 sm:$0xff]  }
  0x4f   : > { %2969 = vmatprep.subr.bf16.mxu0 %v4295_v14  ;;  %2959 = vmatpush2.bf16.msra.mxu1 %v4292_v15  ;;  %v4382_v14 = vld [vmem:[%s4883_s25 + $0x394] ss:$8 sps:$4 sm:$0xff]   ;;  %v4377_v15 = vld [vmem:[%s4883_s25 + $0x290] ss:$8 sps:$4 sm:$0xff]  }
  0x50   : > { %3010 = vmatprep.subr.bf16.mxu1 %v4298_v17  ;;  %v4380_v17 = vld [vmem:[%s4883_s25 + $0x390] ss:$8 sps:$4 sm:$0xff]  }
  0x51   : > { %2920 = vmatmul.mubr.bf16.vlgmr.msra.gmra.mxu0 %v761_v13  ;;  %v4374_v13 = vld [vmem:[%s4883_s25 + $0x3a0] ss:$8 sps:$4 sm:$0xff]  }
  0x52   : > { %2970 = vmatpush1.bf16.msra.mxu0 %v4293_v18  ;;  %3001 = vmatprep.mubr.bf16.mxu0 %v782_v16  ;;  %v4385_v16 = vld [vmem:[%s4883_s25 + $0x284] ss:$8 sps:$4 sm:$0xff]  }
  0x53   : > { %2961 = vmatmul.mubr.bf16.vlgmr.msra.gmra.mxu1 %v783_v19  ;;  %2971 = vmatprep.subr.bf16.mxu0 %v4301_v20  ;;  %v4388_v18 = vld [vmem:[%s4883_s25 + $0x384] ss:$8 sps:$4 sm:$0xff]   ;;  %v4383_v19 = vld [vmem:[%s4883_s25 + $0x280] ss:$8 sps:$4 sm:$0xff]   ;;  %v768_v20 = vrot.slane %v4957_v5, %v4937_v48 }
  0x54   : > { %3011 = vmatpush1.bf16.msra.mxu1 %v4296_v21  ;;  %3042 = vmatprep.mubr.bf16.mxu1 %v786_v22  ;;  %v4391_v21 = vld [vmem:[%s4883_s25 + $0x474] ss:$8 sps:$4 sm:$0xff]   ;;  %v4386_v22 = vld [vmem:[%s4883_s25 + $0x380] ss:$8 sps:$4 sm:$0xff]  }
  0x55   : > { %3012 = vmatprep.subr.bf16.mxu1 %v4304_v23  ;;  %v4394_v23 = vld [vmem:[%s4883_s25 + $0x574] ss:$8 sps:$4 sm:$0xff]  }
  0x56   : > { %2972 = vmatpush1.bf16.msra.mxu0 %v4299_v24  ;;  %v4389_v24 = vld [vmem:[%s4883_s25 + $0x470] ss:$8 sps:$4 sm:$0xff]  }
  0x57   : > { %2973 = vmatprep.subr.bf16.mxu0 %v4307_v25  ;;  %v784_v25 = vcombine.high %v768_v20, %v768_v20 }
  0x58   : > { %3013 = vmatpush1.bf16.msra.mxu1 %v4302_v26  ;;  %v4397_v26 = vld [vmem:[%s4883_s25 + $0x464] ss:$8 sps:$4 sm:$0xff]  }
  0x59   : > { %3014 = vmatprep.subr.bf16.mxu1 %v4310_v27  ;;  %v5041_v27 = vld [vmem:[%s4934_s29 + $0x8] sm:$0xff] }
  0x5a   : > { %2974 = vmatpush1.bf16.msra.mxu0 %v4305_v28  ;;  %v4392_v28 = vld [vmem:[%s4883_s25 + $0x570] ss:$8 sps:$4 sm:$0xff]   ;;  %v5046_v5 = vrot.slane %v5041_v27, %v4937_v48 }
  0x5b   : > { %2975 = vmatprep.subr.bf16.mxu0 %v4313_v29  ;;  %v4400_v29 = vld [vmem:[%s4883_s25 + $0x564] ss:$8 sps:$4 sm:$0xff]  }
  0x5c   : > { %3015 = vmatpush1.bf16.msra.mxu1 %v4308_v30  ;;  %v4395_v30 = vld [vmem:[%s4883_s25 + $0x460] ss:$8 sps:$4 sm:$0xff]  }
  0x5d   : > { %3016 = vmatprep.subr.bf16.mxu1 %v4316_v31  ;;  %v802_v31 = vcombine.high %v5046_v5, %v5046_v5 }
  0x5e   : > { %2976 = vmatpush1.bf16.msra.mxu0 %v4311_v32  ;;  %v4403_v32 = vld [vmem:[%s4883_s25 + $0x454] ss:$8 sps:$4 sm:$0xff]  }
  0x5f   : > { %2977 = vmatprep.subr.bf16.mxu0 %v4319_v33  ;;  %v4398_v33 = vld [vmem:[%s4883_s25 + $0x560] ss:$8 sps:$4 sm:$0xff]  }
  0x60   : > { %3017 = vmatpush1.bf16.msra.mxu1 %v4314_v34  ;;  %v824_v34 = vrot.slane %v802_v31, %v4937_v48  ;;  %v4479_v31 = vld [vmem:[%s4883_s25 + $0x480] ss:$8 sps:$4 sm:$0xff]  }
  0x61   : > { %3018 = vmatprep.subr.bf16.mxu1 %v4322_v35  ;;  %v4406_v35 = vld [vmem:[%s4883_s25 + $0x554] ss:$8 sps:$4 sm:$0xff]  }
  0x62   : > { %2978 = vmatpush1.bf16.msra.mxu0 %v4317_v36  ;;  %v4401_v36 = vld [vmem:[%s4883_s25 + $0x450] ss:$8 sps:$4 sm:$0xff]  }
  0x63   : > { %2979 = vmatprep.subr.bf16.mxu0 %v4325_v37  ;;  %v834_v37 = vcombine.high %v824_v34, %v824_v34 }
  0x64   : > { %3019 = vmatpush1.bf16.msra.mxu1 %v4320_v38  ;;  %v4409_v38 = vld [vmem:[%s4883_s25 + $0x444] ss:$8 sps:$4 sm:$0xff]  }
  0x65   : > { %3020 = vmatprep.subr.bf16.mxu1 %v4328_v39  ;;  %v4404_v39 = vld [vmem:[%s4883_s25 + $0x550] ss:$8 sps:$4 sm:$0xff]  }
  0x66   : > { %2980 = vmatpush1.bf16.msra.mxu0 %v4323_v40  ;;  %v4412_v40 = vld [vmem:[%s4883_s25 + $0x544] ss:$8 sps:$4 sm:$0xff]  }
  0x67   : > { %2981 = vmatprep.subr.bf16.mxu0 %v4331_v41  ;;  %v4407_v41 = vld [vmem:[%s4883_s25 + $0x440] ss:$8 sps:$4 sm:$0xff]  }
  0x68   : > { %3021 = vmatpush1.bf16.msra.mxu1 %v4326_v43  ;;  %v4415_v43 = vld [vmem:[%s4883_s25 + $0x434] ss:$8 sps:$4 sm:$0xff]  }
  0x69   : > { %3022 = vmatprep.subr.bf16.mxu1 %v4334_v44  ;;  %v4410_v44 = vld [vmem:[%s4883_s25 + $0x540] ss:$8 sps:$4 sm:$0xff]  }
  0x6a   : > { %2982 = vmatpush1.bf16.msra.mxu0 %v4329_v45  ;;  %v4418_v45 = vld [vmem:[%s4883_s25 + $0x534] ss:$8 sps:$4 sm:$0xff]  }
  0x6b   : > { %2983 = vmatprep.subr.bf16.mxu0 %v4337_v46  ;;  %v4413_v46 = vld [vmem:[%s4883_s25 + $0x430] ss:$8 sps:$4 sm:$0xff]  }
  0x6c   : > { %3023 = vmatpush1.bf16.msra.mxu1 %v4332_v47  ;;  %v4421_v47 = vld [vmem:[%s4883_s25 + $0x424] ss:$8 sps:$4 sm:$0xff]  }
  0x6d   : > { %3024 = vmatprep.subr.bf16.mxu1 %v4340_v49  ;;  %v4416_v49 = vld [vmem:[%s4883_s25 + $0x530] ss:$8 sps:$4 sm:$0xff]  }
  0x6e   : > { %2984 = vmatpush1.bf16.msra.mxu0 %v4335_v50  ;;  %v4424_v50 = vld [vmem:[%s4883_s25 + $0x524] ss:$8 sps:$4 sm:$0xff]  }
  0x6f   : > { %2985 = vmatprep.subr.bf16.mxu0 %v4343_v51  ;;  %v4419_v51 = vld [vmem:[%s4883_s25 + $0x420] ss:$8 sps:$4 sm:$0xff]  }
  0x70   : > { %3025 = vmatpush1.bf16.msra.mxu1 %v4338_v52  ;;  %v4427_v52 = vld [vmem:[%s4883_s25 + $0x414] ss:$8 sps:$4 sm:$0xff]  }
  0x71   : > { %3026 = vmatprep.subr.bf16.mxu1 %v4346_v53  ;;  %v4422_v53 = vld [vmem:[%s4883_s25 + $0x520] ss:$8 sps:$4 sm:$0xff]  }
  0x72   : > { %2986 = vmatpush2.bf16.msra.mxu0 %v4341_v54  ;;  %v4430_v54 = vld [vmem:[%s4883_s25 + $0x514] ss:$8 sps:$4 sm:$0xff]  }
  0x73   : > { %2987 = vmatprep.subr.bf16.mxu0 %v4349_v55  ;;  %v4425_v55 = vld [vmem:[%s4883_s25 + $0x410] ss:$8 sps:$4 sm:$0xff]  }
  0x74   : > { %3027 = vmatpush2.bf16.msra.mxu1 %v4344_v56  ;;  %v4433_v56 = vld [vmem:[%s4883_s25 + $0x404] ss:$8 sps:$4 sm:$0xff]  }
  0x75   : > { %3028 = vmatprep.subr.bf16.mxu1 %v4352_v57  ;;  %v4428_v57 = vld [vmem:[%s4883_s25 + $0x510] ss:$8 sps:$4 sm:$0xff]  }
  0x76   : > { %2988 = vmatpush2.bf16.msra.mxu0 %v4347_v58  ;;  %v4436_v58 = vld [vmem:[%s4883_s25 + $0x504] ss:$8 sps:$4 sm:$0xff]  }
  0x77   : > { %2989 = vmatprep.subr.bf16.mxu0 %v4355_v59  ;;  %v4431_v59 = vld [vmem:[%s4883_s25 + $0x400] ss:$8 sps:$4 sm:$0xff]  }
  0x78   : > { %3029 = vmatpush2.bf16.msra.mxu1 %v4350_v60  ;;  %v4439_v60 = vld [vmem:[%s4883_s25 + $0x4f4] ss:$8 sps:$4 sm:$0xff]  }
  0x79   : > { %3030 = vmatprep.subr.bf16.mxu1 %v4358_v61  ;;  %v4434_v61 = vld [vmem:[%s4883_s25 + $0x500] ss:$8 sps:$4 sm:$0xff]  }
  0x7a   : > { %2990 = vmatpush2.bf16.msra.mxu0 %v4353_v62  ;;  %v4442_v62 = vld [vmem:[%s4883_s25 + $0x5f4] ss:$8 sps:$4 sm:$0xff]  }
  0x7b   : > { %2991 = vmatprep.subr.bf16.mxu0 %v4361_v63  ;;  %v4437_v63 = vld [vmem:[%s4883_s25 + $0x4f0] ss:$8 sps:$4 sm:$0xff]  }
  0x7c   : > { %3031 = vmatpush2.bf16.msra.mxu1 %v4356_v0  ;;  %v4445_v0 = vld [vmem:[%s4883_s25 + $0x4e4] ss:$8 sps:$4 sm:$0xff]  }
  0x7d   : > { %3032 = vmatprep.subr.bf16.mxu1 %v4364_v1  ;;  %v4440_v1 = vld [vmem:[%s4883_s25 + $0x5f0] ss:$8 sps:$4 sm:$0xff]  }
  0x7e   : > { %2992 = vmatpush2.bf16.msra.mxu0 %v4359_v2  ;;  %v4448_v2 = vld [vmem:[%s4883_s25 + $0x5e4] ss:$8 sps:$4 sm:$0xff]  }
  0x7f   : > { %2993 = vmatprep.subr.bf16.mxu0 %v4367_v3  ;;  %v4443_v3 = vld [vmem:[%s4883_s25 + $0x4e0] ss:$8 sps:$4 sm:$0xff]  }
  0x80   : > { %3033 = vmatpush2.bf16.msra.mxu1 %v4362_v4  ;;  %v4451_v4 = vld [vmem:[%s4883_s25 + $0x4d4] ss:$8 sps:$4 sm:$0xff]  }
  0x81   : > { %3034 = vmatprep.subr.bf16.mxu1 %v4370_v6  ;;  %v4446_v6 = vld [vmem:[%s4883_s25 + $0x5e0] ss:$8 sps:$4 sm:$0xff]  }
  0x82   : > { %2994 = vmatpush2.bf16.msra.mxu0 %v4365_v7  ;;  %v4454_v7 = vld [vmem:[%s4883_s25 + $0x5d4] ss:$8 sps:$4 sm:$0xff]  }
  0x83   : > { %2995 = vmatprep.subr.bf16.mxu0 %v4373_v8  ;;  %v4449_v8 = vld [vmem:[%s4883_s25 + $0x4d0] ss:$8 sps:$4 sm:$0xff]  }
  0x84   : > { %3035 = vmatpush2.bf16.msra.mxu1 %v4368_v9  ;;  %v4457_v9 = vld [vmem:[%s4883_s25 + $0x4c4] ss:$8 sps:$4 sm:$0xff]  }
  0x85   : > { %3036 = vmatprep.subr.bf16.mxu1 %v4376_v10  ;;  %v4452_v10 = vld [vmem:[%s4883_s25 + $0x5d0] ss:$8 sps:$4 sm:$0xff]  }
  0x86   : > { %2996 = vmatpush2.bf16.msra.mxu0 %v4371_v11  ;;  %v4460_v11 = vld [vmem:[%s4883_s25 + $0x5c4] ss:$8 sps:$4 sm:$0xff]  }
  0x87   : > { %2997 = vmatprep.subr.bf16.mxu0 %v4379_v12  ;;  %v4455_v12 = vld [vmem:[%s4883_s25 + $0x4c0] ss:$8 sps:$4 sm:$0xff]  }
  0x88   : > { %3037 = vmatpush2.bf16.msra.mxu1 %v4374_v13  ;;  %v4463_v13 = vld [vmem:[%s4883_s25 + $0x4b4] ss:$8 sps:$4 sm:$0xff]  }
  0x89   : > { %3038 = vmatprep.subr.bf16.mxu1 %v4382_v14  ;;  %v4458_v14 = vld [vmem:[%s4883_s25 + $0x5c0] ss:$8 sps:$4 sm:$0xff]  }
  0x8a   : > { %2998 = vmatpush2.bf16.msra.mxu0 %v4377_v15  ;;  %v4466_v15 = vld [vmem:[%s4883_s25 + $0x5b4] ss:$8 sps:$4 sm:$0xff]  }
  0x8b   : > { %2999 = vmatprep.subr.bf16.mxu0 %v4385_v16  ;;  %v4461_v16 = vld [vmem:[%s4883_s25 + $0x4b0] ss:$8 sps:$4 sm:$0xff]  }
  0x8c   : > { %3039 = vmatpush2.bf16.msra.mxu1 %v4380_v17  ;;  %v4469_v17 = vld [vmem:[%s4883_s25 + $0x4a4] ss:$8 sps:$4 sm:$0xff]  }
  0x8d   : > { %3040 = vmatprep.subr.bf16.mxu1 %v4388_v18  ;;  %v4464_v18 = vld [vmem:[%s4883_s25 + $0x5b0] ss:$8 sps:$4 sm:$0xff]  }
  0x8e   : > { %3000 = vmatpush2.bf16.msra.mxu0 %v4383_v19  ;;  %v787_v19 = vcombine.high %v5041_v27, %v5041_v27  ;;  %v4481_v27 = vld [vmem:[%s4883_s25 + $0x484] ss:$8 sps:$4 sm:$0xff]  }
  0x8f   : > { %3051 = vmatprep.subr.bf16.mxu0 %v4391_v21  ;;  %v4467_v21 = vld [vmem:[%s4883_s25 + $0x4a0] ss:$8 sps:$4 sm:$0xff]  }
  0x90   : > { %3041 = vmatpush2.bf16.msra.mxu1 %v4386_v22  ;;  %v4475_v22 = vld [vmem:[%s4883_s25 + $0x494] ss:$8 sps:$4 sm:$0xff]  }
  0x91   : > { %3002 = vmatmul.mubr.bf16.vlgmr.msra.gmra.mxu0 %v768_v20  ;;  %3092 = vmatprep.subr.bf16.mxu1 %v4394_v23  ;;  %v4472_v20 = vld [vmem:[%s4883_s25 + $0x5a4] ss:$8 sps:$4 sm:$0xff]   ;;  %v4470_v23 = vld [vmem:[%s4883_s25 + $0x5a0] ss:$8 sps:$4 sm:$0xff]  }
  0x92   : > { %3052 = vmatpush1.bf16.msra.mxu0 %v4389_v24  ;;  %3083 = vmatprep.mubr.bf16.mxu0 %v824_v34  ;;  %v5106_v24 = vrot.slane %v787_v19, %v4937_v48  ;;  %v4482_v34 = vld [vmem:[%s4883_s25 + $0x580] ss:$8 sps:$4 sm:$0xff]   ;;  %v4548_v19 = vld [vmem:[%s4883_s25 + $0x7d0] ss:$8 sps:$4 sm:$0xff]  }
  0x93   : > { %3043 = vmatmul.mubr.bf16.vlgmr.msra.gmra.mxu1 %v784_v25  ;;  %3053 = vmatprep.subr.bf16.mxu0 %v4397_v26  ;;  %v4478_v25 = vld [vmem:[%s4883_s25 + $0x594] ss:$8 sps:$4 sm:$0xff]   ;;  %v4473_v26 = vld [vmem:[%s4883_s25 + $0x490] ss:$8 sps:$4 sm:$0xff]  }
  0x94   : > { %3093 = vmatpush1.bf16.msra.mxu1 %v4392_v28  ;;  %3124 = vmatprep.mubr.bf16.mxu1 %v834_v37  ;;  %v4476_v28 = vld [vmem:[%s4883_s25 + $0x590] ss:$8 sps:$4 sm:$0xff]  }
  0x95   : > { %3094 = vmatprep.subr.bf16.mxu1 %v4400_v29  ;;  %v803_v29 = vcombine.high %v5106_v24, %v5106_v24  ;;  %v4485_v37 = vld [vmem:[%s4883_s25 + $0x670] ss:$8 sps:$4 sm:$0xff]  }
  0x96   : > { %3054 = vmatpush1.bf16.msra.mxu0 %v4395_v30  ;;  %v4484_v30 = vld [vmem:[%s4883_s25 + $0x584] ss:$8 sps:$4 sm:$0xff]  }
  0x97   : > { %3055 = vmatprep.subr.bf16.mxu0 %v4403_v32  ;;  %v810_v32 = vrot.slane %v5046_v5, %v4937_v48 }
  0x98   : > { %3095 = vmatpush1.bf16.msra.mxu1 %v4398_v33  ;;  %v4487_v33 = vld [vmem:[%s4883_s25 + $0x674] ss:$8 sps:$4 sm:$0xff]  }
  0x99   : > { %3096 = vmatprep.subr.bf16.mxu1 %v4406_v35  ;;  %v831_v35 = vrot.slane %v803_v29, %v4937_v48  ;;  %v4568_v29 = vld [vmem:[%s4883_s25 + $0x7a4] ss:$8 sps:$4 sm:$0xff]  }
  0x9a   : > { %3056 = vmatpush1.bf16.msra.mxu0 %v4401_v36  ;;  %v4490_v36 = vld [vmem:[%s4883_s25 + $0x774] ss:$8 sps:$4 sm:$0xff]  }
  0x9b   : > { %3057 = vmatprep.subr.bf16.mxu0 %v4409_v38  ;;  %v832_v38 = vcombine.high %v810_v32, %v810_v32  ;;  %v835_v5 = vcombine.high %v831_v35, %v831_v35 }
  0x9c   : > { %3097 = vmatpush1.bf16.msra.mxu1 %v4404_v39  ;;  %v4493_v39 = vld [vmem:[%s4883_s25 + $0x664] ss:$8 sps:$4 sm:$0xff]  }
  0x9d   : > { %3098 = vmatprep.subr.bf16.mxu1 %v4412_v40  ;;  %v4488_v40 = vld [vmem:[%s4883_s25 + $0x770] ss:$8 sps:$4 sm:$0xff]  }
  0x9e   : > { %3058 = vmatpush1.bf16.msra.mxu0 %v4407_v41  ;;  %v4496_v41 = vld [vmem:[%s4883_s25 + $0x764] ss:$8 sps:$4 sm:$0xff]  }
  0x9f   : > { %3059 = vmatprep.subr.bf16.mxu0 %v4415_v43  ;;  %v4491_v43 = vld [vmem:[%s4883_s25 + $0x660] ss:$8 sps:$4 sm:$0xff]  }
  0xa0   : > { %3099 = vmatpush1.bf16.msra.mxu1 %v4410_v44  ;;  %v4499_v44 = vld [vmem:[%s4883_s25 + $0x654] ss:$8 sps:$4 sm:$0xff]  }
  0xa1   : > { %3100 = vmatprep.subr.bf16.mxu1 %v4418_v45  ;;  %v4494_v45 = vld [vmem:[%s4883_s25 + $0x760] ss:$8 sps:$4 sm:$0xff]  }
  0xa2   : > { %3060 = vmatpush1.bf16.msra.mxu0 %v4413_v46  ;;  %v4502_v46 = vld [vmem:[%s4883_s25 + $0x754] ss:$8 sps:$4 sm:$0xff]  }
  0xa3   : > { %3061 = vmatprep.subr.bf16.mxu0 %v4421_v47  ;;  %v4497_v47 = vld [vmem:[%s4883_s25 + $0x650] ss:$8 sps:$4 sm:$0xff]  }
  0xa4   : > { %3101 = vmatpush1.bf16.msra.mxu1 %v4416_v49  ;;  %v4505_v49 = vld [vmem:[%s4883_s25 + $0x644] ss:$8 sps:$4 sm:$0xff]  }
  0xa5   : > { %3102 = vmatprep.subr.bf16.mxu1 %v4424_v50  ;;  %v4500_v50 = vld [vmem:[%s4883_s25 + $0x750] ss:$8 sps:$4 sm:$0xff]  }
  0xa6   : > { %3062 = vmatpush1.bf16.msra.mxu0 %v4419_v51  ;;  %v4508_v51 = vld [vmem:[%s4883_s25 + $0x744] ss:$8 sps:$4 sm:$0xff]  }
  0xa7   : > { %3063 = vmatprep.subr.bf16.mxu0 %v4427_v52  ;;  %v4503_v52 = vld [vmem:[%s4883_s25 + $0x640] ss:$8 sps:$4 sm:$0xff]  }
  0xa8   : > { %3103 = vmatpush1.bf16.msra.mxu1 %v4422_v53  ;;  %v4511_v53 = vld [vmem:[%s4883_s25 + $0x634] ss:$8 sps:$4 sm:$0xff]  }
  0xa9   : > { %3104 = vmatprep.subr.bf16.mxu1 %v4430_v54  ;;  %v4506_v54 = vld [vmem:[%s4883_s25 + $0x740] ss:$8 sps:$4 sm:$0xff]  }
  0xaa   : > { %3064 = vmatpush1.bf16.msra.mxu0 %v4425_v55  ;;  %v4514_v55 = vld [vmem:[%s4883_s25 + $0x734] ss:$8 sps:$4 sm:$0xff]  }
  0xab   : > { %3065 = vmatprep.subr.bf16.mxu0 %v4433_v56  ;;  %v4509_v56 = vld [vmem:[%s4883_s25 + $0x630] ss:$8 sps:$4 sm:$0xff]  }
  0xac   : > { %3105 = vmatpush1.bf16.msra.mxu1 %v4428_v57  ;;  %v4517_v57 = vld [vmem:[%s4883_s25 + $0x624] ss:$8 sps:$4 sm:$0xff]  }
  0xad   : > { %3106 = vmatprep.subr.bf16.mxu1 %v4436_v58  ;;  %v4512_v58 = vld [vmem:[%s4883_s25 + $0x730] ss:$8 sps:$4 sm:$0xff]  }
  0xae   : > { %3066 = vmatpush1.bf16.msra.mxu0 %v4431_v59  ;;  %v4520_v59 = vld [vmem:[%s4883_s25 + $0x724] ss:$8 sps:$4 sm:$0xff]  }
  0xaf   : > { %3067 = vmatprep.subr.bf16.mxu0 %v4439_v60  ;;  %v4515_v60 = vld [vmem:[%s4883_s25 + $0x620] ss:$8 sps:$4 sm:$0xff]  }
  0xb0   : > { %3107 = vmatpush1.bf16.msra.mxu1 %v4434_v61  ;;  %v4523_v61 = vld [vmem:[%s4883_s25 + $0x614] ss:$8 sps:$4 sm:$0xff]  }
  0xb1   : > { %3108 = vmatprep.subr.bf16.mxu1 %v4442_v62  ;;  %v4518_v62 = vld [vmem:[%s4883_s25 + $0x720] ss:$8 sps:$4 sm:$0xff]  }
  0xb2   : > { %3068 = vmatpush2.bf16.msra.mxu0 %v4437_v63  ;;  %v4526_v63 = vld [vmem:[%s4883_s25 + $0x714] ss:$8 sps:$4 sm:$0xff]  }
  0xb3   : > { %3069 = vmatprep.subr.bf16.mxu0 %v4445_v0  ;;  %v4521_v0 = vld [vmem:[%s4883_s25 + $0x610] ss:$8 sps:$4 sm:$0xff]  }
  0xb4   : > { %3109 = vmatpush2.bf16.msra.mxu1 %v4440_v1  ;;  %v4529_v1 = vld [vmem:[%s4883_s25 + $0x604] ss:$8 sps:$4 sm:$0xff]  }
  0xb5   : > { %3110 = vmatprep.subr.bf16.mxu1 %v4448_v2  ;;  %v4524_v2 = vld [vmem:[%s4883_s25 + $0x710] ss:$8 sps:$4 sm:$0xff]  }
  0xb6   : > { %3070 = vmatpush2.bf16.msra.mxu0 %v4443_v3  ;;  %v4532_v3 = vld [vmem:[%s4883_s25 + $0x704] ss:$8 sps:$4 sm:$0xff]  }
  0xb7   : > { %3071 = vmatprep.subr.bf16.mxu0 %v4451_v4  ;;  %v4527_v4 = vld [vmem:[%s4883_s25 + $0x600] ss:$8 sps:$4 sm:$0xff]  }
  0xb8   : > { %3111 = vmatpush2.bf16.msra.mxu1 %v4446_v6  ;;  %v4535_v6 = vld [vmem:[%s4883_s25 + $0x6f4] ss:$8 sps:$4 sm:$0xff]  }
  0xb9   : > { %3112 = vmatprep.subr.bf16.mxu1 %v4454_v7  ;;  %v4530_v7 = vld [vmem:[%s4883_s25 + $0x700] ss:$8 sps:$4 sm:$0xff]  }
  0xba   : > { %3072 = vmatpush2.bf16.msra.mxu0 %v4449_v8  ;;  %v4538_v8 = vld [vmem:[%s4883_s25 + $0x7f4] ss:$8 sps:$4 sm:$0xff]  }
  0xbb   : > { %3073 = vmatprep.subr.bf16.mxu0 %v4457_v9  ;;  %v4533_v9 = vld [vmem:[%s4883_s25 + $0x6f0] ss:$8 sps:$4 sm:$0xff]  }
  0xbc   : > { %3113 = vmatpush2.bf16.msra.mxu1 %v4452_v10  ;;  %v4541_v10 = vld [vmem:[%s4883_s25 + $0x6e4] ss:$8 sps:$4 sm:$0xff]  }
  0xbd   : > { %3114 = vmatprep.subr.bf16.mxu1 %v4460_v11  ;;  %v4536_v11 = vld [vmem:[%s4883_s25 + $0x7f0] ss:$8 sps:$4 sm:$0xff]  }
  0xbe   : > { %3074 = vmatpush2.bf16.msra.mxu0 %v4455_v12  ;;  %v4544_v12 = vld [vmem:[%s4883_s25 + $0x7e4] ss:$8 sps:$4 sm:$0xff]  }
  0xbf   : > { %3075 = vmatprep.subr.bf16.mxu0 %v4463_v13  ;;  %v4539_v13 = vld [vmem:[%s4883_s25 + $0x6e0] ss:$8 sps:$4 sm:$0xff]  }
  0xc0   : > { %3115 = vmatpush2.bf16.msra.mxu1 %v4458_v14  ;;  %v4547_v14 = vld [vmem:[%s4883_s25 + $0x6d4] ss:$8 sps:$4 sm:$0xff]  }
  0xc1   : > { %3116 = vmatprep.subr.bf16.mxu1 %v4466_v15  ;;  %v4542_v15 = vld [vmem:[%s4883_s25 + $0x7e0] ss:$8 sps:$4 sm:$0xff]  }
  0xc2   : > { %3076 = vmatpush2.bf16.msra.mxu0 %v4461_v16  ;;  %v4550_v16 = vld [vmem:[%s4883_s25 + $0x7d4] ss:$8 sps:$4 sm:$0xff]  }
  0xc3   : > { %3077 = vmatprep.subr.bf16.mxu0 %v4469_v17  ;;  %v4545_v17 = vld [vmem:[%s4883_s25 + $0x6d0] ss:$8 sps:$4 sm:$0xff]  }
  0xc4   : > { %3117 = vmatpush2.bf16.msra.mxu1 %v4464_v18  ;;  %v4553_v18 = vld [vmem:[%s4883_s25 + $0x6c4] ss:$8 sps:$4 sm:$0xff]  }
  0xc5   : > { %3118 = vmatprep.subr.bf16.mxu1 %v4472_v20  ;;  %v4556_v20 = vld [vmem:[%s4883_s25 + $0x7c4] ss:$8 sps:$4 sm:$0xff]  }
  0xc6   : > { %3078 = vmatpush2.bf16.msra.mxu0 %v4467_v21  ;;  %v4551_v21 = vld [vmem:[%s4883_s25 + $0x6c0] ss:$8 sps:$4 sm:$0xff]  }
  0xc7   : > { %3079 = vmatprep.subr.bf16.mxu0 %v4475_v22  ;;  %v4559_v22 = vld [vmem:[%s4883_s25 + $0x6b4] ss:$8 sps:$4 sm:$0xff]  }
  0xc8   : > { %3119 = vmatpush2.bf16.msra.mxu1 %v4470_v23  ;;  %v4554_v23 = vld [vmem:[%s4883_s25 + $0x7c0] ss:$8 sps:$4 sm:$0xff]  }
  0xc9   : > { %3120 = vmatprep.subr.bf16.mxu1 %v4478_v25  ;;  %v4562_v25 = vld [vmem:[%s4883_s25 + $0x7b4] ss:$8 sps:$4 sm:$0xff]  }
  0xca   : > { %3080 = vmatpush2.bf16.msra.mxu0 %v4473_v26  ;;  %v4557_v26 = vld [vmem:[%s4883_s25 + $0x6b0] ss:$8 sps:$4 sm:$0xff]  }
  0xcb   : > { %3081 = vmatprep.subr.bf16.mxu0 %v4481_v27  ;;  %v4565_v27 = vld [vmem:[%s4883_s25 + $0x6a4] ss:$8 sps:$4 sm:$0xff]  }
  0xcc   : > { %3121 = vmatpush2.bf16.msra.mxu1 %v4476_v28  ;;  %v4560_v28 = vld [vmem:[%s4883_s25 + $0x7b0] ss:$8 sps:$4 sm:$0xff]  }
  0xcd   : > { %3122 = vmatprep.subr.bf16.mxu1 %v4484_v30  ;;  %v5175_v30 = vld [vmem:[%s4934_s29 + $0x10] sm:$0xff] }
  0xce   : > { %3082 = vmatpush2.bf16.msra.mxu0 %v4479_v31  ;;  %v4563_v31 = vld [vmem:[%s4883_s25 + $0x6a0] ss:$8 sps:$4 sm:$0xff]  }
  0xcf   : > { %3133 = vmatprep.subr.bf16.mxu0 %v4487_v33  ;;  %v4566_v33 = vld [vmem:[%s4883_s25 + $0x7a0] ss:$8 sps:$4 sm:$0xff]  }
  0xd0   : > { %3123 = vmatpush2.bf16.msra.mxu1 %v4482_v34  ;;  %v5183_v34 = vrot.slane %v5175_v30, %v4937_v48 }
  0xd1   : > { %3084 = vmatmul.mubr.bf16.vlgmr.msra.gmra.mxu0 %v810_v32  ;;  %3174 = vmatprep.subr.bf16.mxu1 %v4490_v36  ;;  %v4571_v32 = vld [vmem:[%s4883_s25 + $0x694] ss:$8 sps:$4 sm:$0xff]   ;;  %v4569_v36 = vld [vmem:[%s4883_s25 + $0x690] ss:$8 sps:$4 sm:$0xff]  }
  0xd2   : > { %3134 = vmatpush1.bf16.msra.mxu0 %v4485_v37  ;;  %3165 = vmatprep.mubr.bf16.mxu0 %v831_v35  ;;  %v4574_v35 = vld [vmem:[%s4883_s25 + $0x794] ss:$8 sps:$4 sm:$0xff]   ;;  %v4577_v37 = vld [vmem:[%s4883_s25 + $0x684] ss:$8 sps:$4 sm:$0xff]  }
  0xd3   : > { %3125 = vmatmul.mubr.bf16.vlgmr.msra.gmra.mxu1 %v832_v38  ;;  %3135 = vmatprep.subr.bf16.mxu0 %v4493_v39  ;;  %v4572_v38 = vld [vmem:[%s4883_s25 + $0x790] ss:$8 sps:$4 sm:$0xff]   ;;  %v851_v39 = vcombine.high %v5183_v34, %v5183_v34 }
  0xd4   : > { %3175 = vmatpush1.bf16.msra.mxu1 %v4488_v40  ;;  %3206 = vmatprep.mubr.bf16.mxu1 %v835_v5  ;;  %v4580_v40 = vld [vmem:[%s4883_s25 + $0x784] ss:$8 sps:$4 sm:$0xff]   ;;  %v4575_v5 = vld [vmem:[%s4883_s25 + $0x680] ss:$8 sps:$4 sm:$0xff]  }
  0xd5   : > { %3176 = vmatprep.subr.bf16.mxu1 %v4496_v41  ;;  %v722_v41 = vld [vmem:[%s309_s8] sm:$0x3] }
  0xd6   : > { %3136 = vmatpush1.bf16.msra.mxu0 %v4491_v43  ;;  %v726_v43 = vsub.s32 0, %v4925_v42 }
  0xd7   : > { %3137 = vmatprep.subr.bf16.mxu0 %v4499_v44  ;;  %v817_v44 = vrot.slane %v5106_v24, %v4937_v48 }
  0xd8   : > { %3177 = vmatpush1.bf16.msra.mxu1 %v4494_v45  ;;  %v4584_v45 = vld [vmem:[%s4883_s25 + $0x874] ss:$8 sps:$4 sm:$0xff]  }
  0xd9   : > { %3178 = vmatprep.subr.bf16.mxu1 %v4502_v46  ;;  %v4578_v46 = vld [vmem:[%s4883_s25 + $0x780] ss:$8 sps:$4 sm:$0xff]  }
  0xda   : > { %3138 = vmatpush1.bf16.msra.mxu0 %v4497_v47  ;;  %v730_v47 = vsub.s32 1, %v4925_v42  ;;  %v4588_v42 = vld [vmem:[%s4883_s25 + $0x860] ss:$8 sps:$4 sm:$0xff]  }
  0xdb   : > { %3139 = vmatprep.subr.bf16.mxu0 %v4505_v49  ;;  %v873_v49 = vrot.slane %v851_v39, %v4937_v48  ;;  %v4633_v39 = vld [vmem:[%s4883_s25 + $0x9f0] ss:$8 sps:$4 sm:$0xff]  }
  0xdc   : > { %3179 = vmatpush1.bf16.msra.mxu1 %v4500_v50  ;;  %v4587_v50 = vld [vmem:[%s4883_s25 + $0x974] ss:$8 sps:$4 sm:$0xff]   ;;  %v731_v24 = vrot.slane %v722_v41, %v730_v47  ;;  %v4645_v47 = vld [vmem:[%s4883_s25 + $0x9d0] ss:$8 sps:$4 sm:$0xff]  }
  0xdd   : > { %3180 = vmatprep.subr.bf16.mxu1 %v4508_v51  ;;  %v727_v51 = vrot.slane %v722_v41, %v726_v43  ;;  %v4644_v41 = vld [vmem:[%s4883_s25 + $0x8d4] ss:$8 sps:$4 sm:$0xff]   ;;  %v4639_v43 = vld [vmem:[%s4883_s25 + $0x9e0] ss:$8 sps:$4 sm:$0xff]  }
  0xde   : > { %3140 = vmatpush1.bf16.msra.mxu0 %v4503_v52  ;;  %v4582_v52 = vld [vmem:[%s4883_s25 + $0x870] ss:$8 sps:$4 sm:$0xff]  }
  0xdf   : > { %3141 = vmatprep.subr.bf16.mxu0 %v4511_v53  ;;  %v833_v53 = vcombine.high %v817_v44, %v817_v44 }
  0xe0   : > { %3181 = vmatpush1.bf16.msra.mxu1 %v4506_v54  ;;  %v4590_v54 = vld [vmem:[%s4883_s25 + $0x864] ss:$8 sps:$4 sm:$0xff]  }
  0xe1   : > { %3182 = vmatprep.subr.bf16.mxu1 %v4514_v55  ;;  %v4585_v55 = vld [vmem:[%s4883_s25 + $0x970] ss:$8 sps:$4 sm:$0xff]  }
  0xe2   : > { %3142 = vmatpush1.bf16.msra.mxu0 %v4509_v56  ;;  %v883_v56 = vcombine.high %v873_v49, %v873_v49 }
  0xe3   : > { %3143 = vmatprep.subr.bf16.mxu0 %v4517_v57 }
  0xe4   : > { %3183 = vmatpush1.bf16.msra.mxu1 %v4512_v58  ;;  %v4593_v58 = vld [vmem:[%s4883_s25 + $0x964] ss:$8 sps:$4 sm:$0xff]  }
  0xe5   : > { %3184 = vmatprep.subr.bf16.mxu1 %v4520_v59 }
  0xe6   : > { %3144 = vmatpush1.bf16.msra.mxu0 %v4515_v60 }
  0xe7   : > { %3145 = vmatprep.subr.bf16.mxu0 %v4523_v61 }
  0xe8   : > { %3185 = vmatpush1.bf16.msra.mxu1 %v4518_v62  ;;  %v4596_v62 = vld [vmem:[%s4883_s25 + $0x854] ss:$8 sps:$4 sm:$0xff]  }
  0xe9   : > { %3186 = vmatprep.subr.bf16.mxu1 %v4526_v63 }
  0xea   : > { %3146 = vmatpush1.bf16.msra.mxu0 %v4521_v0 }
  0xeb   : > { %3147 = vmatprep.subr.bf16.mxu0 %v4529_v1  ;;  %v4591_v1 = vld [vmem:[%s4883_s25 + $0x960] ss:$8 sps:$4 sm:$0xff]  }
  0xec   : > { %3187 = vmatpush1.bf16.msra.mxu1 %v4524_v2 }
  0xed   : > { %3188 = vmatprep.subr.bf16.mxu1 %v4532_v3 }
  0xee   : > { %3148 = vmatpush1.bf16.msra.mxu0 %v4527_v4  ;;  %v4599_v4 = vld [vmem:[%s4883_s25 + $0x954] ss:$8 sps:$4 sm:$0xff]  }
  0xef   : > { %3149 = vmatprep.subr.bf16.mxu0 %v4535_v6 }
  0xf0   : > { %3189 = vmatpush1.bf16.msra.mxu1 %v4530_v7  ;;  %v4594_v7 = vld [vmem:[%s4883_s25 + $0x850] ss:$8 sps:$4 sm:$0xff]  }
  0xf1   : > { %3190 = vmatprep.subr.bf16.mxu1 %v4538_v8 }
  0xf2   : > { %3150 = vmatpush2.bf16.msra.mxu0 %v4533_v9  ;;  %v4602_v9 = vld [vmem:[%s4883_s25 + $0x844] ss:$8 sps:$4 sm:$0xff]  }
  0xf3   : > { %3151 = vmatprep.subr.bf16.mxu0 %v4541_v10 }
  0xf4   : > { %3191 = vmatpush2.bf16.msra.mxu1 %v4536_v11  ;;  %v4597_v11 = vld [vmem:[%s4883_s25 + $0x950] ss:$8 sps:$4 sm:$0xff]  }
  0xf5   : > { %3192 = vmatprep.subr.bf16.mxu1 %v4544_v12  ;;  %v4605_v12 = vld [vmem:[%s4883_s25 + $0x944] ss:$8 sps:$4 sm:$0xff]  }
  0xf6   : > { %3152 = vmatpush2.bf16.msra.mxu0 %v4539_v13 }
  0xf7   : > { %3153 = vmatprep.subr.bf16.mxu0 %v4547_v14  ;;  %v4600_v14 = vld [vmem:[%s4883_s25 + $0x840] ss:$8 sps:$4 sm:$0xff]  }
  0xf8   : > { %3193 = vmatpush2.bf16.msra.mxu1 %v4542_v15  ;;  %v4608_v15 = vld [vmem:[%s4883_s25 + $0x834] ss:$8 sps:$4 sm:$0xff]  }
  0xf9   : > { %3194 = vmatprep.subr.bf16.mxu1 %v4550_v16  ;;  %v4603_v16 = vld [vmem:[%s4883_s25 + $0x940] ss:$8 sps:$4 sm:$0xff]  }
  0xfa   : > { %3154 = vmatpush2.bf16.msra.mxu0 %v4545_v17  ;;  %v4611_v17 = vld [vmem:[%s4883_s25 + $0x934] ss:$8 sps:$4 sm:$0xff]  }
  0xfb   : > { %3155 = vmatprep.subr.bf16.mxu0 %v4553_v18  ;;  %v4606_v18 = vld [vmem:[%s4883_s25 + $0x830] ss:$8 sps:$4 sm:$0xff]  }
  0xfc   : > { %3195 = vmatpush2.bf16.msra.mxu1 %v4548_v19  ;;  %v4614_v19 = vld [vmem:[%s4883_s25 + $0x824] ss:$8 sps:$4 sm:$0xff]  }
  0xfd   : > { %3196 = vmatprep.subr.bf16.mxu1 %v4556_v20  ;;  %v4609_v20 = vld [vmem:[%s4883_s25 + $0x930] ss:$8 sps:$4 sm:$0xff]  }
  0xfe   : > { %3156 = vmatpush2.bf16.msra.mxu0 %v4551_v21  ;;  %v4617_v21 = vld [vmem:[%s4883_s25 + $0x924] ss:$8 sps:$4 sm:$0xff]  }
  0xff   : > { %3157 = vmatprep.subr.bf16.mxu0 %v4559_v22  ;;  %v4612_v22 = vld [vmem:[%s4883_s25 + $0x820] ss:$8 sps:$4 sm:$0xff]  }
 0x100   : > { %3197 = vmatpush2.bf16.msra.mxu1 %v4554_v23  ;;  %v4620_v23 = vld [vmem:[%s4883_s25 + $0x814] ss:$8 sps:$4 sm:$0xff]  }
 0x101   : > { %3198 = vmatprep.subr.bf16.mxu1 %v4562_v25  ;;  %v4615_v25 = vld [vmem:[%s4883_s25 + $0x920] ss:$8 sps:$4 sm:$0xff]  }
 0x102   : > { %3158 = vmatpush2.bf16.msra.mxu0 %v4557_v26  ;;  %v4623_v26 = vld [vmem:[%s4883_s25 + $0x914] ss:$8 sps:$4 sm:$0xff]  }
 0x103   : > { %3159 = vmatprep.subr.bf16.mxu0 %v4565_v27  ;;  %v4618_v27 = vld [vmem:[%s4883_s25 + $0x810] ss:$8 sps:$4 sm:$0xff]  }
 0x104   : > { %3199 = vmatpush2.bf16.msra.mxu1 %v4560_v28  ;;  %v4626_v28 = vld [vmem:[%s4883_s25 + $0x804] ss:$8 sps:$4 sm:$0xff]  }
 0x105   : > { %3200 = vmatprep.subr.bf16.mxu1 %v4568_v29  ;;  %v4621_v29 = vld [vmem:[%s4883_s25 + $0x910] ss:$8 sps:$4 sm:$0xff]  }
 0x106   : > { %3160 = vmatpush2.bf16.msra.mxu0 %v4563_v31  ;;  %v4629_v31 = vld [vmem:[%s4883_s25 + $0x904] ss:$8 sps:$4 sm:$0xff]  }
 0x107   : > { %3161 = vmatprep.subr.bf16.mxu0 %v4571_v32  ;;  %v4624_v32 = vld [vmem:[%s4883_s25 + $0x800] ss:$8 sps:$4 sm:$0xff]  }
 0x108   : > { %3201 = vmatpush2.bf16.msra.mxu1 %v4566_v33  ;;  %v4632_v33 = vld [vmem:[%s4883_s25 + $0x8f4] ss:$8 sps:$4 sm:$0xff]  }
 0x109   : > { %3202 = vmatprep.subr.bf16.mxu1 %v4574_v35  ;;  %v4627_v35 = vld [vmem:[%s4883_s25 + $0x900] ss:$8 sps:$4 sm:$0xff]  }
 0x10a   : > { %3162 = vmatpush2.bf16.msra.mxu0 %v4569_v36  ;;  %v4635_v36 = vld [vmem:[%s4883_s25 + $0x9f4] ss:$8 sps:$4 sm:$0xff]  }
 0x10b   : > { %3163 = vmatprep.subr.bf16.mxu0 %v4577_v37  ;;  %v4630_v37 = vld [vmem:[%s4883_s25 + $0x8f0] ss:$8 sps:$4 sm:$0xff]  }
 0x10c   : > { %3203 = vmatpush2.bf16.msra.mxu1 %v4572_v38  ;;  %v4638_v38 = vld [vmem:[%s4883_s25 + $0x8e4] ss:$8 sps:$4 sm:$0xff]  }
 0x10d   : > { %3204 = vmatprep.subr.bf16.mxu1 %v4580_v40  ;;  %v4641_v40 = vld [vmem:[%s4883_s25 + $0x9e4] ss:$8 sps:$4 sm:$0xff]  }
 0x10e   : > { %3164 = vmatpush2.bf16.msra.mxu0 %v4575_v5  ;;  %v4636_v5 = vld [vmem:[%s4883_s25 + $0x8e0] ss:$8 sps:$4 sm:$0xff]  }
 0x10f   : > { %3215 = vmatprep.subr.bf16.mxu0 %v4584_v45  ;;  %v4642_v45 = vld [vmem:[%s4883_s25 + $0x8d0] ss:$8 sps:$4 sm:$0xff]  }
 0x110   : > { %3205 = vmatpush2.bf16.msra.mxu1 %v4578_v46  ;;  %v4650_v46 = vld [vmem:[%s4883_s25 + $0x8c4] ss:$8 sps:$4 sm:$0xff]  }
 0x111   : > { %v2921_v57 = vpop.f32.mrf.mxu0  ;;  %3166 = vmatmul.mubr.bf16.vlgmr.msra.gmra.mxu0 %v817_v44  ;;  %3256 = vmatprep.subr.bf16.mxu1 %v4587_v50  ;;  %v4647_v44 = vld [vmem:[%s4883_s25 + $0x9d4] ss:$8 sps:$4 sm:$0xff]   ;;  %v4648_v50 = vld [vmem:[%s4883_s25 + $0x8c0] ss:$8 sps:$4 sm:$0xff]  }
 0x112   : > { %v2922_v59 = vadd.f32 %v2921_v57, %v727_v51  ;;  %3216 = vmatpush1.bf16.msra.mxu0 %v4582_v52  ;;  %3247 = vmatprep.mubr.bf16.mxu0 %v873_v49  ;;  %v4653_v49 = vld [vmem:[%s4883_s25 + $0x9c4] ss:$8 sps:$4 sm:$0xff]   ;;  %v4656_v51 = vld [vmem:[%s4883_s25 + $0x8b4] ss:$8 sps:$4 sm:$0xff]   ;;  %v4651_v52 = vld [vmem:[%s4883_s25 + $0x9c0] ss:$8 sps:$4 sm:$0xff]  }
 0x113   : > { %v2923_v60 = vpop.f32.mrf.mxu0  ;;  %v2962_v61 = vpop.f32.mrf.mxu1  ;;  %3207 = vmatmul.mubr.bf16.vlgmr.msra.gmra.mxu1 %v833_v53  ;;  %3217 = vmatprep.subr.bf16.mxu0 %v4590_v54  ;;  %v4659_v53 = vld [vmem:[%s4883_s25 + $0x9b4] ss:$8 sps:$4 sm:$0xff]   ;;  %v4654_v54 = vld [vmem:[%s4883_s25 + $0x8b0] ss:$8 sps:$4 sm:$0xff]   ;;  %v4665_v57 = vld [vmem:[%s4883_s25 + $0x9a4] ss:$8 sps:$4 sm:$0xff]  }
 0x114   : > { %v2924_v63 = vadd.f32 %v2923_v60, %v731_v24  ;;  %v5212_v0 = vadd.f32 %v2962_v61, %v2922_v59  ;;  %3257 = vmatpush1.bf16.msra.mxu1 %v4585_v55  ;;  %3288 = vmatprep.mubr.bf16.mxu1 %v883_v56  ;;  %v4662_v24 = vld [vmem:[%s4883_s25 + $0x8a4] ss:$8 sps:$4 sm:$0xff]   ;;  %v4657_v55 = vld [vmem:[%s4883_s25 + $0x9b0] ss:$8 sps:$4 sm:$0xff]   ;;  %v836_v56 = vcombine.high %v5175_v30, %v5175_v30  ;;  %v4663_v59 = vld [vmem:[%s4883_s25 + $0x9a0] ss:$8 sps:$4 sm:$0xff]  }
 0x115   : > { %v2925_v2 = vpop.f32.mrf.mxu0  ;;  %v2964_v3 = vpop.f32.mrf.mxu1  ;;  %3258 = vmatprep.subr.bf16.mxu1 %v4593_v58  ;;  %v4668_v58 = vld [vmem:[%s4883_s25 + $0x894] ss:$8 sps:$4 sm:$0xff]   ;;  %v4666_v30 = vld [vmem:[%s4883_s25 + $0x890] ss:$8 sps:$4 sm:$0xff]  }
 0x116   : > { %v5216_v6 = vadd.f32 %v2964_v3, %v2924_v63  ;;  %3218 = vmatpush1.bf16.msra.mxu0 %v4588_v42  ;;  %v4660_v42 = vld [vmem:[%s4883_s25 + $0x8a0] ss:$8 sps:$4 sm:$0xff]   ;;  %v5268_v60 = vrot.slane %v836_v56, %v4937_v48  ;;  %v4671_v61 = vld [vmem:[%s4883_s25 + $0x994] ss:$8 sps:$4 sm:$0xff]   ;;  %v4669_v63 = vld [vmem:[%s4883_s25 + $0x990] ss:$8 sps:$4 sm:$0xff]  }
 0x117   : > { %v2926_v8 = vpop.f32.mrf.mxu0  ;;  %3219 = vmatprep.subr.bf16.mxu0 %v4596_v62  ;;  %v2966_v10 = vpop.f32.mrf.mxu1  ;;  %v4674_v62 = vld [vmem:[%s4883_s25 + $0x884] ss:$8 sps:$4 sm:$0xff]   ;;  %v4672_v3 = vld [vmem:[%s4883_s25 + $0x880] ss:$8 sps:$4 sm:$0xff]   ;;  %v4731_v56 = vld [vmem:[%s4883_s25 + $0xbf4] ss:$8 sps:$4 sm:$0xff]  }
 0x118   : > { %3259 = vmatpush1.bf16.msra.mxu1 %v4591_v1  ;;  %v852_v1 = vcombine.high %v5268_v60, %v5268_v60  ;;  %v4677_v2 = vld [vmem:[%s4883_s25 + $0x984] ss:$8 sps:$4 sm:$0xff]   ;;  %v4675_v8 = vld [vmem:[%s4883_s25 + $0x980] ss:$8 sps:$4 sm:$0xff]   ;;  %v4683_v10 = vld [vmem:[%s4883_s25 + $0xb74] ss:$8 sps:$4 sm:$0xff]  }
 0x119   : > { %3260 = vmatprep.subr.bf16.mxu1 %v4599_v4  ;;  %v2967_v13 = vpop.f32.mrf.mxu1  ;;  %v859_v4 = vrot.slane %v5183_v34, %v4937_v48  ;;  %v4689_v34 = vld [vmem:[%s4883_s25 + $0xb64] ss:$8 sps:$4 sm:$0xff]  }
 0x11a   : > { %3220 = vmatpush1.bf16.msra.mxu0 %v4594_v7  ;;  %v4680_v7 = vld [vmem:[%s4883_s25 + $0xa74] ss:$8 sps:$4 sm:$0xff]   ;;  %v4686_v13 = vld [vmem:[%s4883_s25 + $0xa64] ss:$8 sps:$4 sm:$0xff]  }
 0x11b   : > { %3221 = vmatprep.subr.bf16.mxu0 %v4602_v9  ;;  %v880_v9 = vrot.slane %v852_v1, %v4937_v48  ;;  %v4738_v1 = vld [vmem:[%s4883_s25 + $0xad0] ss:$8 sps:$4 sm:$0xff]  }
 0x11c   : > { %3261 = vmatpush1.bf16.msra.mxu1 %v4597_v11  ;;  %v4678_v11 = vld [vmem:[%s4883_s25 + $0xa70] ss:$8 sps:$4 sm:$0xff]  }
 0x11d   : > { %3262 = vmatprep.subr.bf16.mxu1 %v4605_v12  ;;  %v881_v12 = vcombine.high %v859_v4, %v859_v4 }
 0x11e   : > { %3222 = vmatpush1.bf16.msra.mxu0 %v4600_v14  ;;  %v4681_v14 = vld [vmem:[%s4883_s25 + $0xb70] ss:$8 sps:$4 sm:$0xff]  }
 0x11f   : > { %3223 = vmatprep.subr.bf16.mxu0 %v4608_v15  ;;  %v884_v15 = vcombine.high %v880_v9, %v880_v9 }
 0x120   : > { %3263 = vmatpush1.bf16.msra.mxu1 %v4603_v16 }
 0x121   : > { %3264 = vmatprep.subr.bf16.mxu1 %v4611_v17 }
 0x122   : > { %3224 = vmatpush1.bf16.msra.mxu0 %v4606_v18  ;;  %v4684_v18 = vld [vmem:[%s4883_s25 + $0xa60] ss:$8 sps:$4 sm:$0xff]  }
 0x123   : > { %3225 = vmatprep.subr.bf16.mxu0 %v4614_v19 }
 0x124   : > { %3265 = vmatpush1.bf16.msra.mxu1 %v4609_v20 }
 0x125   : > { %3266 = vmatprep.subr.bf16.mxu1 %v4617_v21  ;;  %v4692_v21 = vld [vmem:[%s4883_s25 + $0xa54] ss:$8 sps:$4 sm:$0xff]  }
 0x126   : > { %3226 = vmatpush1.bf16.msra.mxu0 %v4612_v22 }
 0x127   : > { %3227 = vmatprep.subr.bf16.mxu0 %v4620_v23 }
 0x128   : > { %3267 = vmatpush1.bf16.msra.mxu1 %v4615_v25  ;;  %v4687_v25 = vld [vmem:[%s4883_s25 + $0xb60] ss:$8 sps:$4 sm:$0xff]  }
 0x129   : > { %3268 = vmatprep.subr.bf16.mxu1 %v4623_v26 }
 0x12a   : > { %3228 = vmatpush1.bf16.msra.mxu0 %v4618_v27  ;;  %v4695_v27 = vld [vmem:[%s4883_s25 + $0xb54] ss:$8 sps:$4 sm:$0xff]  }
 0x12b   : > { %3229 = vmatprep.subr.bf16.mxu0 %v4626_v28 }
 0x12c   : > { %3269 = vmatpush1.bf16.msra.mxu1 %v4621_v29  ;;  %v4690_v29 = vld [vmem:[%s4883_s25 + $0xa50] ss:$8 sps:$4 sm:$0xff]  }
 0x12d   : > { %3270 = vmatprep.subr.bf16.mxu1 %v4629_v31 }
 0x12e   : > { %3230 = vmatpush1.bf16.msra.mxu0 %v4624_v32 }
 0x12f   : > { %3231 = vmatprep.subr.bf16.mxu0 %v4632_v33  ;;  %v4693_v33 = vld [vmem:[%s4883_s25 + $0xb50] ss:$8 sps:$4 sm:$0xff]  }
 0x130   : > { %3271 = vmatpush1.bf16.msra.mxu1 %v4627_v35  ;;  %v4701_v35 = vld [vmem:[%s4883_s25 + $0xb44] ss:$8 sps:$4 sm:$0xff]  }
 0x131   : > { %3272 = vmatprep.subr.bf16.mxu1 %v4635_v36 }
 0x132   : > { %3232 = vmatpush2.bf16.msra.mxu0 %v4630_v37  ;;  %v4696_v37 = vld [vmem:[%s4883_s25 + $0xa40] ss:$8 sps:$4 sm:$0xff]  }
 0x133   : > { %3233 = vmatprep.subr.bf16.mxu0 %v4638_v38  ;;  %v4704_v38 = vld [vmem:[%s4883_s25 + $0xa34] ss:$8 sps:$4 sm:$0xff]  }
 0x134   : > { %3273 = vmatpush2.bf16.msra.mxu1 %v4633_v39  ;;  %v4699_v39 = vld [vmem:[%s4883_s25 + $0xb40] ss:$8 sps:$4 sm:$0xff]  }
 0x135   : > { %3274 = vmatprep.subr.bf16.mxu1 %v4641_v40  ;;  %v4707_v40 = vld [vmem:[%s4883_s25 + $0xb34] ss:$8 sps:$4 sm:$0xff]  }
 0x136   : > { %3234 = vmatpush2.bf16.msra.mxu0 %v4636_v5  ;;  %v4702_v5 = vld [vmem:[%s4883_s25 + $0xa30] ss:$8 sps:$4 sm:$0xff]  }
 0x137   : > { %3235 = vmatprep.subr.bf16.mxu0 %v4644_v41  ;;  %v4710_v41 = vld [vmem:[%s4883_s25 + $0xa24] ss:$8 sps:$4 sm:$0xff]  }
 0x138   : > { %3275 = vmatpush2.bf16.msra.mxu1 %v4639_v43  ;;  %v4705_v43 = vld [vmem:[%s4883_s25 + $0xb30] ss:$8 sps:$4 sm:$0xff]  }
 0x139   : > { %3276 = vmatprep.subr.bf16.mxu1 %v4647_v44  ;;  %v4713_v44 = vld [vmem:[%s4883_s25 + $0xb24] ss:$8 sps:$4 sm:$0xff]  }
 0x13a   : > { %3236 = vmatpush2.bf16.msra.mxu0 %v4642_v45  ;;  %v4708_v45 = vld [vmem:[%s4883_s25 + $0xa20] ss:$8 sps:$4 sm:$0xff]  }
 0x13b   : > { %3237 = vmatprep.subr.bf16.mxu0 %v4650_v46  ;;  %v4716_v46 = vld [vmem:[%s4883_s25 + $0xa14] ss:$8 sps:$4 sm:$0xff]  }
 0x13c   : > { %3277 = vmatpush2.bf16.msra.mxu1 %v4645_v47  ;;  %v4711_v47 = vld [vmem:[%s4883_s25 + $0xb20] ss:$8 sps:$4 sm:$0xff]  }
 0x13d   : > { %3278 = vmatprep.subr.bf16.mxu1 %v4653_v49  ;;  %v4719_v49 = vld [vmem:[%s4883_s25 + $0xb14] ss:$8 sps:$4 sm:$0xff]  }
 0x13e   : > { %3238 = vmatpush2.bf16.msra.mxu0 %v4648_v50  ;;  %v4714_v50 = vld [vmem:[%s4883_s25 + $0xa10] ss:$8 sps:$4 sm:$0xff]  }
 0x13f   : > { %3239 = vmatprep.subr.bf16.mxu0 %v4656_v51  ;;  %v4722_v51 = vld [vmem:[%s4883_s25 + $0xa04] ss:$8 sps:$4 sm:$0xff]  }
 0x140   : > { %3279 = vmatpush2.bf16.msra.mxu1 %v4651_v52  ;;  %v4717_v52 = vld [vmem:[%s4883_s25 + $0xb10] ss:$8 sps:$4 sm:$0xff]  }
 0x141   : > { %3280 = vmatprep.subr.bf16.mxu1 %v4659_v53  ;;  %v4725_v53 = vld [vmem:[%s4883_s25 + $0xb04] ss:$8 sps:$4 sm:$0xff]  }
 0x142   : > { %3240 = vmatpush2.bf16.msra.mxu0 %v4654_v54  ;;  %v4720_v54 = vld [vmem:[%s4883_s25 + $0xa00] ss:$8 sps:$4 sm:$0xff]  }
 0x143   : > { %3241 = vmatprep.subr.bf16.mxu0 %v4662_v24  ;;  %v4728_v24 = vld [vmem:[%s4883_s25 + $0xaf4] ss:$8 sps:$4 sm:$0xff]  }
 0x144   : > { %3281 = vmatpush2.bf16.msra.mxu1 %v4657_v55  ;;  %v4723_v55 = vld [vmem:[%s4883_s25 + $0xb00] ss:$8 sps:$4 sm:$0xff]  }
 0x145   : > { %3282 = vmatprep.subr.bf16.mxu1 %v4665_v57  ;;  %v4726_v57 = vld [vmem:[%s4883_s25 + $0xaf0] ss:$8 sps:$4 sm:$0xff]  }
 0x146   : > { %3242 = vmatpush2.bf16.msra.mxu0 %v4660_v42  ;;  %v4734_v42 = vld [vmem:[%s4883_s25 + $0xae4] ss:$8 sps:$4 sm:$0xff]  }
 0x147   : > { %3243 = vmatprep.subr.bf16.mxu0 %v4668_v58  ;;  %v4729_v58 = vld [vmem:[%s4883_s25 + $0xbf0] ss:$8 sps:$4 sm:$0xff]  }
 0x148   : > { %3283 = vmatpush2.bf16.msra.mxu1 %v4663_v59  ;;  %v4737_v59 = vld [vmem:[%s4883_s25 + $0xbe4] ss:$8 sps:$4 sm:$0xff]  }
 0x149   : > { %3284 = vmatprep.subr.bf16.mxu1 %v4671_v61  ;;  %v4732_v61 = vld [vmem:[%s4883_s25 + $0xae0] ss:$8 sps:$4 sm:$0xff]  }
 0x14a   : > { %3244 = vmatpush2.bf16.msra.mxu0 %v4666_v30  ;;  %v4740_v30 = vld [vmem:[%s4883_s25 + $0xad4] ss:$8 sps:$4 sm:$0xff]  }
 0x14b   : > { %3245 = vmatprep.subr.bf16.mxu0 %v4674_v62  ;;  %v4735_v62 = vld [vmem:[%s4883_s25 + $0xbe0] ss:$8 sps:$4 sm:$0xff]  }
 0x14c   : > { %3285 = vmatpush2.bf16.msra.mxu1 %v4669_v63  ;;  %v4743_v63 = vld [vmem:[%s4883_s25 + $0xbd4] ss:$8 sps:$4 sm:$0xff]  }
 0x14d   : > { %3286 = vmatprep.subr.bf16.mxu1 %v4677_v2  ;;  %v4746_v2 = vld [vmem:[%s4883_s25 + $0xac4] ss:$8 sps:$4 sm:$0xff]  }
 0x14e   : > { %3246 = vmatpush2.bf16.msra.mxu0 %v4672_v3  ;;  %v4741_v3 = vld [vmem:[%s4883_s25 + $0xbd0] ss:$8 sps:$4 sm:$0xff]  }
 0x14f   : > { %3297 = vmatprep.subr.bf16.mxu0 %v4680_v7  ;;  %v4744_v7 = vld [vmem:[%s4883_s25 + $0xac0] ss:$8 sps:$4 sm:$0xff]  }
 0x150   : > { %3287 = vmatpush2.bf16.msra.mxu1 %v4675_v8  ;;  %v4752_v8 = vld [vmem:[%s4883_s25 + $0xab4] ss:$8 sps:$4 sm:$0xff]  }
 0x151   : > { %v3003_v16 = vpop.f32.mrf.mxu0  ;;  %3248 = vmatmul.mubr.bf16.vlgmr.msra.gmra.mxu0 %v859_v4  ;;  %3338 = vmatprep.subr.bf16.mxu1 %v4683_v10  ;;  %v4749_v4 = vld [vmem:[%s4883_s25 + $0xbc4] ss:$8 sps:$4 sm:$0xff]   ;;  %v4755_v10 = vld [vmem:[%s4883_s25 + $0xbb4] ss:$8 sps:$4 sm:$0xff]  }
 0x152   : > { %v3004_v17 = vadd.f32 %v3003_v16, %v5212_v0  ;;  %3298 = vmatpush1.bf16.msra.mxu0 %v4678_v11  ;;  %3329 = vmatprep.mubr.bf16.mxu0 %v880_v9  ;;  %v4747_v9 = vld [vmem:[%s4883_s25 + $0xbc0] ss:$8 sps:$4 sm:$0xff]   ;;  %v4750_v11 = vld [vmem:[%s4883_s25 + $0xab0] ss:$8 sps:$4 sm:$0xff]   ;;  %v4764_v16 = vld [vmem:[%s4883_s25 + $0xa94] ss:$8 sps:$4 sm:$0xff]  }
 0x153   : > { %v3005_v19 = vpop.f32.mrf.mxu0  ;;  %v3044_v20 = vpop.f32.mrf.mxu1  ;;  %3289 = vmatmul.mubr.bf16.vlgmr.msra.gmra.mxu1 %v881_v12  ;;  %3299 = vmatprep.subr.bf16.mxu0 %v4686_v13  ;;  %v4758_v12 = vld [vmem:[%s4883_s25 + $0xaa4] ss:$8 sps:$4 sm:$0xff]   ;;  %v4753_v13 = vld [vmem:[%s4883_s25 + $0xbb0] ss:$8 sps:$4 sm:$0xff]  }
 0x154   : > { %v3006_v22 = vadd.f32 %v3005_v19, %v5216_v6  ;;  %v5292_v23 = vadd.f32 %v3044_v20, %v3004_v17  ;;  %3339 = vmatpush1.bf16.msra.mxu1 %v4681_v14  ;;  %3370 = vmatprep.mubr.bf16.mxu1 %v884_v15  ;;  %v4698_v6 = vld [vmem:[%s4883_s25 + $0xa44] ss:$8 sps:$4 sm:$0xff]   ;;  %v4756_v15 = vld [vmem:[%s4883_s25 + $0xaa0] ss:$8 sps:$4 sm:$0xff]   ;;  %v4767_v17 = vld [vmem:[%s4883_s25 + $0xb94] ss:$8 sps:$4 sm:$0xff]  }
 0x155   : > { %v3007_v0 = vpop.f32.mrf.mxu0  ;;  %v3046_v26 = vpop.f32.mrf.mxu1  ;;  %3340 = vmatprep.subr.bf16.mxu1 %v4689_v34  ;;  %v4761_v14 = vld [vmem:[%s4883_s25 + $0xba4] ss:$8 sps:$4 sm:$0xff]   ;;  %v4759_v34 = vld [vmem:[%s4883_s25 + $0xba0] ss:$8 sps:$4 sm:$0xff]   ;;  %v4765_v20 = vld [vmem:[%s4883_s25 + $0xb90] ss:$8 sps:$4 sm:$0xff]  }
 0x156   : > { %v5296_v28 = vadd.f32 %v3046_v26, %v3006_v22  ;;  %3300 = vmatpush1.bf16.msra.mxu0 %v4684_v18  ;;  %v4762_v18 = vld [vmem:[%s4883_s25 + $0xa90] ss:$8 sps:$4 sm:$0xff]   ;;  %v4770_v19 = vld [vmem:[%s4883_s25 + $0xa84] ss:$8 sps:$4 sm:$0xff]   ;;  %v4768_v22 = vld [vmem:[%s4883_s25 + $0xa80] ss:$8 sps:$4 sm:$0xff]  }
 0x157   : > { %v3008_v31 = vpop.f32.mrf.mxu0  ;;  %3301 = vmatprep.subr.bf16.mxu0 %v4692_v21  ;;  %v3048_v32 = vpop.f32.mrf.mxu1  ;;  %v4773_v21 = vld [vmem:[%s4883_s25 + $0xb84] ss:$8 sps:$4 sm:$0xff]   ;;  %v4777_v0 = vld [vmem:[%s4883_s25 + $0xc34] ss:$8 sps:$4 sm:$0xff]   ;;  %v4771_v26 = vld [vmem:[%s4883_s25 + $0xb80] ss:$8 sps:$4 sm:$0xff]  }
 0x158   : > { %3341 = vmatpush1.bf16.msra.mxu1 %v4687_v25  ;;  %v866_v25 = vrot.slane %v5268_v60, %v4937_v48  ;;  %v4780_v31 = vld [vmem:[%s4883_s25 + $0xc24] ss:$8 sps:$4 sm:$0xff]  }
 0x159   : > { %3342 = vmatprep.subr.bf16.mxu1 %v4695_v27  ;;  %v3049_v36 = vpop.f32.mrf.mxu1  ;;  %v4775_v27 = vld [vmem:[%s4883_s25 + $0xc30] ss:$8 sps:$4 sm:$0xff]  }
 0x15a   : > { %3302 = vmatpush1.bf16.msra.mxu0 %v4690_v29  ;;  %v882_v29 = vcombine.high %v866_v25, %v866_v25 }
 0x15b   : > { %3303 = vmatprep.subr.bf16.mxu0 %v4698_v6 }
 0x15c   : > { %3343 = vmatpush1.bf16.msra.mxu1 %v4693_v33  ;;  %v4778_v33 = vld [vmem:[%s4883_s25 + $0xc20] ss:$8 sps:$4 sm:$0xff]  }
 0x15d   : > { %3344 = vmatprep.subr.bf16.mxu1 %v4701_v35  ;;  %v4828_v35 = vmov 0  }
 0x15e   : > { %3304 = vmatpush1.bf16.msra.mxu0 %v4696_v37  ;;  %v4783_v37 = vld [vmem:[%s4883_s25 + $0xc14] ss:$8 sps:$4 sm:$0xff]  }
 0x15f   : > { %3305 = vmatprep.subr.bf16.mxu0 %v4704_v38 }
 0x160   : > { %3345 = vmatpush1.bf16.msra.mxu1 %v4699_v39 }
 0x161   : > { %3346 = vmatprep.subr.bf16.mxu1 %v4707_v40 }
 0x162   : > { %3306 = vmatpush1.bf16.msra.mxu0 %v4702_v5 }
 0x163   : > { %3307 = vmatprep.subr.bf16.mxu0 %v4710_v41  ;;  %v4781_v41 = vld [vmem:[%s4883_s25 + $0xc10] ss:$8 sps:$4 sm:$0xff]  }
 0x164   : > { %3347 = vmatpush1.bf16.msra.mxu1 %v4705_v43 }
 0x165   : > { %3348 = vmatprep.subr.bf16.mxu1 %v4713_v44  ;;  %v4786_v44 = vld [vmem:[%s4883_s25 + $0xc04] ss:$8 sps:$4 sm:$0xff]  }
 0x166   : > { %3308 = vmatpush1.bf16.msra.mxu0 %v4708_v45 }
 0x167   : > { %3309 = vmatprep.subr.bf16.mxu0 %v4716_v46 }
 0x168   : > { %3349 = vmatpush1.bf16.msra.mxu1 %v4711_v47  ;;  %v4784_v47 = vld [vmem:[%s4883_s25 + $0xc00] ss:$8 sps:$4 sm:$0xff]  }
 0x169   : > { %3350 = vmatprep.subr.bf16.mxu1 %v4719_v49  ;;  %v3732_v49 = vld.sshfl [vmem:[%s4934_s29 + $0x18] sm:$0x1 pattern:$0x75316420] }
 0x16a   : > { %3310 = vmatpush1.bf16.msra.mxu0 %v4714_v50  ;;  %v4788_v50 = vld [vmem:[%s5369_s12 + $0x38] sm:$0xff]  }
 0x16b   : > { %3311 = vmatprep.subr.bf16.mxu0 %v4722_v51  ;;  %v898_v51 = vrot.slane %v3732_v49, %v4937_v48 }
 0x16c   : > { %3351 = vmatpush1.bf16.msra.mxu1 %v4717_v52  ;;  %v4789_v52 = vld [vmem:[%s5369_s12 + $0x70] sm:$0xff]  }
 0x16d   : > { %3352 = vmatprep.subr.bf16.mxu1 %v4725_v53  ;;  %v4790_v53 = vld [vmem:[%s5369_s12 + $0x30] sm:$0xff]  }
 0x16e   : > { %3312 = vmatpush1.bf16.msra.mxu0 %v4720_v54 }
 0x16f   : > { %3313 = vmatprep.subr.bf16.mxu0 %v4728_v24  ;;  %v4791_v24 = vld [vmem:[%s5369_s12 + $0x68] sm:$0xff]  }
 0x170   : > { %3353 = vmatpush1.bf16.msra.mxu1 %v4723_v55 }
 0x171   : > { %3354 = vmatprep.subr.bf16.mxu1 %v4731_v56  ;;  %v4792_v56 = vld [vmem:[%s5369_s12 + $0x28] sm:$0xff]  }
 0x172   : > { %3314 = vmatpush2.bf16.msra.mxu0 %v4726_v57 }
 0x173   : > { %3315 = vmatprep.subr.bf16.mxu0 %v4734_v42 }
 0x174   : > { %3355 = vmatpush2.bf16.msra.mxu1 %v4729_v58 }
 0x175   : > { %3356 = vmatprep.subr.bf16.mxu1 %v4737_v59 }
 0x176   : > { %3316 = vmatpush2.bf16.msra.mxu0 %v4732_v61 }
 0x177   : > { %3317 = vmatprep.subr.bf16.mxu0 %v4740_v30  ;;  %v4793_v30 = vld [vmem:[%s5369_s12 + $0x60] sm:$0xff]  }
 0x178   : > { %3357 = vmatpush2.bf16.msra.mxu1 %v4735_v62 }
 0x179   : > { %3358 = vmatprep.subr.bf16.mxu1 %v4743_v63  ;;  %v4794_v63 = vld [vmem:[%s5369_s12 + $0x20] sm:$0xff]  }
 0x17a   : > { %3318 = vmatpush2.bf16.msra.mxu0 %v4738_v1 }
 0x17b   : > { %3319 = vmatprep.subr.bf16.mxu0 %v4746_v2 }
 0x17c   : > { %3359 = vmatpush2.bf16.msra.mxu1 %v4741_v3  ;;  %v4795_v3 = vld [vmem:[%s5369_s12 + $0x58] sm:$0xff]  }
 0x17d   : > { %3360 = vmatprep.subr.bf16.mxu1 %v4749_v4  ;;  %v4796_v4 = vld [vmem:[%s5369_s12 + $0x18] sm:$0xff]  }
 0x17e   : > { %3320 = vmatpush2.bf16.msra.mxu0 %v4744_v7 }
 0x17f   : > { %3321 = vmatprep.subr.bf16.mxu0 %v4752_v8  ;;  %v4797_v8 = vld [vmem:[%s5369_s12 + $0x50] sm:$0xff]  }
 0x180   : > { %3361 = vmatpush2.bf16.msra.mxu1 %v4747_v9  ;;  %v4798_v9 = vld [vmem:[%s5369_s12 + $0x10] sm:$0xff]  }
 0x181   : > { %3362 = vmatprep.subr.bf16.mxu1 %v4755_v10  ;;  %v4799_v10 = vld [vmem:[%s5369_s12 + $0x48] sm:$0xff]  }
 0x182   : > { %3322 = vmatpush2.bf16.msra.mxu0 %v4750_v11  ;;  %v4800_v11 = vld [vmem:[%s5369_s12 + $0x8] sm:$0xff]  }
 0x183   : > { %3323 = vmatprep.subr.bf16.mxu0 %v4758_v12  ;;  %v4801_v12 = vld [vmem:[%s5369_s12 + $0x40] sm:$0xff]  }
 0x184   : > { %3363 = vmatpush2.bf16.msra.mxu1 %v4753_v13  ;;  %v4802_v13 = vld [vmem:[%s5369_s12] sm:$0xff]  }
 0x185   : > { %3364 = vmatprep.subr.bf16.mxu1 %v4761_v14 }
 0x186   : > { %3324 = vmatpush2.bf16.msra.mxu0 %v4756_v15 }
 0x187   : > { %3325 = vmatprep.subr.bf16.mxu0 %v4764_v16 }
 0x188   : > { %3365 = vmatpush2.bf16.msra.mxu1 %v4759_v34 }
 0x189   : > { %3366 = vmatprep.subr.bf16.mxu1 %v4767_v17 }
 0x18a   : > { %3326 = vmatpush2.bf16.msra.mxu0 %v4762_v18 }
 0x18b   : > { %3327 = vmatprep.subr.bf16.mxu0 %v4770_v19 }
 0x18c   : > { %3367 = vmatpush2.bf16.msra.mxu1 %v4765_v20 }
 0x18d   : > { %3368 = vmatprep.subr.bf16.mxu1 %v4773_v21 }
 0x18e   : > { %3328 = vmatpush2.bf16.msra.mxu0 %v4768_v22 }
 0x18f   : > { %3387 = vmatprep.subr.bf16.mxu0 %v4777_v0 }
 0x190   : > { %3369 = vmatpush2.bf16.msra.mxu1 %v4771_v26 }
 0x191   : > { %v3085_v6 = vpop.f32.mrf.mxu0  ;;  %3330 = vmatmul.mubr.bf16.vlgmr.msra.gmra.mxu0 %v866_v25 }
 0x192   : > { %v3086_v32 = vadd.f32 %v3085_v6, %v5292_v23  ;;  %3388 = vmatpush1.bf16.msra.mxu0 %v4775_v27  ;;  %3411 = vmatprep.mubr.bf16.mxu0 %v4828_v35 }
 0x193   : > { %v3087_v60 = vpop.f32.mrf.mxu0  ;;  %v3126_v36 = vpop.f32.mrf.mxu1  ;;  %3371 = vmatmul.mubr.bf16.vlgmr.msra.gmra.mxu1 %v882_v29  ;;  %3389 = vmatprep.subr.bf16.mxu0 %v4780_v31 }
 0x194   : > { %v3088_v38 = vadd.f32 %v3087_v60, %v5296_v28  ;;  %v3127_v39 = vadd.f32 %v3126_v36, %v3086_v32  ;;  %v4787_v28 = vld [vmem:[%s5369_s12 + $0x78] sm:$0xff]  }
 0x195   : > { %v3089_v40 = vpop.f32.mrf.mxu0  ;;  %v3128_v5 = vpop.f32.mrf.mxu1  ;;  %4146 = vmatprep.subr.bf16.mxu1 %v4787_v28  ;;  %v4126_v28 = vld [vmem:[%s317_s15] ss:$0 sm:$0xff] }
 0x196   : > { %v3129_v23 = vadd.f32 %v3128_v5, %v3088_v38  ;;  %3390 = vmatpush1.bf16.msra.mxu0 %v4778_v33  ;;  %4147 = vmatpush3.bf16.msra.mxu1 %v4788_v50 }
 0x197   : > { %v3090_v43 = vpop.f32.mrf.mxu0  ;;  %3391 = vmatprep.subr.bf16.mxu0 %v4783_v37  ;;  %v3130_v45 = vpop.f32.mrf.mxu1  ;;  %4148 = vmatprep.subr.bf16.mxu1 %v4789_v52 }
 0x199   : > { %v3131_v46 = vpop.f32.mrf.mxu1 }
 0x19a   : > { %3392 = vmatpush1.bf16.msra.mxu0 %v4781_v41  ;;  %4149 = vmatpush3.bf16.msra.mxu1 %v4790_v53 }
 0x19b   : > { %3393 = vmatprep.subr.bf16.mxu0 %v4786_v44  ;;  %4150 = vmatprep.subr.bf16.mxu1 %v4791_v24 }
 0x19e   : > { %3394 = vmatpush1.bf16.msra.mxu0 %v4784_v47  ;;  %4151 = vmatpush3.bf16.msra.mxu1 %v4792_v56 }
 0x19f   : > { %4152 = vmatprep.subr.bf16.mxu1 %v4793_v30 }
 0x1a1   : > { %4125 = vmatmul.mubr.msk.bf16.vlgmr.msra.gmra.mxu0 %vm2883_vm0, %v898_v51 }
 0x1a2   : > { %4153 = vmatpush3.bf16.msra.mxu1 %v4794_v63 }
 0x1a3   : > { %4154 = vmatprep.subr.bf16.mxu1 %v4795_v3 }
 0x1a6   : > { %4155 = vmatpush3.bf16.msra.mxu1 %v4796_v4 }
 0x1a7   : > { %4156 = vmatprep.subr.bf16.mxu1 %v4797_v8 }
 0x1aa   : > { %4157 = vmatpush3.bf16.msra.mxu1 %v4798_v9 }
 0x1ab   : > { %4158 = vmatprep.subr.bf16.mxu1 %v4799_v10 }
 0x1ae   : > { %4159 = vmatpush3.bf16.msra.mxu1 %v4800_v11 }
 0x1af   : > { %4160 = vmatprep.subr.bf16.mxu1 %v4801_v12 }
 0x1b2   : > { %4161 = vmatpush3.bf16.msra.mxu1 %v4802_v13 }
 0x1d1   : > { %v3167_v54 = vpop.f32.mrf.mxu0 }
 0x1d2   : > { %v3168_v55 = vadd.f32 %v3167_v54, %v3127_v39 }
 0x1d3   : > { %v3169_v57 = vpop.f32.mrf.mxu0  ;;  %v3208_v42 = vpop.f32.mrf.mxu1 }
 0x1d4   : > { %v3170_v48 = vadd.f32 %v3169_v57, %v3129_v23  ;;  %v3209_v58 = vadd.f32 %v3208_v42, %v3168_v55 }
 0x1d5   : > { %v3171_v59 = vpop.f32.mrf.mxu0  ;;  %v3210_v61 = vpop.f32.mrf.mxu1 }
 0x1d6   : > { %v3211_v62 = vadd.f32 %v3210_v61, %v3170_v48 }
 0x1d7   : > { %v3172_v1 = vpop.f32.mrf.mxu0  ;;  %v3212_v2 = vpop.f32.mrf.mxu1 }
 0x1d9   : > { %v3213_v7 = vpop.f32.mrf.mxu1 }
 0x211   : > { %v3249_v14 = vpop.f32.mrf.mxu0 }
 0x212   : > { %v3250_v15 = vadd.f32 %v3249_v14, %v3209_v58 }
 0x213   : > { %v3251_v16 = vpop.f32.mrf.mxu0  ;;  %v3290_v34 = vpop.f32.mrf.mxu1 }
 0x214   : > { %v3252_v17 = vadd.f32 %v3251_v16, %v3211_v62  ;;  %v3291_v18 = vadd.f32 %v3290_v34, %v3250_v15 }
 0x215   : > { %v3253_v19 = vpop.f32.mrf.mxu0  ;;  %v3292_v20 = vpop.f32.mrf.mxu1 }
 0x216   : > { %v3293_v21 = vadd.f32 %v3292_v20, %v3252_v17 }
 0x217   : > { %v3254_v22 = vpop.f32.mrf.mxu0  ;;  %v3294_v25 = vpop.f32.mrf.mxu1 }
 0x219   : > { %v3295_v0 = vpop.f32.mrf.mxu1 }
 0x251   : > { %v3331_v26 = vpop.f32.mrf.mxu0 }
 0x252   : > { %v3332_v60 = vadd.f32 %v3331_v26, %v3291_v18 }
 0x253   : > { %v3333_v27 = vpop.f32.mrf.mxu0  ;;  %v3372_v29 = vpop.f32.mrf.mxu1 }
 0x254   : > { %v3334_v36 = vadd.f32 %v3333_v27, %v3293_v21  ;;  %v3373_v37 = vadd.f32 %v3372_v29, %v3332_v60 }
 0x255   : > { %v3335_v31 = vpop.f32.mrf.mxu0  ;;  %v3374_v6 = vpop.f32.mrf.mxu1 }
 0x256   : > { %v3375_v39 = vadd.f32 %v3374_v6, %v3334_v36 }
 0x257   : > { %v3336_v32 = vpop.f32.mrf.mxu0  ;;  %v3376_v33 = vpop.f32.mrf.mxu1 }
 0x259   : > { %v3377_v35 = vpop.f32.mrf.mxu1 }
 0x261   : > { %v3413_v38 = vpop.f32.mrf.mxu0 }
 0x262   : > { %v3414_v40 = vadd.f32 %v3413_v38, %v3373_v37 }
 0x263   : > { %v3415_v5 = vpop.f32.mrf.mxu0 }
 0x264   : > { %v3416_v23 = vadd.f32 %v3415_v5, %v3375_v39  ;;  %v3420_v41 = vmax.f32 %v3414_v40, 0.0 }
 0x265   : > { %v3417_v43 = vpop.f32.mrf.mxu0 }
 0x266   : > { %v3421_v44 = vmax.f32 %v3416_v23, 0.0  ;;  %v3422_v47 = vpack.c.bf16 %v3420_v41, %v3420_v41 }
 0x267   : > { %v3418_v45 = vpop.f32.mrf.mxu0 }
 0x268   : > { %v3423_v46 = vpack.c.bf16 %v3421_v44, %v3421_v44 }
 0x26a   : > { %3591 = vmatprep.mubr.bf16.mxu1 %v3423_v46 }
 0x26b   : > { %3592 = vmatmul.mubr.bf16.vlgmr.msra.gmra.mxu1 %v3422_v47 }
 0x32b   : > { %v4162_v49 = vpop.f32.mrf.mxu1 }
 0x32d   : > { %v4163_v50 = vpop.f32.mrf.mxu1 }
 0x32e   : > { %v4164_v51 = vadd.f32 %v4163_v50, %v4162_v49 }
 0x32f   : > { %v4165_v52 = vpop.f32.mrf.mxu1 }
 0x330   : > { %v3594_v53 = vadd.f32 %v4164_v51, %v4126_v28 }
 0x331   : > { %v4166_v54 = vpop.f32.mrf.mxu1 }
 0x332   : > { %3599 = vst [vmem:[%s324_s22] sm:$0x3] %v3594_v53 }
 0x333 PF: > { %s15_s20 = sadd.s32 1, %s4825_s20   ;;  %s5412_s18 = smov %s4821_s19 }
 0x334   : > { %p12_p5 = scmp.ge.s32.totalorder %s15_s20, 4   ;;  %s5413_s19 = smov %s5415_s21 }
 0x336   :  { %14 = sbr.rel (!%p12_p5) target bundleno = 2 (0x2), region = 82 }

</bundles_post_ra>
